<compile_context>
chip_gen: v7x
topology: tpu7x:2x2x1
jax: 0.10.0
libtpu: 0.0.40
codegen_flags: <defaults>
</compile_context>

<pallas_src>
import numpy as np

import jax
import jax.numpy as jnp
from jax import lax
from jax.experimental import pallas as pl
from jax.experimental.pallas import tpu as pltpu


# ----------------------------------------------------------------------------
# Pallas kernels
# ----------------------------------------------------------------------------
def _conv1_pool_kernel(x_ref, w1t_ref, b1t_ref, o_ref):
    """Fused conv1(5x5, 1->6) + bias + ReLU + 2x2 maxpool for ONE image.

    x_ref  : (2, 14, 28)   input rows split by parity: x_ref[r, i, :] = x[2i+r, :]
    w1t_ref: (5, 28, 144)  per-kh Toeplitz weights; out col = dx*72 + q*6 + c
    b1t_ref: (1, 72)       bias tiled per (q, c)
    o_ref  : (12, 72)      pooled conv1 (NHWC), col = q*6 + c
    """
    x = x_ref[...]                                   # (2, 14, 28)
    acc0 = jnp.zeros((12, 144), jnp.float32)         # output rows 2p + 0
    acc1 = jnp.zeros((12, 144), jnp.float32)         # output rows 2p + 1
    for kh in range(5):
        w = w1t_ref[kh]                              # (28, 144)
        lhs0 = x[kh % 2, kh // 2:kh // 2 + 12, :]            # rows 2p + 0 + kh
        lhs1 = x[(kh + 1) % 2, (kh + 1) // 2:(kh + 1) // 2 + 12, :]  # rows 2p + 1 + kh
        acc0 = acc0 + jnp.dot(lhs0, w, preferred_element_type=jnp.float32)
        acc1 = acc1 + jnp.dot(lhs1, w, preferred_element_type=jnp.float32)
    pooled = jnp.maximum(acc0, acc1)                 # pool over output-row parity
    pooled = jnp.maximum(pooled[:, :72], pooled[:, 72:])  # pool over output-col parity
    o_ref[...] = jnp.maximum(pooled + b1t_ref[...], 0.0)  # bias + ReLU (order-safe)


def _conv2_fc_kernel(z_ref, w2t_ref, b2t_ref, wfc1_ref, bfc1_ref,
                     wfc2_ref, bfc2_ref, wfc3_ref, bfc3_ref, o_ref):
    """Fused conv2(5x5, 6->16) + bias + ReLU + 2x2 maxpool + fc1/fc2/fc3.

    z_ref   : (2, 6, 72)   pooled conv1, rows split by parity; col = q*6 + c
    w2t_ref : (5, 72, 128) per-kh Toeplitz weights; out col = dx*64 + q2*16 + co
    b2t_ref : (1, 64)
    wfc1_ref: (4, 64, 600) fc1 weight, columns permuted to NHWC flatten, blocked by h
    wfc2_ref: (600, 420), wfc3_ref: (420, 128) zero-padded
    o_ref   : (1, 128)     lane-dense padded logits
    """
    z = z_ref[...]                                   # (2, 6, 72)
    acc0 = jnp.zeros((4, 128), jnp.float32)
    acc1 = jnp.zeros((4, 128), jnp.float32)
    for kh in range(5):
        w = w2t_ref[kh]                              # (72, 128)
        lhs0 = z[kh % 2, kh // 2:kh // 2 + 4, :]             # (4, 72)
        lhs1 = z[(kh + 1) % 2, (kh + 1) // 2:(kh + 1) // 2 + 4, :]
        acc0 = acc0 + jnp.dot(lhs0, w, preferred_element_type=jnp.float32)
        acc1 = acc1 + jnp.dot(lhs1, w, preferred_element_type=jnp.float32)
    pooled = jnp.maximum(acc0, acc1)                 # pool over output-row parity
    pooled = jnp.maximum(pooled[:, :64], pooled[:, 64:])  # pool over output-col parity
    y = jnp.maximum(pooled + b2t_ref[...], 0.0)      # (4, 64) pooled conv2 (rows = h)

    # fc1: the NCHW flatten is folded into the weight layout; summing the 4
    # row-block matmuls keeps everything 2-D (no in-kernel reshape needed).
    h = jnp.zeros((1, 600), jnp.float32)
    for p in range(4):
        h = h + jnp.dot(y[p:p + 1, :], wfc1_ref[p],
                        preferred_element_type=jnp.float32)
    h = jnp.maximum(h + bfc1_ref[...], 0.0)          # (1, 600)
    h = jnp.maximum(
        jnp.dot(h, wfc2_ref[...], preferred_element_type=jnp.float32)
        + bfc2_ref[...], 0.0)                        # (1, 420)
    o_ref[...] = (jnp.dot(h, wfc3_ref[...], preferred_element_type=jnp.float32)
                  + bfc3_ref[...])                   # (1, 128), cols >= 10 are zero


# ----------------------------------------------------------------------------
# Trace-time weight plumbing (pure parameter rearrangement, no activation work)
# ----------------------------------------------------------------------------
def _toeplitz_onehot(in_w, pooled_w, k):
    """Structural one-hot M[iw, jb, kw] = 1 where iw == ow(jb) + kw,
    with jb = dx*pooled_w + q and ow = 2*q + dx (pooling-parity-major cols)."""
    jb = np.arange(2 * pooled_w)
    ow = 2 * (jb % pooled_w) + (jb // pooled_w)
    iw = np.arange(in_w)[:, None, None]
    kw = np.arange(k)[None, None, :]
    return (iw == (ow[None, :, None] + kw)).astype(np.float32)


def _prepare_params(params):
    f32 = jnp.float32
    # conv1 (6,1,5,5) -> Toeplitz (5, 28, 144); out col = dx*72 + q*6 + c
    w1 = params["conv1_w"].astype(f32)[:, 0]                      # (c, kh, kw)
    m1 = jnp.asarray(_toeplitz_onehot(28, 12, 5))                 # (28, 24, 5)
    w1t = jnp.einsum("ijk,chk->hijc", m1, w1).reshape(5, 28, 144)
    b1t = jnp.tile(params["conv1_b"].astype(f32), 12).reshape(1, 72)
    # conv2 (16,6,5,5) -> Toeplitz (5, 72, 128); out col = dx*64 + q2*16 + co
    w2 = params["conv2_w"].astype(f32)                            # (co, ci, kh, kw)
    m2 = jnp.asarray(_toeplitz_onehot(12, 4, 5))                  # (12, 8, 5)
    w2t = jnp.einsum("wjk,oihk->hwijo", m2, w2).reshape(5, 72, 128)
    b2t = jnp.tile(params["conv2_b"].astype(f32), 4).reshape(1, 64)
    # fc1: permute input columns from NCHW flatten to NHWC flatten, block by h
    wfc1 = params["fc1_w"].astype(f32).reshape(600, 16, 4, 4)     # (j, c, h, w)
    wfc1 = jnp.transpose(wfc1, (2, 3, 1, 0)).reshape(4, 64, 600)  # (h, w*16+c, j)
    bfc1 = params["fc1_b"].astype(f32).reshape(1, 600)
    wfc2 = params["fc2_w"].astype(f32).T                          # (600, 420)
    bfc2 = params["fc2_b"].astype(f32).reshape(1, 420)
    # fc3: pad 10 -> 128 output lanes so the final HBM store is lane-dense
    wfc3 = jnp.zeros((420, 128), f32).at[:, :10].set(params["fc3_w"].astype(f32).T)
    bfc3 = jnp.zeros((1, 128), f32).at[0, :10].set(params["fc3_b"].astype(f32))
    return dict(w1t=w1t, b1t=b1t, w2t=w2t, b2t=b2t, wfc1=wfc1, bfc1=bfc1,
                wfc2=wfc2, bfc2=bfc2, wfc3=wfc3, bfc3=bfc3)


# ----------------------------------------------------------------------------
# pallas_call wrappers
# ----------------------------------------------------------------------------
_COMPILER_PARAMS = pltpu.CompilerParams(
    dimension_semantics=("parallel",),
    vmem_limit_bytes=32 * 1024 * 1024,
)


def _conv1_stage(x_split, w1t, b1t):
    n = x_split.shape[0]
    return pl.pallas_call(
        _conv1_pool_kernel,
        out_shape=jax.ShapeDtypeStruct((n, 12, 72), jnp.float32),
        grid=(n,),
        in_specs=[
            pl.BlockSpec((None, 2, 14, 28), lambda i: (i, 0, 0, 0)),
            pl.BlockSpec((5, 28, 144), lambda i: (0, 0, 0)),
            pl.BlockSpec((1, 72), lambda i: (0, 0)),
        ],
        out_specs=pl.BlockSpec((None, 12, 72), lambda i: (i, 0, 0)),
        compiler_params=_COMPILER_PARAMS,
    )(x_split, w1t, b1t)


def _conv2_fc_stage(p1_split, prep):
    n = p1_split.shape[0]
    return pl.pallas_call(
        _conv2_fc_kernel,
        out_shape=jax.ShapeDtypeStruct((n, 1, 128), jnp.float32),
        grid=(n,),
        in_specs=[
            pl.BlockSpec((None, 2, 6, 72), lambda i: (i, 0, 0, 0)),
            pl.BlockSpec((5, 72, 128), lambda i: (0, 0, 0)),
            pl.BlockSpec((1, 64), lambda i: (0, 0)),
            pl.BlockSpec((4, 64, 600), lambda i: (0, 0, 0)),
            pl.BlockSpec((1, 600), lambda i: (0, 0)),
            pl.BlockSpec((600, 420), lambda i: (0, 0)),
            pl.BlockSpec((1, 420), lambda i: (0, 0)),
            pl.BlockSpec((420, 128), lambda i: (0, 0)),
            pl.BlockSpec((1, 128), lambda i: (0, 0)),
        ],
        out_specs=pl.BlockSpec((None, 1, 128), lambda i: (i, 0, 0)),
        compiler_params=_COMPILER_PARAMS,
    )(p1_split, prep["w2t"], prep["b2t"], prep["wfc1"], prep["bfc1"],
      prep["wfc2"], prep["bfc2"], prep["wfc3"], prep["bfc3"])


# ----------------------------------------------------------------------------
# Parameters and forward pass
# ----------------------------------------------------------------------------
def init_params(num_classes=10, over_factor=5, dtype=jnp.float32):
    key = jax.random.PRNGKey(42)
    ks = jax.random.split(key, 10)

    def w(k, shape, fan_in):
        return (jax.random.normal(k, shape, dtype) / jnp.sqrt(fan_in)).astype(dtype)

    h1, h2, h3 = 4 * 4 * 16, 120 * over_factor, 84 * over_factor
    return {
        "conv1_w": w(ks[0], (6, 1, 5, 5), 25),
        "conv1_b": w(ks[1], (6,), 25),
        "conv2_w": w(ks[2], (16, 6, 5, 5), 150),
        "conv2_b": w(ks[3], (16,), 150),
        "fc1_w": w(ks[4], (h2, h1), h1),
        "fc1_b": w(ks[5], (h2,), h1),
        "fc2_w": w(ks[6], (h3, h2), h2),
        "fc2_b": w(ks[7], (h3,), h2),
        "fc3_w": w(ks[8], (num_classes, h3), h3),
        "fc3_b": w(ks[9], (num_classes,), h3),
    }


@jax.jit
def over_lenet_forward(x, params):
    """x: (N, 1, 28, 28) float32 NCHW (like PyTorch). Returns (N, num_classes)."""
    prep = _prepare_params(params)
    n = x.shape[0]
    # Split the raw input rows by parity (tiny, one-shot XLA rearrangement):
    # x_split[n, r, i, :] = x[n, 0, 2*i + r, :]
    x_split = jnp.transpose(x[:, 0].reshape(n, 14, 2, 28), (0, 2, 1, 3))
    pooled1 = _conv1_stage(x_split, prep["w1t"], prep["b1t"])          # (N, 12, 72)
    # Split the pooled rows by parity for the second conv stage (864 floats/img).
    p1_split = jnp.transpose(pooled1.reshape(n, 6, 2, 72), (0, 2, 1, 3))  # (N, 2, 6, 72)
    logits_padded = _conv2_fc_stage(p1_split, prep)                    # (N, 1, 128)
    num_classes = params["fc3_w"].shape[0]
    return logits_padded[:, 0, :num_classes]


# ----------------------------------------------------------------------------
# Pure-XLA reference (matches the PyTorch module) for verification
# ----------------------------------------------------------------------------
def reference_forward(x, params):
    dn = ("NCHW", "OIHW", "NCHW")
    hp = lax.Precision.HIGHEST
    y = lax.conv_general_dilated(x, params["conv1_w"], (1, 1), "VALID",
                                 dimension_numbers=dn, precision=hp)
    y = jnp.maximum(y + params["conv1_b"][None, :, None, None], 0.0)
    y = lax.reduce_window(y, -jnp.inf, lax.max, (1, 1, 2, 2), (1, 1, 2, 2), "VALID")
    y = lax.conv_general_dilated(y, params["conv2_w"], (1, 1), "VALID",
                                 dimension_numbers=dn, precision=hp)
    y = jnp.maximum(y + params["conv2_b"][None, :, None, None], 0.0)
    y = lax.reduce_window(y, -jnp.inf, lax.max, (1, 1, 2, 2), (1, 1, 2, 2), "VALID")
    y = y.reshape(y.shape[0], -1)
    y = jnp.maximum(jnp.dot(y, params["fc1_w"].T, precision=hp) + params["fc1_b"], 0.0)
    y = jnp.maximum(jnp.dot(y, params["fc2_w"].T, precision=hp) + params["fc2_b"], 0.0)
    return jnp.dot(y, params["fc3_w"].T, precision=hp) + params["fc3_b"]


if __name__ == "__main__":
    # The fc1 input size (4*4*16) after two valid 5x5 convs + two 2x2 pools
    # forces a 28x28 input (MNIST).  Small batch of 2.
    key = jax.random.PRNGKey(0)
    x = jax.random.normal(key, (2, 1, 28, 28), dtype=jnp.float32)

    params = init_params(num_classes=10, over_factor=5)
    logits = over_lenet_forward(x, params)
    jax.block_until_ready(logits)
    assert logits.shape == (2, 10) and logits.dtype == jnp.float32

    ref = reference_forward(x, params)
    max_err = float(jnp.max(jnp.abs(logits - ref)))
    assert jnp.allclose(logits, ref, atol=2e-2, rtol=2e-2), max_err

    print("KERNEL_OK")
</pallas_src>

<mosaic_0001>
module attributes {stable_mosaic.version = 11 : i64} {
  func.func @_conv1_pool_kernel(%arg0: i32, %arg1: memref<1x2x14x28xf32, #tpu.memory_space<vmem>>, %arg2: memref<5x28x144xf32, #tpu.memory_space<vmem>>, %arg3: memref<1x72xf32, #tpu.memory_space<vmem>>, %arg4: memref<1x12x72xf32, #tpu.memory_space<vmem>>) attributes {dimension_semantics = [#tpu.dimension_semantics<parallel>], iteration_bounds = array<i64: 2>, scalar_prefetch = 0 : i64, scratch_operands = 0 : i64, tpu.core_type = #tpu.core_type<tc>, window_params = [{transform_indices = @transform_0, window_bounds = array<i64: 1, 2, 14, 28>}, {pipeline_mode = #tpu.pipeline_mode<synchronous>, transform_indices = @transform_1, window_bounds = array<i64: 5, 28, 144>}, {pipeline_mode = #tpu.pipeline_mode<synchronous>, transform_indices = @transform_2, window_bounds = array<i64: 1, 72>}, {transform_indices = @transform_3, window_bounds = array<i64: 1, 12, 72>}]} {
    %c0 = arith.constant 0 : index
    %c0_0 = arith.constant 0 : index
    %c0_1 = arith.constant 0 : index
    %c0_2 = arith.constant 0 : index
    %0 = vector.load %arg1[%c0, %c0_0, %c0_1, %c0_2] : memref<1x2x14x28xf32, #tpu.memory_space<vmem>>, vector<1x2x14x28xf32>
    %1 = vector.shape_cast %0 : vector<1x2x14x28xf32> to vector<2x14x28xf32>
    %cst = arith.constant 0.000000e+00 : f32
    %2 = vector.broadcast %cst : f32 to vector<12x144xf32>
    %cst_3 = arith.constant 0.000000e+00 : f32
    %3 = vector.broadcast %cst_3 : f32 to vector<12x144xf32>
    %c0_4 = arith.constant 0 : index
    %c0_5 = arith.constant 0 : index
    %c0_6 = arith.constant 0 : index
    %4 = vector.load %arg2[%c0_4, %c0_5, %c0_6] : memref<5x28x144xf32, #tpu.memory_space<vmem>>, vector<1x28x144xf32>
    %5 = vector.shape_cast %4 : vector<1x28x144xf32> to vector<28x144xf32>
    %6 = vector.extract_strided_slice %1 {offsets = [0, 0, 0], sizes = [1, 12, 28], strides = [1, 1, 1]} : vector<2x14x28xf32> to vector<1x12x28xf32>
    %7 = vector.shape_cast %6 : vector<1x12x28xf32> to vector<12x28xf32>
    %8 = vector.extract_strided_slice %1 {offsets = [1, 0, 0], sizes = [1, 12, 28], strides = [1, 1, 1]} : vector<2x14x28xf32> to vector<1x12x28xf32>
    %9 = vector.shape_cast %8 : vector<1x12x28xf32> to vector<12x28xf32>
    %cst_7 = arith.constant dense<0.000000e+00> : vector<12x144xf32>
    %10 = tpu.matmul %7, %5, %cst_7 {dimension_numbers = #tpu.dot_dimension_numbers<[1], [0], [0], [1], [0, 0, 1, 1], [], []>} : vector<12x28xf32>, vector<28x144xf32>, vector<12x144xf32> -> vector<12x144xf32>
    %11 = arith.addf %2, %10 : vector<12x144xf32>
    %cst_8 = arith.constant dense<0.000000e+00> : vector<12x144xf32>
    %12 = tpu.matmul %9, %5, %cst_8 {dimension_numbers = #tpu.dot_dimension_numbers<[1], [0], [0], [1], [0, 0, 1, 1], [], []>} : vector<12x28xf32>, vector<28x144xf32>, vector<12x144xf32> -> vector<12x144xf32>
    %13 = arith.addf %3, %12 : vector<12x144xf32>
    %c1 = arith.constant 1 : index
    %c0_9 = arith.constant 0 : index
    %c0_10 = arith.constant 0 : index
    %14 = vector.load %arg2[%c1, %c0_9, %c0_10] : memref<5x28x144xf32, #tpu.memory_space<vmem>>, vector<1x28x144xf32>
    %15 = vector.shape_cast %14 : vector<1x28x144xf32> to vector<28x144xf32>
    %16 = vector.extract_strided_slice %1 {offsets = [1, 0, 0], sizes = [1, 12, 28], strides = [1, 1, 1]} : vector<2x14x28xf32> to vector<1x12x28xf32>
    %17 = vector.shape_cast %16 : vector<1x12x28xf32> to vector<12x28xf32>
    %18 = vector.extract_strided_slice %1 {offsets = [0, 1, 0], sizes = [1, 12, 28], strides = [1, 1, 1]} : vector<2x14x28xf32> to vector<1x12x28xf32>
    %19 = vector.shape_cast %18 : vector<1x12x28xf32> to vector<12x28xf32>
    %cst_11 = arith.constant dense<0.000000e+00> : vector<12x144xf32>
    %20 = tpu.matmul %17, %15, %cst_11 {dimension_numbers = #tpu.dot_dimension_numbers<[1], [0], [0], [1], [0, 0, 1, 1], [], []>} : vector<12x28xf32>, vector<28x144xf32>, vector<12x144xf32> -> vector<12x144xf32>
    %21 = arith.addf %11, %20 : vector<12x144xf32>
    %cst_12 = arith.constant dense<0.000000e+00> : vector<12x144xf32>
    %22 = tpu.matmul %19, %15, %cst_12 {dimension_numbers = #tpu.dot_dimension_numbers<[1], [0], [0], [1], [0, 0, 1, 1], [], []>} : vector<12x28xf32>, vector<28x144xf32>, vector<12x144xf32> -> vector<12x144xf32>
    %23 = arith.addf %13, %22 : vector<12x144xf32>
    %c2 = arith.constant 2 : index
    %c0_13 = arith.constant 0 : index
    %c0_14 = arith.constant 0 : index
    %24 = vector.load %arg2[%c2, %c0_13, %c0_14] : memref<5x28x144xf32, #tpu.memory_space<vmem>>, vector<1x28x144xf32>
    %25 = vector.shape_cast %24 : vector<1x28x144xf32> to vector<28x144xf32>
    %26 = vector.extract_strided_slice %1 {offsets = [0, 1, 0], sizes = [1, 12, 28], strides = [1, 1, 1]} : vector<2x14x28xf32> to vector<1x12x28xf32>
    %27 = vector.shape_cast %26 : vector<1x12x28xf32> to vector<12x28xf32>
    %28 = vector.extract_strided_slice %1 {offsets = [1, 1, 0], sizes = [1, 12, 28], strides = [1, 1, 1]} : vector<2x14x28xf32> to vector<1x12x28xf32>
    %29 = vector.shape_cast %28 : vector<1x12x28xf32> to vector<12x28xf32>
    %cst_15 = arith.constant dense<0.000000e+00> : vector<12x144xf32>
    %30 = tpu.matmul %27, %25, %cst_15 {dimension_numbers = #tpu.dot_dimension_numbers<[1], [0], [0], [1], [0, 0, 1, 1], [], []>} : vector<12x28xf32>, vector<28x144xf32>, vector<12x144xf32> -> vector<12x144xf32>
    %31 = arith.addf %21, %30 : vector<12x144xf32>
    %cst_16 = arith.constant dense<0.000000e+00> : vector<12x144xf32>
    %32 = tpu.matmul %29, %25, %cst_16 {dimension_numbers = #tpu.dot_dimension_numbers<[1], [0], [0], [1], [0, 0, 1, 1], [], []>} : vector<12x28xf32>, vector<28x144xf32>, vector<12x144xf32> -> vector<12x144xf32>
    %33 = arith.addf %23, %32 : vector<12x144xf32>
    %c3 = arith.constant 3 : index
    %c0_17 = arith.constant 0 : index
    %c0_18 = arith.constant 0 : index
    %34 = vector.load %arg2[%c3, %c0_17, %c0_18] : memref<5x28x144xf32, #tpu.memory_space<vmem>>, vector<1x28x144xf32>
    %35 = vector.shape_cast %34 : vector<1x28x144xf32> to vector<28x144xf32>
    %36 = vector.extract_strided_slice %1 {offsets = [1, 1, 0], sizes = [1, 12, 28], strides = [1, 1, 1]} : vector<2x14x28xf32> to vector<1x12x28xf32>
    %37 = vector.shape_cast %36 : vector<1x12x28xf32> to vector<12x28xf32>
    %38 = vector.extract_strided_slice %1 {offsets = [0, 2, 0], sizes = [1, 12, 28], strides = [1, 1, 1]} : vector<2x14x28xf32> to vector<1x12x28xf32>
    %39 = vector.shape_cast %38 : vector<1x12x28xf32> to vector<12x28xf32>
    %cst_19 = arith.constant dense<0.000000e+00> : vector<12x144xf32>
    %40 = tpu.matmul %37, %35, %cst_19 {dimension_numbers = #tpu.dot_dimension_numbers<[1], [0], [0], [1], [0, 0, 1, 1], [], []>} : vector<12x28xf32>, vector<28x144xf32>, vector<12x144xf32> -> vector<12x144xf32>
    %41 = arith.addf %31, %40 : vector<12x144xf32>
    %cst_20 = arith.constant dense<0.000000e+00> : vector<12x144xf32>
    %42 = tpu.matmul %39, %35, %cst_20 {dimension_numbers = #tpu.dot_dimension_numbers<[1], [0], [0], [1], [0, 0, 1, 1], [], []>} : vector<12x28xf32>, vector<28x144xf32>, vector<12x144xf32> -> vector<12x144xf32>
    %43 = arith.addf %33, %42 : vector<12x144xf32>
    %c4 = arith.constant 4 : index
    %c0_21 = arith.constant 0 : index
    %c0_22 = arith.constant 0 : index
    %44 = vector.load %arg2[%c4, %c0_21, %c0_22] : memref<5x28x144xf32, #tpu.memory_space<vmem>>, vector<1x28x144xf32>
    %45 = vector.shape_cast %44 : vector<1x28x144xf32> to vector<28x144xf32>
    %46 = vector.extract_strided_slice %1 {offsets = [0, 2, 0], sizes = [1, 12, 28], strides = [1, 1, 1]} : vector<2x14x28xf32> to vector<1x12x28xf32>
    %47 = vector.shape_cast %46 : vector<1x12x28xf32> to vector<12x28xf32>
    %48 = vector.extract_strided_slice %1 {offsets = [1, 2, 0], sizes = [1, 12, 28], strides = [1, 1, 1]} : vector<2x14x28xf32> to vector<1x12x28xf32>
    %49 = vector.shape_cast %48 : vector<1x12x28xf32> to vector<12x28xf32>
    %cst_23 = arith.constant dense<0.000000e+00> : vector<12x144xf32>
    %50 = tpu.matmul %47, %45, %cst_23 {dimension_numbers = #tpu.dot_dimension_numbers<[1], [0], [0], [1], [0, 0, 1, 1], [], []>} : vector<12x28xf32>, vector<28x144xf32>, vector<12x144xf32> -> vector<12x144xf32>
    %51 = arith.addf %41, %50 : vector<12x144xf32>
    %cst_24 = arith.constant dense<0.000000e+00> : vector<12x144xf32>
    %52 = tpu.matmul %49, %45, %cst_24 {dimension_numbers = #tpu.dot_dimension_numbers<[1], [0], [0], [1], [0, 0, 1, 1], [], []>} : vector<12x28xf32>, vector<28x144xf32>, vector<12x144xf32> -> vector<12x144xf32>
    %53 = arith.addf %43, %52 : vector<12x144xf32>
    %54 = arith.maximumf %51, %53 : vector<12x144xf32>
    %55 = vector.extract_strided_slice %54 {offsets = [0, 0], sizes = [12, 72], strides = [1, 1]} : vector<12x144xf32> to vector<12x72xf32>
    %56 = vector.extract_strided_slice %54 {offsets = [0, 72], sizes = [12, 72], strides = [1, 1]} : vector<12x144xf32> to vector<12x72xf32>
    %57 = arith.maximumf %55, %56 : vector<12x72xf32>
    %c0_25 = arith.constant 0 : index
    %c0_26 = arith.constant 0 : index
    %58 = vector.load %arg3[%c0_25, %c0_26] : memref<1x72xf32, #tpu.memory_space<vmem>>, vector<1x72xf32>
    %59 = vector.broadcast %58 : vector<1x72xf32> to vector<12x72xf32>
    %60 = arith.addf %57, %59 : vector<12x72xf32>
    %cst_27 = arith.constant 0.000000e+00 : f32
    %61 = vector.broadcast %cst_27 : f32 to vector<12x72xf32>
    %62 = arith.maximumf %60, %61 : vector<12x72xf32>
    %c0_28 = arith.constant 0 : index
    %c0_29 = arith.constant 0 : index
    %c0_30 = arith.constant 0 : index
    %63 = vector.load %arg4[%c0_28, %c0_29, %c0_30] : memref<1x12x72xf32, #tpu.memory_space<vmem>>, vector<1x12x72xf32>
    %64 = vector.shape_cast %63 : vector<1x12x72xf32> to vector<12x72xf32>
    %65 = vector.shape_cast %62 : vector<12x72xf32> to vector<1x12x72xf32>
    tpu.vector_store %arg4[%c0_28, %c0_29, %c0_30], %65 {strides = array<i32>} : memref<1x12x72xf32, #tpu.memory_space<vmem>>, vector<1x12x72xf32>,
    return
  }
  func.func @transform_0(%arg0: i32) -> (i32, i32, i32, i32) {
    %c0_i32 = arith.constant 0 : i32
    %c0_i32_0 = arith.constant 0 : i32
    %c0_i32_1 = arith.constant 0 : i32
    %c0_i32_2 = arith.constant 0 : i32
    return %arg0, %c0_i32, %c0_i32_0, %c0_i32_1 : i32, i32, i32, i32
  }
  func.func @transform_1(%arg0: i32) -> (i32, i32, i32) {
    %c0_i32 = arith.constant 0 : i32
    %c0_i32_0 = arith.constant 0 : i32
    %c0_i32_1 = arith.constant 0 : i32
    %c0_i32_2 = arith.constant 0 : i32
    return %c0_i32, %c0_i32_0, %c0_i32_1 : i32, i32, i32
  }
  func.func @transform_2(%arg0: i32) -> (i32, i32) {
    %c0_i32 = arith.constant 0 : i32
    %c0_i32_0 = arith.constant 0 : i32
    %c0_i32_1 = arith.constant 0 : i32
    return %c0_i32, %c0_i32_0 : i32, i32
  }
  func.func @transform_3(%arg0: i32) -> (i32, i32, i32) {
    %c0_i32 = arith.constant 0 : i32
    %c0_i32_0 = arith.constant 0 : i32
    %c0_i32_1 = arith.constant 0 : i32
    return %arg0, %c0_i32, %c0_i32_0 : i32, i32, i32
  }
}

module attributes {stable_mosaic.version = 11 : i64} {
  func.func @_conv2_fc_kernel(%arg0: i32, %arg1: memref<1x2x6x72xf32, #tpu.memory_space<vmem>>, %arg2: memref<5x72x128xf32, #tpu.memory_space<vmem>>, %arg3: memref<1x64xf32, #tpu.memory_space<vmem>>, %arg4: memref<4x64x600xf32, #tpu.memory_space<vmem>>, %arg5: memref<1x600xf32, #tpu.memory_space<vmem>>, %arg6: memref<600x420xf32, #tpu.memory_space<vmem>>, %arg7: memref<1x420xf32, #tpu.memory_space<vmem>>, %arg8: memref<420x128xf32, #tpu.memory_space<vmem>>, %arg9: memref<1x128xf32, #tpu.memory_space<vmem>>, %arg10: memref<1x1x128xf32, #tpu.memory_space<vmem>>) attributes {dimension_semantics = [#tpu.dimension_semantics<parallel>], iteration_bounds = array<i64: 2>, scalar_prefetch = 0 : i64, scratch_operands = 0 : i64, tpu.core_type = #tpu.core_type<tc>, window_params = [{transform_indices = @transform_0, window_bounds = array<i64: 1, 2, 6, 72>}, {pipeline_mode = #tpu.pipeline_mode<synchronous>, transform_indices = @transform_1, window_bounds = array<i64: 5, 72, 128>}, {pipeline_mode = #tpu.pipeline_mode<synchronous>, transform_indices = @transform_2, window_bounds = array<i64: 1, 64>}, {pipeline_mode = #tpu.pipeline_mode<synchronous>, transform_indices = @transform_3, window_bounds = array<i64: 4, 64, 600>}, {pipeline_mode = #tpu.pipeline_mode<synchronous>, transform_indices = @transform_4, window_bounds = array<i64: 1, 600>}, {pipeline_mode = #tpu.pipeline_mode<synchronous>, transform_indices = @transform_5, window_bounds = array<i64: 600, 420>}, {pipeline_mode = #tpu.pipeline_mode<synchronous>, transform_indices = @transform_6, window_bounds = array<i64: 1, 420>}, {pipeline_mode = #tpu.pipeline_mode<synchronous>, transform_indices = @transform_7, window_bounds = array<i64: 420, 128>}, {pipeline_mode = #tpu.pipeline_mode<synchronous>, transform_indices = @transform_8, window_bounds = array<i64: 1, 128>}, {transform_indices = @transform_9, window_bounds = array<i64: 1, 1, 128>}]} {
    %c0 = arith.constant 0 : index
    %c0_0 = arith.constant 0 : index
    %c0_1 = arith.constant 0 : index
    %c0_2 = arith.constant 0 : index
    %0 = vector.load %arg1[%c0, %c0_0, %c0_1, %c0_2] : memref<1x2x6x72xf32, #tpu.memory_space<vmem>>, vector<1x2x6x72xf32>
    %1 = vector.shape_cast %0 : vector<1x2x6x72xf32> to vector<2x6x72xf32>
    %cst = arith.constant 0.000000e+00 : f32
    %2 = vector.broadcast %cst : f32 to vector<4x128xf32>
    %cst_3 = arith.constant 0.000000e+00 : f32
    %3 = vector.broadcast %cst_3 : f32 to vector<4x128xf32>
    %c0_4 = arith.constant 0 : index
    %c0_5 = arith.constant 0 : index
    %c0_6 = arith.constant 0 : index
    %4 = vector.load %arg2[%c0_4, %c0_5, %c0_6] : memref<5x72x128xf32, #tpu.memory_space<vmem>>, vector<1x72x128xf32>
    %5 = vector.shape_cast %4 : vector<1x72x128xf32> to vector<72x128xf32>
    %6 = vector.extract_strided_slice %1 {offsets = [0, 0, 0], sizes = [1, 4, 72], strides = [1, 1, 1]} : vector<2x6x72xf32> to vector<1x4x72xf32>
    %7 = vector.shape_cast %6 : vector<1x4x72xf32> to vector<4x72xf32>
    %8 = vector.extract_strided_slice %1 {offsets = [1, 0, 0], sizes = [1, 4, 72], strides = [1, 1, 1]} : vector<2x6x72xf32> to vector<1x4x72xf32>
    %9 = vector.shape_cast %8 : vector<1x4x72xf32> to vector<4x72xf32>
    %cst_7 = arith.constant dense<0.000000e+00> : vector<4x128xf32>
    %10 = tpu.matmul %7, %5, %cst_7 {dimension_numbers = #tpu.dot_dimension_numbers<[1], [0], [0], [1], [0, 0, 1, 1], [], []>} : vector<4x72xf32>, vector<72x128xf32>, vector<4x128xf32> -> vector<4x128xf32>
    %11 = arith.addf %2, %10 : vector<4x128xf32>
    %cst_8 = arith.constant dense<0.000000e+00> : vector<4x128xf32>
    %12 = tpu.matmul %9, %5, %cst_8 {dimension_numbers = #tpu.dot_dimension_numbers<[1], [0], [0], [1], [0, 0, 1, 1], [], []>} : vector<4x72xf32>, vector<72x128xf32>, vector<4x128xf32> -> vector<4x128xf32>
    %13 = arith.addf %3, %12 : vector<4x128xf32>
    %c1 = arith.constant 1 : index
    %c0_9 = arith.constant 0 : index
    %c0_10 = arith.constant 0 : index
    %14 = vector.load %arg2[%c1, %c0_9, %c0_10] : memref<5x72x128xf32, #tpu.memory_space<vmem>>, vector<1x72x128xf32>
    %15 = vector.shape_cast %14 : vector<1x72x128xf32> to vector<72x128xf32>
    %16 = vector.extract_strided_slice %1 {offsets = [1, 0, 0], sizes = [1, 4, 72], strides = [1, 1, 1]} : vector<2x6x72xf32> to vector<1x4x72xf32>
    %17 = vector.shape_cast %16 : vector<1x4x72xf32> to vector<4x72xf32>
    %18 = vector.extract_strided_slice %1 {offsets = [0, 1, 0], sizes = [1, 4, 72], strides = [1, 1, 1]} : vector<2x6x72xf32> to vector<1x4x72xf32>
    %19 = vector.shape_cast %18 : vector<1x4x72xf32> to vector<4x72xf32>
    %cst_11 = arith.constant dense<0.000000e+00> : vector<4x128xf32>
    %20 = tpu.matmul %17, %15, %cst_11 {dimension_numbers = #tpu.dot_dimension_numbers<[1], [0], [0], [1], [0, 0, 1, 1], [], []>} : vector<4x72xf32>, vector<72x128xf32>, vector<4x128xf32> -> vector<4x128xf32>
    %21 = arith.addf %11, %20 : vector<4x128xf32>
    %cst_12 = arith.constant dense<0.000000e+00> : vector<4x128xf32>
    %22 = tpu.matmul %19, %15, %cst_12 {dimension_numbers = #tpu.dot_dimension_numbers<[1], [0], [0], [1], [0, 0, 1, 1], [], []>} : vector<4x72xf32>, vector<72x128xf32>, vector<4x128xf32> -> vector<4x128xf32>
    %23 = arith.addf %13, %22 : vector<4x128xf32>
    %c2 = arith.constant 2 : index
    %c0_13 = arith.constant 0 : index
    %c0_14 = arith.constant 0 : index
    %24 = vector.load %arg2[%c2, %c0_13, %c0_14] : memref<5x72x128xf32, #tpu.memory_space<vmem>>, vector<1x72x128xf32>
    %25 = vector.shape_cast %24 : vector<1x72x128xf32> to vector<72x128xf32>
    %26 = vector.extract_strided_slice %1 {offsets = [0, 1, 0], sizes = [1, 4, 72], strides = [1, 1, 1]} : vector<2x6x72xf32> to vector<1x4x72xf32>
    %27 = vector.shape_cast %26 : vector<1x4x72xf32> to vector<4x72xf32>
    %28 = vector.extract_strided_slice %1 {offsets = [1, 1, 0], sizes = [1, 4, 72], strides = [1, 1, 1]} : vector<2x6x72xf32> to vector<1x4x72xf32>
    %29 = vector.shape_cast %28 : vector<1x4x72xf32> to vector<4x72xf32>
    %cst_15 = arith.constant dense<0.000000e+00> : vector<4x128xf32>
    %30 = tpu.matmul %27, %25, %cst_15 {dimension_numbers = #tpu.dot_dimension_numbers<[1], [0], [0], [1], [0, 0, 1, 1], [], []>} : vector<4x72xf32>, vector<72x128xf32>, vector<4x128xf32> -> vector<4x128xf32>
    %31 = arith.addf %21, %30 : vector<4x128xf32>
    %cst_16 = arith.constant dense<0.000000e+00> : vector<4x128xf32>
    %32 = tpu.matmul %29, %25, %cst_16 {dimension_numbers = #tpu.dot_dimension_numbers<[1], [0], [0], [1], [0, 0, 1, 1], [], []>} : vector<4x72xf32>, vector<72x128xf32>, vector<4x128xf32> -> vector<4x128xf32>
    %33 = arith.addf %23, %32 : vector<4x128xf32>
    %c3 = arith.constant 3 : index
    %c0_17 = arith.constant 0 : index
    %c0_18 = arith.constant 0 : index
    %34 = vector.load %arg2[%c3, %c0_17, %c0_18] : memref<5x72x128xf32, #tpu.memory_space<vmem>>, vector<1x72x128xf32>
    %35 = vector.shape_cast %34 : vector<1x72x128xf32> to vector<72x128xf32>
    %36 = vector.extract_strided_slice %1 {offsets = [1, 1, 0], sizes = [1, 4, 72], strides = [1, 1, 1]} : vector<2x6x72xf32> to vector<1x4x72xf32>
    %37 = vector.shape_cast %36 : vector<1x4x72xf32> to vector<4x72xf32>
    %38 = vector.extract_strided_slice %1 {offsets = [0, 2, 0], sizes = [1, 4, 72], strides = [1, 1, 1]} : vector<2x6x72xf32> to vector<1x4x72xf32>
    %39 = vector.shape_cast %38 : vector<1x4x72xf32> to vector<4x72xf32>
    %cst_19 = arith.constant dense<0.000000e+00> : vector<4x128xf32>
    %40 = tpu.matmul %37, %35, %cst_19 {dimension_numbers = #tpu.dot_dimension_numbers<[1], [0], [0], [1], [0, 0, 1, 1], [], []>} : vector<4x72xf32>, vector<72x128xf32>, vector<4x128xf32> -> vector<4x128xf32>
    %41 = arith.addf %31, %40 : vector<4x128xf32>
    %cst_20 = arith.constant dense<0.000000e+00> : vector<4x128xf32>
    %42 = tpu.matmul %39, %35, %cst_20 {dimension_numbers = #tpu.dot_dimension_numbers<[1], [0], [0], [1], [0, 0, 1, 1], [], []>} : vector<4x72xf32>, vector<72x128xf32>, vector<4x128xf32> -> vector<4x128xf32>
    %43 = arith.addf %33, %42 : vector<4x128xf32>
    %c4 = arith.constant 4 : index
    %c0_21 = arith.constant 0 : index
    %c0_22 = arith.constant 0 : index
    %44 = vector.load %arg2[%c4, %c0_21, %c0_22] : memref<5x72x128xf32, #tpu.memory_space<vmem>>, vector<1x72x128xf32>
    %45 = vector.shape_cast %44 : vector<1x72x128xf32> to vector<72x128xf32>
    %46 = vector.extract_strided_slice %1 {offsets = [0, 2, 0], sizes = [1, 4, 72], strides = [1, 1, 1]} : vector<2x6x72xf32> to vector<1x4x72xf32>
    %47 = vector.shape_cast %46 : vector<1x4x72xf32> to vector<4x72xf32>
    %48 = vector.extract_strided_slice %1 {offsets = [1, 2, 0], sizes = [1, 4, 72], strides = [1, 1, 1]} : vector<2x6x72xf32> to vector<1x4x72xf32>
    %49 = vector.shape_cast %48 : vector<1x4x72xf32> to vector<4x72xf32>
    %cst_23 = arith.constant dense<0.000000e+00> : vector<4x128xf32>
    %50 = tpu.matmul %47, %45, %cst_23 {dimension_numbers = #tpu.dot_dimension_numbers<[1], [0], [0], [1], [0, 0, 1, 1], [], []>} : vector<4x72xf32>, vector<72x128xf32>, vector<4x128xf32> -> vector<4x128xf32>
    %51 = arith.addf %41, %50 : vector<4x128xf32>
    %cst_24 = arith.constant dense<0.000000e+00> : vector<4x128xf32>
    %52 = tpu.matmul %49, %45, %cst_24 {dimension_numbers = #tpu.dot_dimension_numbers<[1], [0], [0], [1], [0, 0, 1, 1], [], []>} : vector<4x72xf32>, vector<72x128xf32>, vector<4x128xf32> -> vector<4x128xf32>
    %53 = arith.addf %43, %52 : vector<4x128xf32>
    %54 = arith.maximumf %51, %53 : vector<4x128xf32>
    %55 = vector.extract_strided_slice %54 {offsets = [0, 0], sizes = [4, 64], strides = [1, 1]} : vector<4x128xf32> to vector<4x64xf32>
    %56 = vector.extract_strided_slice %54 {offsets = [0, 64], sizes = [4, 64], strides = [1, 1]} : vector<4x128xf32> to vector<4x64xf32>
    %57 = arith.maximumf %55, %56 : vector<4x64xf32>
    %c0_25 = arith.constant 0 : index
    %c0_26 = arith.constant 0 : index
    %58 = vector.load %arg3[%c0_25, %c0_26] : memref<1x64xf32, #tpu.memory_space<vmem>>, vector<1x64xf32>
    %59 = vector.broadcast %58 : vector<1x64xf32> to vector<4x64xf32>
    %60 = arith.addf %57, %59 : vector<4x64xf32>
    %cst_27 = arith.constant 0.000000e+00 : f32
    %61 = vector.broadcast %cst_27 : f32 to vector<4x64xf32>
    %62 = arith.maximumf %60, %61 : vector<4x64xf32>
    %cst_28 = arith.constant 0.000000e+00 : f32
    %63 = vector.broadcast %cst_28 : f32 to vector<1x600xf32>
    %64 = vector.extract_strided_slice %62 {offsets = [0, 0], sizes = [1, 64], strides = [1, 1]} : vector<4x64xf32> to vector<1x64xf32>
    %c0_29 = arith.constant 0 : index
    %c0_30 = arith.constant 0 : index
    %c0_31 = arith.constant 0 : index
    %65 = vector.load %arg4[%c0_29, %c0_30, %c0_31] : memref<4x64x600xf32, #tpu.memory_space<vmem>>, vector<1x64x600xf32>
    %66 = vector.shape_cast %65 : vector<1x64x600xf32> to vector<64x600xf32>
    %cst_32 = arith.constant dense<0.000000e+00> : vector<1x600xf32>
    %67 = tpu.matmul %64, %66, %cst_32 {dimension_numbers = #tpu.dot_dimension_numbers<[1], [0], [0], [1], [0, 0, 1, 1], [], []>} : vector<1x64xf32>, vector<64x600xf32>, vector<1x600xf32> -> vector<1x600xf32>
    %68 = arith.addf %63, %67 : vector<1x600xf32>
    %69 = vector.extract_strided_slice %62 {offsets = [1, 0], sizes = [1, 64], strides = [1, 1]} : vector<4x64xf32> to vector<1x64xf32>
    %c1_33 = arith.constant 1 : index
    %c0_34 = arith.constant 0 : index
    %c0_35 = arith.constant 0 : index
    %70 = vector.load %arg4[%c1_33, %c0_34, %c0_35] : memref<4x64x600xf32, #tpu.memory_space<vmem>>, vector<1x64x600xf32>
    %71 = vector.shape_cast %70 : vector<1x64x600xf32> to vector<64x600xf32>
    %cst_36 = arith.constant dense<0.000000e+00> : vector<1x600xf32>
    %72 = tpu.matmul %69, %71, %cst_36 {dimension_numbers = #tpu.dot_dimension_numbers<[1], [0], [0], [1], [0, 0, 1, 1], [], []>} : vector<1x64xf32>, vector<64x600xf32>, vector<1x600xf32> -> vector<1x600xf32>
    %73 = arith.addf %68, %72 : vector<1x600xf32>
    %74 = vector.extract_strided_slice %62 {offsets = [2, 0], sizes = [1, 64], strides = [1, 1]} : vector<4x64xf32> to vector<1x64xf32>
    %c2_37 = arith.constant 2 : index
    %c0_38 = arith.constant 0 : index
    %c0_39 = arith.constant 0 : index
    %75 = vector.load %arg4[%c2_37, %c0_38, %c0_39] : memref<4x64x600xf32, #tpu.memory_space<vmem>>, vector<1x64x600xf32>
    %76 = vector.shape_cast %75 : vector<1x64x600xf32> to vector<64x600xf32>
    %cst_40 = arith.constant dense<0.000000e+00> : vector<1x600xf32>
    %77 = tpu.matmul %74, %76, %cst_40 {dimension_numbers = #tpu.dot_dimension_numbers<[1], [0], [0], [1], [0, 0, 1, 1], [], []>} : vector<1x64xf32>, vector<64x600xf32>, vector<1x600xf32> -> vector<1x600xf32>
    %78 = arith.addf %73, %77 : vector<1x600xf32>
    %79 = vector.extract_strided_slice %62 {offsets = [3, 0], sizes = [1, 64], strides = [1, 1]} : vector<4x64xf32> to vector<1x64xf32>
    %c3_41 = arith.constant 3 : index
    %c0_42 = arith.constant 0 : index
    %c0_43 = arith.constant 0 : index
    %80 = vector.load %arg4[%c3_41, %c0_42, %c0_43] : memref<4x64x600xf32, #tpu.memory_space<vmem>>, vector<1x64x600xf32>
    %81 = vector.shape_cast %80 : vector<1x64x600xf32> to vector<64x600xf32>
    %cst_44 = arith.constant dense<0.000000e+00> : vector<1x600xf32>
    %82 = tpu.matmul %79, %81, %cst_44 {dimension_numbers = #tpu.dot_dimension_numbers<[1], [0], [0], [1], [0, 0, 1, 1], [], []>} : vector<1x64xf32>, vector<64x600xf32>, vector<1x600xf32> -> vector<1x600xf32>
    %83 = arith.addf %78, %82 : vector<1x600xf32>
    %c0_45 = arith.constant 0 : index
    %c0_46 = arith.constant 0 : index
    %84 = vector.load %arg5[%c0_45, %c0_46] : memref<1x600xf32, #tpu.memory_space<vmem>>, vector<1x600xf32>
    %85 = arith.addf %83, %84 : vector<1x600xf32>
    %cst_47 = arith.constant 0.000000e+00 : f32
    %86 = vector.broadcast %cst_47 : f32 to vector<1x600xf32>
    %87 = arith.maximumf %85, %86 : vector<1x600xf32>
    %c0_48 = arith.constant 0 : index
    %c0_49 = arith.constant 0 : index
    %88 = vector.load %arg6[%c0_48, %c0_49] : memref<600x420xf32, #tpu.memory_space<vmem>>, vector<600x420xf32>
    %cst_50 = arith.constant dense<0.000000e+00> : vector<1x420xf32>
    %89 = tpu.matmul %87, %88, %cst_50 {dimension_numbers = #tpu.dot_dimension_numbers<[1], [0], [0], [1], [0, 0, 1, 1], [], []>} : vector<1x600xf32>, vector<600x420xf32>, vector<1x420xf32> -> vector<1x420xf32>
    %c0_51 = arith.constant 0 : index
    %c0_52 = arith.constant 0 : index
    %90 = vector.load %arg7[%c0_51, %c0_52] : memref<1x420xf32, #tpu.memory_space<vmem>>, vector<1x420xf32>
    %91 = arith.addf %89, %90 : vector<1x420xf32>
    %cst_53 = arith.constant 0.000000e+00 : f32
    %92 = vector.broadcast %cst_53 : f32 to vector<1x420xf32>
    %93 = arith.maximumf %91, %92 : vector<1x420xf32>
    %c0_54 = arith.constant 0 : index
    %c0_55 = arith.constant 0 : index
    %94 = vector.load %arg8[%c0_54, %c0_55] : memref<420x128xf32, #tpu.memory_space<vmem>>, vector<420x128xf32>
    %cst_56 = arith.constant dense<0.000000e+00> : vector<1x128xf32>
    %95 = tpu.matmul %93, %94, %cst_56 {dimension_numbers = #tpu.dot_dimension_numbers<[1], [0], [0], [1], [0, 0, 1, 1], [], []>} : vector<1x420xf32>, vector<420x128xf32>, vector<1x128xf32> -> vector<1x128xf32>
    %c0_57 = arith.constant 0 : index
    %c0_58 = arith.constant 0 : index
    %96 = vector.load %arg9[%c0_57, %c0_58] : memref<1x128xf32, #tpu.memory_space<vmem>>, vector<1x128xf32>
    %97 = arith.addf %95, %96 : vector<1x128xf32>
    %c0_59 = arith.constant 0 : index
    %c0_60 = arith.constant 0 : index
    %c0_61 = arith.constant 0 : index
    %98 = vector.load %arg10[%c0_59, %c0_60, %c0_61] : memref<1x1x128xf32, #tpu.memory_space<vmem>>, vector<1x1x128xf32>
    %99 = vector.shape_cast %98 : vector<1x1x128xf32> to vector<1x128xf32>
    %100 = vector.shape_cast %97 : vector<1x128xf32> to vector<1x1x128xf32>
    tpu.vector_store %arg10[%c0_59, %c0_60, %c0_61], %100 {strides = array<i32>} : memref<1x1x128xf32, #tpu.memory_space<vmem>>, vector<1x1x128xf32>,
    return
  }
  func.func @transform_0(%arg0: i32) -> (i32, i32, i32, i32) {
    %c0_i32 = arith.constant 0 : i32
    %c0_i32_0 = arith.constant 0 : i32
    %c0_i32_1 = arith.constant 0 : i32
    %c0_i32_2 = arith.constant 0 : i32
    return %arg0, %c0_i32, %c0_i32_0, %c0_i32_1 : i32, i32, i32, i32
  }
  func.func @transform_1(%arg0: i32) -> (i32, i32, i32) {
    %c0_i32 = arith.constant 0 : i32
    %c0_i32_0 = arith.constant 0 : i32
    %c0_i32_1 = arith.constant 0 : i32
    %c0_i32_2 = arith.constant 0 : i32
    return %c0_i32, %c0_i32_0, %c0_i32_1 : i32, i32, i32
  }
  func.func @transform_2(%arg0: i32) -> (i32, i32) {
    %c0_i32 = arith.constant 0 : i32
    %c0_i32_0 = arith.constant 0 : i32
    %c0_i32_1 = arith.constant 0 : i32
    return %c0_i32, %c0_i32_0 : i32, i32
  }
  func.func @transform_3(%arg0: i32) -> (i32, i32, i32) {
    %c0_i32 = arith.constant 0 : i32
    %c0_i32_0 = arith.constant 0 : i32
    %c0_i32_1 = arith.constant 0 : i32
    %c0_i32_2 = arith.constant 0 : i32
    return %c0_i32, %c0_i32_0, %c0_i32_1 : i32, i32, i32
  }
  func.func @transform_4(%arg0: i32) -> (i32, i32) {
    %c0_i32 = arith.constant 0 : i32
    %c0_i32_0 = arith.constant 0 : i32
    %c0_i32_1 = arith.constant 0 : i32
    return %c0_i32, %c0_i32_0 : i32, i32
  }
  func.func @transform_5(%arg0: i32) -> (i32, i32) {
    %c0_i32 = arith.constant 0 : i32
    %c0_i32_0 = arith.constant 0 : i32
    %c0_i32_1 = arith.constant 0 : i32
    return %c0_i32, %c0_i32_0 : i32, i32
  }
  func.func @transform_6(%arg0: i32) -> (i32, i32) {
    %c0_i32 = arith.constant 0 : i32
    %c0_i32_0 = arith.constant 0 : i32
    %c0_i32_1 = arith.constant 0 : i32
    return %c0_i32, %c0_i32_0 : i32, i32
  }
  func.func @transform_7(%arg0: i32) -> (i32, i32) {
    %c0_i32 = arith.constant 0 : i32
    %c0_i32_0 = arith.constant 0 : i32
    %c0_i32_1 = arith.constant 0 : i32
    return %c0_i32, %c0_i32_0 : i32, i32
  }
  func.func @transform_8(%arg0: i32) -> (i32, i32) {
    %c0_i32 = arith.constant 0 : i32
    %c0_i32_0 = arith.constant 0 : i32
    %c0_i32_1 = arith.constant 0 : i32
    return %c0_i32, %c0_i32_0 : i32, i32
  }
  func.func @transform_9(%arg0: i32) -> (i32, i32, i32) {
    %c0_i32 = arith.constant 0 : i32
    %c0_i32_0 = arith.constant 0 : i32
    %c0_i32_1 = arith.constant 0 : i32
    return %arg0, %c0_i32, %c0_i32_0 : i32, i32, i32
  }
}

</mosaic_0001>

<bundles_post_ra>
// kernel: tile.13
= control target key start
LH: loop header
LB: loop body
LE: loop exit
PB: predicated region body
PF: predicated region fallthrough
CT: control target
= control target key end

     0   :  { %s28_s0 = inlined_call_operand.vmem [shape: f32[6], index: 0, kind: input, shape index: {}]   ;;  %s29_s1 = inlined_call_operand.vmem [shape: f32[12,6], index: 1, kind: output, shape index: {}]  }
   0x1   :  { %v4_v0 = vld [vmem:[%s28_s0] ss:$0 sm:$0xff] }
   0x2   :  { %5 = vst [vmem:[%s29_s1] sm:$0xff] %v4_v0  ;;  %8 = vst [vmem:[%s29_s1 + $0x8] sm:$0xff] %v4_v0 }

// kernel: tile.14
= control target key start
LH: loop header
LB: loop body
LE: loop exit
PB: predicated region body
PF: predicated region fallthrough
CT: control target
= control target key end

     0   :  { %s99_s10 = smov 66   ;;  %s100_s11 = smov 54   ;;  %vm3_vm0 = vcmask 48128   ;;  %vm9_vm1 = vcmask 589328   ;;  %vm15_vm2 = vcmask 540128   ;;  %vm21_vm3 = vcmask 490928   ;;  %s159_s0 = inlined_call_operand.vmem [shape: f32[12,6], index: 0, kind: input, shape index: {}]   ;;  %s160_s1 = inlined_call_operand.vmem [shape: f32[1,72], index: 1, kind: output, shape index: {}]  }
   0x1   :  { %v77_v0 = vld [vmem:[%s159_s0 + $0xb] sm:$0x1]   ;;  %v79_v1 = vld [vmem:[%s159_s0 + $0x9] sm:$0x1]   ;;  %v78_v2 = vld [vmem:[%s159_s0 + $0xa] sm:$0x1]  }
   0x2   :  { %7 = vrot.lane.b32.xlu0 %v77_v0, %s99_s10  ;;  %19 = vrot.lane.b32.xlu1 %v79_v1, %s100_s11  ;;  %v80_v3 = vld [vmem:[%s159_s0 + $0x8] sm:$0x1]   ;;  %s101_s16 = smov 60   ;;  %s102_s17 = smov 48   ;;  %v81_v4 = vld [vmem:[%s159_s0 + $0x7] sm:$0x1]  }
   0x3   :  { %v2_v5 = vld [vmem:[%s159_s0] sm:$0x1]   ;;  %v82_v6 = vld [vmem:[%s159_s0 + $0x6] sm:$0x1]   ;;  %s103_s24 = smov 42   ;;  %s104_s25 = smov 36  }
   0x4   :  { %4 = vst.msk [vmem:[#allocation0] sm:$0x1] %vm3_vm0, %v2_v5   ;;  %v83_v7 = vld [vmem:[%s159_s0 + $0x5] sm:$0x1]   ;;  %v84_v8 = vld [vmem:[%s159_s0 + $0x4] sm:$0x1]  }
   0x5   :  { %s105_s30 = smov 30   ;;  %s106_s2 = smov 24   ;;  %v85_v9 = vld [vmem:[%s159_s0 + $0x3] sm:$0x1]   ;;  %v86_v10 = vld [vmem:[%s159_s0 + $0x2] sm:$0x1]  }
   0x6   :  { %13 = vrot.lane.b32.xlu0 %v78_v2, %s101_s16  ;;  %25 = vrot.lane.b32.xlu1 %v80_v3, %s102_s17  ;;  %s107_s7 = smov 18   ;;  %s108_s8 = smov 12   ;;  %v87_v11 = vld [vmem:[%s159_s0 + $0x1] sm:$0x1]   ;;  %vm27_vm4 = vcmask 441728   ;;  %vm33_vm5 = vcmask 392528  }
   0x7   :  { %s109_s0 = smov 6   ;;  %vm39_vm6 = vcmask 343328   ;;  %vm45_vm7 = vcmask 294128   ;;  %vm51_vm8 = vcmask 244928   ;;  %vm57_vm9 = vcmask 195728  }
   0x8   :  { %vm63_vm10 = vcmask 146528   ;;  %vm69_vm11 = vcmask 97328  }
   0xa   :  { %31 = vrot.lane.b32.xlu0 %v81_v4, %s103_s24  ;;  %37 = vrot.lane.b32.xlu1 %v82_v6, %s104_s25 }
   0xe   :  { %43 = vrot.lane.b32.xlu0 %v83_v7, %s105_s30  ;;  %49 = vrot.lane.b32.xlu1 %v84_v8, %s106_s2 }
  0x12   :  { %55 = vrot.lane.b32.xlu0 %v85_v9, %s107_s7  ;;  %61 = vrot.lane.b32.xlu1 %v86_v10, %s108_s8 }
  0x16   :  { %67 = vrot.lane.b32.xlu0 %v87_v11, %s109_s0 }
  0x74   :  { %v8_v12 = vpop.permute.xlu0 %7   ;;  %v20_v13 = vpop.permute.xlu1 %19  }
  0x75   :  { %10 = vst.msk [vmem:[#allocation0] sm:$0x1] %vm9_vm1, %v8_v12  }
  0x78   :  { %v14_v14 = vpop.permute.xlu0 %13   ;;  %v26_v15 = vpop.permute.xlu1 %25  }
  0x79   :  { %16 = vst.msk [vmem:[#allocation0] sm:$0x1] %vm15_vm2, %v14_v14  }
  0x7a   :  { %22 = vst.msk [vmem:[#allocation0] sm:$0x1] %vm21_vm3, %v20_v13  }
  0x7b   :  { %28 = vst.msk [vmem:[#allocation0] sm:$0x1] %vm27_vm4, %v26_v15  }
  0x7c   :  { %v32_v16 = vpop.permute.xlu0 %31   ;;  %v38_v17 = vpop.permute.xlu1 %37  }
  0x7d   :  { %34 = vst.msk [vmem:[#allocation0] sm:$0x1] %vm33_vm5, %v32_v16  }
  0x7e   :  { %40 = vst.msk [vmem:[#allocation0] sm:$0x1] %vm39_vm6, %v38_v17  }
  0x80   :  { %v44_v18 = vpop.permute.xlu0 %43   ;;  %v50_v19 = vpop.permute.xlu1 %49  }
  0x81   :  { %46 = vst.msk [vmem:[#allocation0] sm:$0x1] %vm45_vm7, %v44_v18  }
  0x82   :  { %52 = vst.msk [vmem:[#allocation0] sm:$0x1] %vm51_vm8, %v50_v19  }
  0x84   :  { %v56_v20 = vpop.permute.xlu0 %55   ;;  %v62_v21 = vpop.permute.xlu1 %61  }
  0x85   :  { %58 = vst.msk [vmem:[#allocation0] sm:$0x1] %vm57_vm9, %v56_v20  }
  0x86   :  { %64 = vst.msk [vmem:[#allocation0] sm:$0x1] %vm63_vm10, %v62_v21  }
  0x88   :  { %v68_v22 = vpop.permute.xlu0 %67  }
  0x89   :  { %70 = vst.msk [vmem:[#allocation0] sm:$0x1] %vm69_vm11, %v68_v22  }
  0x90   :  { %v74_v23 = vld [vmem:[#allocation0] sm:$0x1] }
  0x91   :  { %76 = vst [vmem:[%s160_s1] sm:$0x1] %v74_v23 }

// kernel: over_lenet_forward.2
= control target key start
LH: loop header
LB: loop body
LE: loop exit
PB: predicated region body
PF: predicated region fallthrough
CT: control target
= control target key end

     0   :  { %s1440_s12 = smov 0   ;;  %s1704_s0 = inlined_call_operand.vmem [shape: f32[2,2,14,28], index: 0, kind: input, shape index: {}]   ;;  %s1705_s1 = inlined_call_operand.vmem [shape: f32[5,28,144], index: 1, kind: input, shape index: {}]   ;;  %s1706_s2 = inlined_call_operand.vmem [shape: f32[1,72], index: 2, kind: input, shape index: {}]   ;;  %s1707_s3 = inlined_call_operand.vmem [shape: f32[2,12,72], index: 3, kind: output, shape index: {}]  }
   0x1 LB: > { %s1180_s13 = sadd.s32 4294967295, %s1415_s12   ;;  %p1184_p0 = scmp.ge.s32.totalorder %s1415_s12, 1  ;;  %s1415_s12 = sphi %s1440_s12, %s13_s12  }
   0x2   : > { %p137_p1 = scmp.lt.s32.totalorder %s1415_s12, 3 }
   0x4   : > { %p138_p2 = pnand %p1184_p0, %p137_p1 }
   0x5   : > { %v1190_v0 = vld [vmem:[%s1705_s1 + $0x48] sm:$0xff] (!%p138_p2)  ;;  %v1192_v1 = vld [vmem:[%s1705_s1 + $0x58] sm:$0xff] (!%p138_p2)  ;;  %v1189_v2 = vld [vmem:[%s1705_s1 + $0x40] sm:$0xff] (!%p138_p2)  ;;  %vm199_vm0 = vcmask (!%p138_p2), 1043456   ;;  %v1417_v7 = vmov (!%p138_p2), 0.0   ;;  %p161_p3 = scmp.lt.s32.totalorder (!%p138_p2), %s1180_s13, 1 }
   0x6   : > { %141 = sbr.rel (%p138_p2) target bundleno = 397 (0x18d), region = 32  ;;  %v1266_v3 = vpack.c.bf16 (!%p138_p2), %v1192_v1, %v1190_v0  ;;  %v1191_v4 = vld [vmem:[%s1705_s1 + $0x50] sm:$0xff] (!%p138_p2)  ;;  %v1194_v5 = vld [vmem:[%s1705_s1 + $0x68] sm:$0xff] (!%p138_p2)  ;;  %v1196_v6 = vld [vmem:[%s1705_s1 + $0x78] sm:$0xf] (!%p138_p2)  ;;  %270 = vmatprep.mubr.f32.mxu0 (!%p138_p2), %v1417_v7  ;;  %444 = vmatprep.mubr.f32.mxu1 (!%p138_p2), %v1417_v7  ;;  %vm1418_vm1 = vmmov (!%p138_p2), 1  }
   0x7   : > { %v1268_v8 = vpack.c.bf16 (!%p138_p2), %v1191_v4, %v1189_v2  ;;  %v1270_v9 = vpack.c.bf16 (!%p138_p2), %v1196_v6, %v1194_v5  ;;  %vm1468_vm2 = vmpackc.low (!%p138_p2), %vm199_vm0, %vm1418_vm1  ;;  %v1193_v11 = vld [vmem:[%s1705_s1 + $0x60] sm:$0xff] (!%p138_p2)  ;;  %v1195_v12 = vld [vmem:[%s1705_s1 + $0x70] sm:$0xf] (!%p138_p2)  ;;  %vm372_vm3 = vcmask (!%p138_p2), 1046528   ;;  %vm192_vm4 = vcmask (!%p138_p2), 228352   ;;  %s1419_s23 = smov (!%p138_p2), 56  }
   0x8   : > { %1267 = vmatprep.subr.bf16.mxu0 (!%p138_p2), %v1266_v3  ;;  %1287 = vmatprep.subr.bf16.mxu1 (!%p138_p2), %v1266_v3  ;;  %v176_v13 = vld [vmem:[%s1705_s1 + $0x8] sm:$0xff] (!%p138_p2)  ;;  %v178_v14 = vld [vmem:[%s1705_s1 + $0x18] sm:$0xff] (!%p138_p2)  ;;  %v1273_v15 = vpack.c.bf16 (!%p138_p2), %v1195_v12, %v1193_v11  ;;  %v175_v17 = vld [vmem:[%s1705_s1] sm:$0xff] (!%p138_p2)  ;;  %vm814_vm5 = vcmask (!%p138_p2), 1045504   ;;  %vm1103_vm6 = vcmask (!%p138_p2), 457728   ;;  %vm1121_vm7 = vcmask (!%p138_p2), 588800  }
   0x9   : > { %1269 = vmatpush1.bf16.msra.mxu0 (!%p138_p2), %v1268_v8  ;;  %1289 = vmatpush1.bf16.msra.mxu1 (!%p138_p2), %v1268_v8  ;;  %v1276_v16 = vpack.c.bf16 (!%p138_p2), %v178_v14, %v176_v13  ;;  %v177_v18 = vld [vmem:[%s1705_s1 + $0x10] sm:$0xff] (!%p138_p2)  ;;  %v180_v19 = vld [vmem:[%s1705_s1 + $0x28] sm:$0xff] (!%p138_p2)  ;;  %v182_v22 = vld [vmem:[%s1705_s1 + $0x38] sm:$0xf] (!%p138_p2)  ;;  %vm1123_vm8 = vcmask (!%p138_p2), 584704  }
   0xa   : > { %1272 = vmatprep.subr.msk.bf16.mxu0 (!%p138_p2), %vm1468_vm2, %v1270_v9  ;;  %1292 = vmatprep.subr.msk.bf16.mxu1 (!%p138_p2), %vm1468_vm2, %v1270_v9  ;;  %v1278_v26 = vpack.c.bf16 (!%p138_p2), %v177_v18, %v175_v17  ;;  %v179_v27 = vld [vmem:[%s1705_s1 + $0x20] sm:$0xff] (!%p138_p2)  ;;  %v181_v28 = vld [vmem:[%s1705_s1 + $0x30] sm:$0xf] (!%p138_p2)  ;;  %v1280_v30 = vpack.c.bf16 (!%p138_p2), %v182_v22, %v180_v19  ;;  %v1214_v31 = vld [vmem:[%s1705_s1 + $0x88] sm:$0xff] (!%p138_p2) }
   0xb   : > { %v1216_v32 = vld [vmem:[%s1705_s1 + $0x98] sm:$0xff] (!%p138_p2)  ;;  %v1283_v34 = vpack.c.bf16 (!%p138_p2), %v181_v28, %v179_v27  ;;  %v1213_v35 = vld [vmem:[%s1705_s1 + $0x80] sm:$0xff] (!%p138_p2)  ;;  %v1215_v36 = vld [vmem:[%s1705_s1 + $0x90] sm:$0xff] (!%p138_p2) }
   0xc   : > { %v1306_v37 = vpack.c.bf16 (!%p138_p2), %v1216_v32, %v1214_v31  ;;  %v1218_v38 = vld [vmem:[%s1705_s1 + $0xa8] sm:$0xff] (!%p138_p2)  ;;  %v1220_v39 = vld [vmem:[%s1705_s1 + $0xb8] sm:$0xf] (!%p138_p2)  ;;  %v1308_v40 = vpack.c.bf16 (!%p138_p2), %v1215_v36, %v1213_v35  ;;  %v1217_v41 = vld [vmem:[%s1705_s1 + $0xa0] sm:$0xff] (!%p138_p2) }
   0xd   : > { %s1711_s13 = smov (!%p161_p3, %s1180_s13), 1  ;;  %1275 = vmatpush1.bf16.msk.msra.mxu0 %vm1468_vm2, %v1273_v15  ;;  %1295 = vmatpush1.bf16.msk.msra.mxu1 %vm1468_vm2, %v1273_v15  ;;  %v1219_v42 = vld [vmem:[%s1705_s1 + $0xb0] sm:$0xf]  ;;  %v1310_v43 = vpack.c.bf16 %v1220_v39, %v1218_v38  ;;  %v1230_v44 = vld [vmem:[%s1705_s1 + $0xc8] sm:$0xff]  ;;  %v1232_v45 = vld [vmem:[%s1705_s1 + $0xd8] sm:$0xff] }
   0xe   : > { %s1264_s7 = sshll.u32 %s1711_s13, 5  ;;  %1277 = vmatprep.subr.bf16.mxu0 %v1276_v16  ;;  %1297 = vmatprep.subr.bf16.mxu1 %v1276_v16  ;;  %v1313_v48 = vpack.c.bf16 %v1219_v42, %v1217_v41  ;;  %v1229_v49 = vld [vmem:[%s1705_s1 + $0xc0] sm:$0xff]  ;;  %v1231_v50 = vld [vmem:[%s1705_s1 + $0xd0] sm:$0xff]  ;;  %v1326_v51 = vpack.c.bf16 %v1232_v45, %v1230_v44  ;;  %v1234_v52 = vld [vmem:[%s1705_s1 + $0xe8] sm:$0xff]  ;;  %s1265_s26 = sshll.u32 %s1711_s13, 4 }
   0xf   : > { %s165_s16 = scalar_lea.vmem %s1704_s0, %s1264_s7  ;;  %v1236_v53 = vld [vmem:[%s1705_s1 + $0xf8] sm:$0xf]  ;;  %v1328_v55 = vpack.c.bf16 %v1231_v50, %v1229_v49  ;;  %v1233_v56 = vld [vmem:[%s1705_s1 + $0xe0] sm:$0xff]  ;;  %v1235_v57 = vld [vmem:[%s1705_s1 + $0xf0] sm:$0xf]  ;;  %s170_s29 = scalar_lea.vmem %s1707_s3, %s1265_s26 }
  0x10   : > { %v1503_v20 = vld [vmem:[%s165_s16] sm:$0xff]  ;;  %v1505_v21 = vld [vmem:[%s165_s16 + $0x8] sm:$0x3f]  ;;  %v1514_v23 = vld [vmem:[%s165_s16 + $0x10] sm:$0xff]  ;;  %v1330_v58 = vpack.c.bf16 %v1236_v53, %v1234_v52  ;;  %v1333_v63 = vpack.c.bf16 %v1235_v57, %v1233_v56 }
  0x11   : > { %v373_v24 = vrot.slane %v1503_v20, 1  ;;  %v1518_v25 = vrot.slane %v1505_v21, 1  ;;  %1199 = vmatmul.mubr.msk.f32.vlgmr.msra.gmra.mrb[0].mxu0 %vm192_vm4, %v1514_v23  ;;  %v1537_v33 = vld [vmem:[%s165_s16 + $0x18] sm:$0x3f]  ;;  %v630_v46 = vrot.slane %v1514_v23, 1  ;;  %v1246_v59 = vld [vmem:[%s1705_s1 + $0x108] sm:$0xff] }
  0x12   : > { %1279 = vmatpush1.bf16.msra.mxu0 %v1278_v26  ;;  %276 = vmatprep.mubr.f32.mxu0 %v1417_v7  ;;  %v1585_v47 = vrot.slane %v1537_v33, 1  ;;  %v1248_v60 = vld [vmem:[%s1705_s1 + $0x118] sm:$0xff]  ;;  %v815_v61 = vrot.slane %v1503_v20, 2  ;;  %v816_v62 = vrot.slane %v1505_v21, 2  ;;  %v1245_v0 = vld [vmem:[%s1705_s1 + $0x100] sm:$0xff]  ;;  %v1247_v1 = vld [vmem:[%s1705_s1 + $0x110] sm:$0xff] }
  0x13   : > { %v375_v29 = vsel %vm372_vm3, %v373_v24, %v1518_v25  ;;  %1282 = vmatprep.subr.msk.bf16.mxu0 %vm1468_vm2, %v1280_v30  ;;  %v1346_v2 = vpack.c.bf16 %v1248_v60, %v1246_v59  ;;  %v1250_v3 = vld [vmem:[%s1705_s1 + $0x128] sm:$0xff]  ;;  %v1252_v4 = vld [vmem:[%s1705_s1 + $0x138] sm:$0xf]  ;;  %v1348_v6 = vpack.c.bf16 %v1247_v1, %v1245_v0  ;;  %v1249_v8 = vld [vmem:[%s1705_s1 + $0x120] sm:$0xff]  ;;  %v999_v12 = vrot.slane %v1514_v23, 2 }
  0x14   : > { %1207 = vmatmul.mubr.msk.f32.vlgmr.msra.gmra.mrb[0].mxu1 %vm192_vm4, %v375_v29  ;;  %v632_v54 = vsel %vm372_vm3, %v630_v46, %v1585_v47  ;;  %v817_v5 = vsel %vm814_vm5, %v815_v61, %v816_v62  ;;  %v1251_v9 = vld [vmem:[%s1705_s1 + $0x130] sm:$0xf]  ;;  %v1350_v11 = vpack.c.bf16 %v1252_v4, %v1250_v3  ;;  %v1000_v13 = vrot.slane %v1537_v33, 2 }
  0x15   : > { %1299 = vmatpush1.bf16.msra.mxu1 %v1278_v26  ;;  %450 = vmatprep.mubr.f32.mxu1 %v1417_v7  ;;  %v1353_v14 = vpack.c.bf16 %v1251_v9, %v1249_v8 }
  0x16   : > { %1302 = vmatprep.subr.msk.bf16.mxu1 %vm1468_vm2, %v1280_v30  ;;  %1200 = vmatmul.mubr.msk.f32.gmra.mrb[2].mxu0 %vm192_vm4, %v1537_v33  ;;  %v1001_v15 = vsel %vm814_vm5, %v999_v12, %v1000_v13 }
  0x17   : > { %1285 = vmatpush1.bf16.msk.msra.mxu0 %vm1468_vm2, %v1283_v34  ;;  %359 = vmatprep.mubr.f32.mxu0 %v1417_v7 }
  0x18   : > { %1208 = vmatmul.mubr.msk.f32.gmra.mrb[2].mxu1 %vm192_vm4, %v1518_v25  ;;  %1307 = vmatprep.subr.bf16.mxu0 %v1306_v37 }
  0x19   : > { %1305 = vmatpush1.bf16.msk.msra.mxu1 %vm1468_vm2, %v1283_v34  ;;  %521 = vmatprep.mubr.f32.mxu1 %v1417_v7 }
  0x1a   : > { %1317 = vmatprep.subr.bf16.mxu1 %v1306_v37  ;;  %1203 = vmatmul.mubr.msk.f32.vlgmr.msra.gmra.mrb[0].mxu0 %vm192_vm4, %v1503_v20 }
  0x1b   : > { %1309 = vmatpush1.bf16.msra.mxu0 %v1308_v40  ;;  %365 = vmatprep.mubr.f32.mxu0 %v1417_v7 }
  0x1c   : > { %1211 = vmatmul.mubr.msk.f32.vlgmr.msra.gmra.mrb[0].mxu1 %vm192_vm4, %v1514_v23  ;;  %1312 = vmatprep.subr.msk.bf16.mxu0 %vm1468_vm2, %v1310_v43 }
  0x1d   : > { %1319 = vmatpush1.bf16.msra.mxu1 %v1308_v40  ;;  %527 = vmatprep.mubr.f32.mxu1 %v1417_v7 }
  0x1e   : > { %1322 = vmatprep.subr.msk.bf16.mxu1 %vm1468_vm2, %v1310_v43  ;;  %1204 = vmatmul.mubr.msk.f32.gmra.mrb[2].mxu0 %vm192_vm4, %v1505_v21 }
  0x1f   : > { %1315 = vmatpush1.bf16.msk.msra.mxu0 %vm1468_vm2, %v1313_v48  ;;  %613 = vmatprep.mubr.f32.mxu0 %v1417_v7 }
  0x20   : > { %1212 = vmatmul.mubr.msk.f32.gmra.mrb[2].mxu1 %vm192_vm4, %v1537_v33  ;;  %1327 = vmatprep.subr.bf16.mxu0 %v1326_v51 }
  0x21   : > { %1325 = vmatpush1.bf16.msk.msra.mxu1 %vm1468_vm2, %v1313_v48  ;;  %701 = vmatprep.mubr.f32.mxu1 %v1417_v7 }
  0x22   : > { %1337 = vmatprep.subr.bf16.mxu1 %v1326_v51  ;;  %1223 = vmatmul.mubr.msk.f32.vlgmr.msra.gmra.mrb[0].mxu0 %vm192_vm4, %v375_v29  ;;  %v1261_v29 = vld [vmem:[%s1706_s2] ss:$0 sm:$0xff] }
  0x23   : > { %1329 = vmatpush1.bf16.msra.mxu0 %v1328_v55  ;;  %619 = vmatprep.mubr.f32.mxu0 %v1417_v7 }
  0x24   : > { %1227 = vmatmul.mubr.msk.f32.vlgmr.msra.gmra.mrb[0].mxu1 %vm192_vm4, %v632_v54  ;;  %1332 = vmatprep.subr.msk.bf16.mxu0 %vm1468_vm2, %v1330_v58 }
  0x25   : > { %1339 = vmatpush1.bf16.msra.mxu1 %v1328_v55  ;;  %707 = vmatprep.mubr.f32.mxu1 %v1417_v7 }
  0x26   : > { %1342 = vmatprep.subr.msk.bf16.mxu1 %vm1468_vm2, %v1330_v58  ;;  %1224 = vmatmul.mubr.msk.f32.gmra.mrb[2].mxu0 %vm192_vm4, %v1518_v25 }
  0x27   : > { %1335 = vmatpush1.bf16.msk.msra.mxu0 %vm1468_vm2, %v1333_v63  ;;  %797 = vmatprep.mubr.f32.mxu0 %v1417_v7 }
  0x28   : > { %1228 = vmatmul.mubr.msk.f32.gmra.mrb[2].mxu1 %vm192_vm4, %v1585_v47  ;;  %1347 = vmatprep.subr.bf16.mxu0 %v1346_v2 }
  0x29   : > { %1345 = vmatpush1.bf16.msk.msra.mxu1 %vm1468_vm2, %v1333_v63  ;;  %886 = vmatprep.mubr.f32.mxu1 %v1417_v7 }
  0x2a   : > { %1357 = vmatprep.subr.bf16.mxu1 %v1346_v2  ;;  %1239 = vmatmul.mubr.msk.f32.vlgmr.msra.gmra.mrb[0].mxu0 %vm192_vm4, %v632_v54 }
  0x2b   : > { %1349 = vmatpush1.bf16.msra.mxu0 %v1348_v6  ;;  %803 = vmatprep.mubr.f32.mxu0 %v1417_v7 }
  0x2c   : > { %1243 = vmatmul.mubr.msk.f32.vlgmr.msra.gmra.mrb[0].mxu1 %vm192_vm4, %v817_v5  ;;  %1352 = vmatprep.subr.msk.bf16.mxu0 %vm1468_vm2, %v1350_v11 }
  0x2d   : > { %1359 = vmatpush1.bf16.msra.mxu1 %v1348_v6  ;;  %892 = vmatprep.mubr.f32.mxu1 %v1417_v7 }
  0x2e   : > { %1362 = vmatprep.subr.msk.bf16.mxu1 %vm1468_vm2, %v1350_v11  ;;  %1240 = vmatmul.mubr.msk.f32.gmra.mrb[2].mxu0 %vm192_vm4, %v1585_v47 }
  0x2f   : > { %1355 = vmatpush1.bf16.msk.msra.mxu0 %vm1468_vm2, %v1353_v14  ;;  %982 = vmatprep.mubr.f32.mxu0 %v1417_v7 }
  0x30   : > { %1244 = vmatmul.mubr.msk.f32.gmra.mrb[2].mxu1 %vm192_vm4, %v816_v62 }
  0x31   : > { %1365 = vmatpush1.bf16.msk.msra.mxu1 %vm1468_vm2, %v1353_v14  ;;  %1070 = vmatprep.mubr.f32.mxu1 %v1417_v7 }
  0x32   : > { %1255 = vmatmul.mubr.msk.f32.vlgmr.msra.gmra.mrb[0].mxu0 %vm192_vm4, %v817_v5 }
  0x33   : > { %988 = vmatprep.mubr.f32.mxu0 %v1417_v7 }
  0x34   : > { %1259 = vmatmul.mubr.msk.f32.vlgmr.msra.gmra.mrb[0].mxu1 %vm192_vm4, %v1001_v15 }
  0x35   : > { %1076 = vmatprep.mubr.f32.mxu1 %v1417_v7 }
  0x36   : > { %1256 = vmatmul.mubr.msk.f32.gmra.mrb[2].mxu0 %vm192_vm4, %v816_v62 }
  0x38   : > { %1260 = vmatmul.mubr.msk.f32.gmra.mrb[2].mxu1 %vm192_vm4, %v1000_v13 }
 0x105   : > { %v984_v10 = vpop.f32.mrb[0].mxu0 }
 0x106   : > { %v986_v18 = vpop.f32.mrb[1].mxu0 }
 0x107   : > { %v1072_v16 = vpop.f32.mrb[0].mxu1 }
 0x108   : > { %v1087_v17 = vmax.f32 %v984_v10, %v1072_v16  ;;  %v1074_v19 = vpop.f32.mrb[1].mxu1 }
 0x109   : > { %v1088_v20 = vmax.f32 %v986_v18, %v1074_v19  ;;  %v990_v21 = vpop.f32.mrb[2].mxu0 }
 0x10a   : > { %1095 = vrot.lane.b32.xlu0 %v1087_v17, %s1419_s23  ;;  %v992_v24 = vpop.f32.mrb[3].mxu0 }
 0x10b   : > { %v1078_v22 = vpop.f32.mrb[2].mxu1 }
 0x10c   : > { %v1089_v23 = vmax.f32 %v990_v21, %v1078_v22  ;;  %v1080_v25 = vpop.f32.mrb[3].mxu1 }
 0x10d   : > { %v1090_v26 = vmax.f32 %v992_v24, %v1080_v25 }
 0x10e   : > { %1097 = vrot.lane.b32.xlu0 %v1088_v20, %s1419_s23  ;;  %1099 = vrot.lane.b32.xlu1 %v1089_v23, %s1419_s23 }
 0x112   : > { %1101 = vrot.lane.b32.xlu1 %v1090_v26, %s1419_s23 }
 0x17c   : > { %v1096_v7 = vpop.permute.xlu0 %1095 }
 0x180   : > { %v1098_v27 = vpop.permute.xlu0 %1097  ;;  %v1100_v28 = vpop.permute.xlu1 %1099 }
 0x181   : > { %v1104_v30 = vsel %vm1103_vm6, %v1096_v7, %v1098_v27 }
 0x182   : > { %v1108_v31 = vmax.f32 %v1087_v17, %v1104_v30 }
 0x184   : > { %v1117_v32 = vadd.f32 %v1261_v29, %v1108_v31  ;;  %v1102_v33 = vpop.permute.xlu1 %1101 }
 0x185   : > { %v1105_v34 = vsel %vm1103_vm6, %v1100_v28, %v1102_v33 }
 0x186   : > { %v1119_v35 = vmax.f32 %v1117_v32, 0.0  ;;  %v1109_v36 = vmax.f32 %v1089_v23, %v1105_v34 }
 0x188   : > { %1122 = vst.msk [vmem:[%s170_s29] sm:$0xff] %vm1121_vm7, %v1119_v35  ;;  %v1118_v37 = vadd.f32 %v1261_v29, %v1109_v36 }
 0x18a   : > { %v1120_v38 = vmax.f32 %v1118_v37, 0.0 }
 0x18c   : > { %1124 = vst.msk [vmem:[%s170_s29 + $0x8] sm:$0xf] %vm1123_vm8, %v1120_v38 }
 0x18d PF: > { %s13_s12 = sadd.s32 1, %s1415_s12  }
 0x18e   : > { %p10_p4 = scmp.ge.s32.totalorder %s13_s12, 4  }
 0x190   :  { %12 = sbr.rel (!%p10_p4) target bundleno = 1 (0x1), region = 66 }

// kernel: tile.18
= control target key start
LH: loop header
LB: loop body
LE: loop exit
PB: predicated region body
PF: predicated region fallthrough
CT: control target
= control target key end

     0   :  { %s22_s0 = inlined_call_operand.vmem [shape: f32[16], index: 0, kind: input, shape index: {}]   ;;  %s23_s1 = inlined_call_operand.vmem [shape: f32[4,16], index: 1, kind: output, shape index: {}]  }
   0x1   :  { %v4_v0 = vld [vmem:[%s22_s0] ss:$0 sm:$0xff] }
   0x2   :  { %5 = vst [vmem:[%s23_s1] sm:$0xf] %v4_v0 }

// kernel: tile.19
= control target key start
LH: loop header
LB: loop body
LE: loop exit
PB: predicated region body
PF: predicated region fallthrough
CT: control target
= control target key end

     0   :  { %vm7_vm0 = vcmask 130048   ;;  %s37_s8 = smov 16   ;;  %s38_s9 = smov 32   ;;  %vm13_vm1 = vcmask 523648   ;;  %vm19_vm2 = vcmask 392448   ;;  %vm25_vm3 = vcmask 261248   ;;  %s55_s0 = inlined_call_operand.vmem [shape: f32[4,16], index: 0, kind: input, shape index: {}]   ;;  %s56_s1 = inlined_call_operand.vmem [shape: f32[1,64], index: 1, kind: output, shape index: {}]  }
   0x1   :  { %v4_v0 = vld [vmem:[%s55_s0] sm:$0xf]  ;;  %s36_s0 = smov 48  }
   0x2   :  { %5 = vst [vmem:[#allocation1] sm:$0xf] %v4_v0 }
   0x9   :  { %v10_v1 = vld [vmem:[#allocation1 + $0x3] sm:$0x1]   ;;  %v22_v2 = vld [vmem:[#allocation1 + $0x1] sm:$0x1]   ;;  %v6_v3 = vld [vmem:[#allocation1] sm:$0x1]  }
   0xa   :  { %11 = vrot.lane.b32.xlu0 %v10_v1, %s36_s0  ;;  %23 = vrot.lane.b32.xlu1 %v22_v2, %s37_s8  ;;  %v16_v4 = vld [vmem:[#allocation1 + $0x2] sm:$0x1]   ;;  %8 = vst.msk [vmem:[#allocation0] sm:$0x1] %vm7_vm0, %v6_v3  }
   0xe   :  { %17 = vrot.lane.b32.xlu0 %v16_v4, %s38_s9 }
  0x7c   :  { %v12_v5 = vpop.permute.xlu0 %11   ;;  %v24_v6 = vpop.permute.xlu1 %23  }
  0x7d   :  { %14 = vst.msk [vmem:[#allocation0] sm:$0x1] %vm13_vm1, %v12_v5  }
  0x80   :  { %v18_v7 = vpop.permute.xlu0 %17  }
  0x81   :  { %20 = vst.msk [vmem:[#allocation0] sm:$0x1] %vm19_vm2, %v18_v7  }
  0x82   :  { %26 = vst.msk [vmem:[#allocation0] sm:$0x1] %vm25_vm3, %v24_v6  }
  0x89   :  { %v30_v8 = vld [vmem:[#allocation0] sm:$0x1] }
  0x8a   :  { %32 = vst [vmem:[%s56_s1] sm:$0x1] %v30_v8 }

// kernel: over_lenet_forward.3
= control target key start
LH: loop header
LB: loop body
LE: loop exit
PB: predicated region body
PF: predicated region fallthrough
CT: control target
= control target key end

     0   :  { %14 = vsyncpa [#allocation3], 0  ;;  %s6710_s0 = inlined_call_operand.vmem [shape: f32[2,2,6,72], index: 0, kind: input, shape index: {}]   ;;  %s6711_s1 = inlined_call_operand.vmem [shape: f32[5,72,128], index: 1, kind: input, shape index: {}]   ;;  %s6712_s2 = inlined_call_operand.vmem [shape: f32[1,64], index: 2, kind: input, shape index: {}]   ;;  %s6713_s3 = inlined_call_operand.vmem [shape: f32[4,64,600], index: 3, kind: input, shape index: {}]   ;;  %s6714_s4 = inlined_call_operand.vmem [shape: f32[1,600], index: 4, kind: input, shape index: {}]   ;;  %s6715_s5 = inlined_call_operand.vmem [shape: f32[600,420], index: 5, kind: input, shape index: {}]   ;;  %s6716_s6 = inlined_call_operand.vmem [shape: f32[1,420], index: 6, kind: input, shape index: {}]   ;;  %s6717_s7 = inlined_call_operand.vmem [shape: f32[420,128], index: 7, kind: input, shape index: {}]   ;;  %s6718_s8 = inlined_call_operand.vmem [shape: f32[1,128], index: 8, kind: input, shape index: {}]   ;;  %s6719_s9 = inlined_call_operand.hbm [shape: f32[2,1,128], index: 9, kind: output, shape index: {}]  }
   0x1   :  { %16 = vsyncpa [#allocation3 + $0x1], 0  ;;  %s4725_s30 = smov 0   ;;  %s4727_s10 = smov 0  }
   0x2   :  { %s4729_s11 = smov 0   ;;  %s4731_s12 = smov 0  }
   0x3 LB: > { %s4746_s13 = sadd.s32 4294967295, %s4668_s12   ;;  %s3219_s14 = sadd.s32 4294967294, %s4668_s12   ;;  %s4668_s12 = sphi %s4731_s12, %s6725_s12   ;;  %s4664_s11 = sphi %s4729_s11, %s6724_s11   ;;  %s4660_s10 = sphi %s4727_s10, %s6723_s10   ;;  %s4656_s30 = sphi %s4725_s30, %s6722_s30  }
   0x4   : > { %s4750_s15 = sadd.s32 1, %s4668_s12   ;;  %s223_s16 = sadd.s32 1, %s4664_s11 }
   0x5   : > { %s220_s17 = ssub.s32 %s4668_s12, %s4750_s15  ;;  %p233_p0 = scmp.ne.s32.totalorder %s4664_s11, %s4660_s10 }
   0x6   : > { %p221_p1 = scmp.eq.s32.totalorder %s220_s17, 0  ;;  %p234_p2 = scmp.eq.s32.totalorder %s4746_s13, 1 }
   0x7   : > { %p239_p3 = scmp.ne.s32.totalorder %s4660_s10, %s4656_s30  ;;  %p240_p4 = scmp.eq.s32.totalorder %s3219_s14, 1 }
   0x8   : > { %s4761_s18 = scalar_select %p221_p1, %s4664_s11, %s223_s16  }
   0x9   : > { %p4763_p5 = por %p234_p2, %p233_p0  ;;  %p4767_p6 = por %p240_p4, %p239_p3 }
   0xa   : > { %p3222_p7 = scmp.ge.s32.totalorder %s4668_s12, 1  ;;  %p290_p8 = scmp.lt.s32.totalorder %s4668_s12, 3 }
   0xc   : > { %p291_p9 = pnand %p3222_p7, %p290_p8 }
   0xd   : > { %v3225_v0 = vld [vmem:[%s6711_s1 + $0x48] sm:$0xff] (!%p291_p9)  ;;  %v3226_v1 = vld [vmem:[%s6711_s1 + $0x50] sm:$0xff] (!%p291_p9)  ;;  %v3227_v2 = vld [vmem:[%s6711_s1 + $0x58] sm:$0xff] (!%p291_p9)  ;;  %v4670_v3 = vmov (!%p291_p9), 0.0|0.0   ;;  %p325_p10 = scmp.lt.s32.totalorder (!%p291_p9), %s4746_s13, 1  ;;  %vm4671_vm0 = vmmov (!%p291_p9), 0  }
   0xe   : > { %294 = sbr.rel (%p291_p9) target bundleno = 1281 (0x501), region = 56  ;;  %3869 = vmatprep.subr.bf16.mxu0 (!%p291_p9), %v4670_v3  ;;  %3893 = vmatprep.subr.bf16.mxu1 (!%p291_p9), %v4670_v3  ;;  %v3870_v4 = vpack.c.bf16 (!%p291_p9), %v3226_v1, %v3225_v0  ;;  %v3228_v5 = vld [vmem:[%s6711_s1 + $0x60] sm:$0xff] (!%p291_p9)  ;;  %v4672_v6 = vmov (!%p291_p9), 0.0   ;;  %v3229_v8 = vld [vmem:[%s6711_s1 + $0x68] sm:$0xff] (!%p291_p9)  ;;  %v3230_v9 = vld [vmem:[%s6711_s1 + $0x70] sm:$0xff] (!%p291_p9)  ;;  %vm351_vm1 = vcmask (!%p291_p9), 588800  }
   0xf   : > { %3601 = vmatprep.mubr.msk.f32.mxu0 (!%p291_p9), %vm4671_vm0, %v4672_v6  ;;  %3643 = vmatprep.mubr.msk.f32.mxu1 (!%p291_p9), %vm4671_vm0, %v4672_v6  ;;  %v3873_v7 = vpack.c.bf16 (!%p291_p9), %v3228_v5, %v3227_v2  ;;  %v3876_v10 = vpack.c.bf16 (!%p291_p9), %v3230_v9, %v3229_v8  ;;  %v3231_v11 = vld [vmem:[%s6711_s1 + $0x78] sm:$0xff] (!%p291_p9)  ;;  %v3232_v12 = vld [vmem:[%s6711_s1 + $0x80] sm:$0xff] (!%p291_p9)  ;;  %v333_v16 = vld [vmem:[%s6711_s1 + $0x8] sm:$0xff] (!%p291_p9)  ;;  %s4673_s28 = smov (!%p291_p9), 64   ;;  %vm1204_vm2 = vcmask (!%p291_p9), 523264   ;;  %vm2514_vm3 = vcmask (!%p291_p9), 719872  }
  0x10   : > { %3871 = vmatpush3.bf16.msra.mxu0 (!%p291_p9), %v3870_v4  ;;  %3895 = vmatpush3.bf16.msra.mxu1 (!%p291_p9), %v3870_v4  ;;  %v3879_v13 = vpack.c.bf16 (!%p291_p9), %v3232_v12, %v3231_v11  ;;  %v332_v15 = vld [vmem:[%s6711_s1] sm:$0xff] (!%p291_p9)  ;;  %v3233_v17 = vld [vmem:[%s6711_s1 + $0x88] sm:$0xff] (!%p291_p9)  ;;  %v334_v21 = vld [vmem:[%s6711_s1 + $0x10] sm:$0xff] (!%p291_p9)  ;;  %vm3006_vm4 = vcmask (!%p291_p9), 1043456   ;;  %vm3002_vm5 = vcmask (!%p291_p9), 293888   ;;  %s3408_s24 = sshll.u32 (!%p291_p9), %s4746_s13, 4 }
  0x11   : > { %3872 = vmatprep.subr.bf16.mxu0 (!%p291_p9), %v4670_v3  ;;  %3896 = vmatprep.subr.bf16.mxu1 (!%p291_p9), %v4670_v3  ;;  %v3882_v20 = vpack.c.bf16 (!%p291_p9), %v333_v16, %v332_v15  ;;  %v335_v22 = vld [vmem:[%s6711_s1 + $0x18] sm:$0xff] (!%p291_p9)  ;;  %v336_v24 = vld [vmem:[%s6711_s1 + $0x20] sm:$0xff] (!%p291_p9)  ;;  %v337_v25 = vld [vmem:[%s6711_s1 + $0x28] sm:$0xff] (!%p291_p9) }
  0x12   : > { %v3885_v23 = vpack.c.bf16 (!%p291_p9), %v335_v22, %v334_v21  ;;  %v3888_v26 = vpack.c.bf16 (!%p291_p9), %v337_v25, %v336_v24  ;;  %v338_v27 = vld [vmem:[%s6711_s1 + $0x30] sm:$0xff] (!%p291_p9)  ;;  %v339_v28 = vld [vmem:[%s6711_s1 + $0x38] sm:$0xff] (!%p291_p9)  ;;  %v340_v32 = vld [vmem:[%s6711_s1 + $0x40] sm:$0xff] (!%p291_p9) }
  0x13   : > { %v3891_v29 = vpack.c.bf16 (!%p291_p9), %v339_v28, %v338_v27  ;;  %v3238_v30 = vld [vmem:[%s6711_s1 + $0x90] sm:$0xff] (!%p291_p9)  ;;  %v3239_v31 = vld [vmem:[%s6711_s1 + $0x98] sm:$0xff] (!%p291_p9)  ;;  %v3240_v34 = vld [vmem:[%s6711_s1 + $0xa0] sm:$0xff] (!%p291_p9) }
  0x14   : > { %3874 = vmatpush3.bf16.msra.mxu0 (!%p291_p9), %v3873_v7  ;;  %3898 = vmatpush3.bf16.msra.mxu1 (!%p291_p9), %v3873_v7  ;;  %v3918_v33 = vpack.c.bf16 (!%p291_p9), %v3239_v31, %v3238_v30  ;;  %v3241_v35 = vld [vmem:[%s6711_s1 + $0xa8] sm:$0xff] (!%p291_p9)  ;;  %v3242_v37 = vld [vmem:[%s6711_s1 + $0xb0] sm:$0xff] (!%p291_p9)  ;;  %v3243_v38 = vld [vmem:[%s6711_s1 + $0xb8] sm:$0xff] (!%p291_p9) }
  0x15   : > { %s326_s21 = scalar_select %p325_p10, %s4746_s13, 1  ;;  %3875 = vmatprep.subr.bf16.mxu0 %v4670_v3  ;;  %3899 = vmatprep.subr.bf16.mxu1 %v4670_v3  ;;  %v3921_v36 = vpack.c.bf16 %v3241_v35, %v3240_v34  ;;  %v3924_v39 = vpack.c.bf16 %v3243_v38, %v3242_v37  ;;  %v3244_v40 = vld [vmem:[%s6711_s1 + $0xc0] sm:$0xff]  ;;  %v3245_v41 = vld [vmem:[%s6711_s1 + $0xc8] sm:$0xff]  ;;  %v3249_v43 = vld [vmem:[%s6711_s1 + $0xd8] sm:$0xff] }
  0x16   : > { %v3927_v42 = vpack.c.bf16 %v3245_v41, %v3244_v40  ;;  %v3250_v44 = vld [vmem:[%s6711_s1 + $0xe0] sm:$0xff]  ;;  %v3246_v45 = vld [vmem:[%s6711_s1 + $0xd0] sm:$0xff]  ;;  %v3251_v48 = vld [vmem:[%s6711_s1 + $0xe8] sm:$0xff]  ;;  %s4674_s13 = smov [#allocation2]  }
  0x17   : > { %s3411_s26 = sshll.u32 %s326_s21, 4  ;;  %v3942_v47 = vpack.c.bf16 %v3250_v44, %v3249_v43  ;;  %v3252_v49 = vld [vmem:[%s6711_s1 + $0xf0] sm:$0xff]  ;;  %v3253_v51 = vld [vmem:[%s6711_s1 + $0xf8] sm:$0xff]  ;;  %v3254_v52 = vld [vmem:[%s6711_s1 + $0x100] sm:$0xff]  ;;  %s323_s21 = sand.u32 1, %s4660_s10  }
  0x18   : > { %3877 = vmatpush3.bf16.msra.mxu0 %v3876_v10  ;;  %3901 = vmatpush3.bf16.msra.mxu1 %v3876_v10  ;;  %s329_s29 = scalar_lea.vmem %s6710_s0, %s3411_s26  ;;  %v3945_v50 = vpack.c.bf16 %v3252_v49, %v3251_v48  ;;  %v3948_v53 = vpack.c.bf16 %v3254_v52, %v3253_v51  ;;  %v3255_v54 = vld [vmem:[%s6711_s1 + $0x108] sm:$0xff]  ;;  %v3256_v55 = vld [vmem:[%s6711_s1 + $0x110] sm:$0xff]  ;;  %v3260_v57 = vld [vmem:[%s6711_s1 + $0x120] sm:$0xff]  ;;  %s324_s25 = scalar_lea.vmem [#allocation2], %s323_s21 }
  0x19   : > { %3878 = vmatprep.subr.bf16.mxu0 %v4670_v3  ;;  %3902 = vmatprep.subr.bf16.mxu1 %v4670_v3  ;;  %v4814_v14 = vld [vmem:[%s329_s29] sm:$0x3f]  ;;  %v4828_v19 = vld [vmem:[%s329_s29 + $0x8] sm:$0x3f]  ;;  %v3951_v56 = vpack.c.bf16 %v3256_v55, %v3255_v54  ;;  %v3257_v59 = vld [vmem:[%s6711_s1 + $0x118] sm:$0xff]  ;;  %s3164_s26 = sshll.u32 %s324_s25, 4  ;;  %s6668_s29 = scalar_lea.hbm %s6719_s9, %s3408_s24  ;;  %s6670_s26 = int_to_ptr.vmem [resolvable:$true] %s3164_s26 }
  0x1a   : > { %v498_v18 = vrot.slane %v4814_v14, 1  ;;  %v722_v46 = vrot.slane %v4828_v19, 1  ;;  %v3261_v58 = vld [vmem:[%s6711_s1 + $0x128] sm:$0xff]  ;;  %v877_v60 = vrot.slane %v4814_v14, 2  ;;  %v3262_v62 = vld [vmem:[%s6711_s1 + $0x130] sm:$0xff]  ;;  %v3263_v63 = vld [vmem:[%s6711_s1 + $0x138] sm:$0xff] }
  0x1b   : > { %v3966_v61 = vpack.c.bf16 %v3261_v58, %v3260_v57  ;;  %v3969_v0 = vpack.c.bf16 %v3263_v63, %v3262_v62  ;;  %v3264_v1 = vld [vmem:[%s6711_s1 + $0x140] sm:$0xff]  ;;  %v3265_v2 = vld [vmem:[%s6711_s1 + $0x148] sm:$0xff]  ;;  %v3266_v5 = vld [vmem:[%s6711_s1 + $0x150] sm:$0xff]  ;;  %v1032_v9 = vrot.slane %v4828_v19, 2  ;;  %s3152_s14 = scalar_lea.sflag [#allocation3], %s323_s21  ;;  %s4606_s16 = scalar_lea.vmem %s6670_s26, 16 }
  0x1c   : > { %3880 = vmatpush3.bf16.msra.mxu0 %v3879_v13  ;;  %3904 = vmatpush3.bf16.msra.mxu1 %v3879_v13  ;;  %v3972_v4 = vpack.c.bf16 %v3265_v2, %v3264_v1  ;;  %v3267_v7 = vld [vmem:[%s6711_s1 + $0x158] sm:$0xff]  ;;  %v3268_v10 = vld [vmem:[%s6711_s1 + $0x160] sm:$0xff]  ;;  %v3273_v11 = vld [vmem:[%s6713_s3 + $0x148] sm:$0xff]  ;;  %p4607_p11 = scmp.ne.s32.totalorder %s6670_s26, %s4606_s16  ;;  %s4610_s17 = sshll.u32 %s4674_s13, 4  ;;  %s4611_s17 = int_to_ptr.vmem [resolvable:$false] %s4610_s17 }
  0x1d   : > { %3599 = vmatprep.subr.mxu0 %v4672_v6  ;;  %3641 = vmatprep.subr.mxu1 %v4672_v6  ;;  %v3975_v8 = vpack.c.bf16 %v3267_v7, %v3266_v5  ;;  %v3278_v12 = vld [vmem:[%s6713_s3 + $0x170] sm:$0xff]  ;;  %v3275_v13 = vld [vmem:[%s6713_s3 + $0x158] sm:$0xff]  ;;  %v3280_v15 = vld [vmem:[%s6713_s3 + $0x180] sm:$0xff]  ;;  %s4612_s22 = scalar_lea.vmem %s4611_s17, 32  ;;  %p4613_p0 = scmp.lt.s32.totalorder %s6670_s26, %s4611_s17 }
  0x1e   : > { %v3272_v16 = vld [vmem:[%s6713_s3 + $0x140] sm:$0xff]  ;;  %v3279_v21 = vld [vmem:[%s6713_s3 + $0x178] sm:$0xff]  ;;  %v3285_v25 = vld [vmem:[%s6713_s3 + $0x1a8] sm:$0xff]  ;;  %p4608_p12 = pnand %p4607_p11, %p4763_p5  ;;  %p4614_p1 = scmp.lt.s32.totalorder %s4612_s22, %s4606_s16 }
  0x1f   : > { %v3283_v22 = vld [vmem:[%s6713_s3 + $0x198] sm:$0xff]  ;;  %v3288_v24 = vld [vmem:[%s6713_s3 + $0x1c0] sm:$0xff]  ;;  %v3293_v35 = vld [vmem:[%s6713_s3 + $0x1e8] sm:$0xff] }
  0x20   : > { %3600 = vmatpush3.msra.mxu0 %v3233_v17  ;;  %3642 = vmatpush3.msra.mxu1 %v3233_v17  ;;  %v3277_v17 = vld [vmem:[%s6713_s3 + $0x168] sm:$0xff]  ;;  %v3993_v27 = vpack.c.bf16 %v3288_v24, %v3283_v22  ;;  %v3287_v30 = vld [vmem:[%s6713_s3 + $0x1b8] sm:$0xff]  ;;  %v3284_v31 = vld [vmem:[%s6713_s3 + $0x1a0] sm:$0xff]  ;;  %p4609_p13 = pneg %p4608_p12  ;;  %p4615_p2 = por %p4614_p1, %p4613_p0 }
  0x21   : > { %3881 = vmatprep.subr.bf16.mxu0 %v4670_v3  ;;  %3905 = vmatprep.subr.bf16.mxu1 %v4670_v3  ;;  %v3295_v37 = vld [vmem:[%s6713_s3 + $0x1f8] sm:$0xff]  ;;  %v3292_v40 = vld [vmem:[%s6713_s3 + $0x1e0] sm:$0xff]  ;;  %v3297_v41 = vld [vmem:[%s6713_s3 + $0x208] sm:$0xff] }
  0x22   : > { %3602 = vmatmul.mubr.msk.f32.vlgmr.msra.gmra.mrb[0].mxu0 %vm351_vm1, %v4828_v19  ;;  %3644 = vmatmul.mubr.msk.f32.vlgmr.msra.gmra.mrb[0].mxu1 %vm351_vm1, %v498_v18  ;;  %v3999_v43 = vpack.c.bf16 %v3297_v41, %v3292_v40  ;;  %v3294_v44 = vld [vmem:[%s6713_s3 + $0x1f0] sm:$0xff]  ;;  %v3308_v48 = vld [vmem:[%s6713_s3 + $0x260] sm:$0xff]  ;;  %v3307_v54 = vld [vmem:[%s6713_s3 + $0x258] sm:$0xff]  ;;  %p4616_p3 = pnand %p4615_p2, %p4609_p13 }
  0x23   : > { %3883 = vmatpush3.bf16.msra.mxu0 %v3882_v20  ;;  %3907 = vmatpush3.bf16.msra.mxu1 %v3882_v20  ;;  %v3274_v20 = vld [vmem:[%s6713_s3 + $0x150] sm:$0xff]  ;;  %v3304_v55 = vld [vmem:[%s6713_s3 + $0x240] sm:$0xff]  ;;  %v1144_v24 = vld [vmem:[%s6713_s3 + $0xb8] sm:$0xff] }
  0x24   : > { %3884 = vmatprep.subr.bf16.mxu0 %v4670_v3  ;;  %3908 = vmatprep.subr.bf16.mxu1 %v4670_v3  ;;  %v3310_v51 = vld [vmem:[%s6713_s3 + $0x270] sm:$0xff]  ;;  %v3271_v5 = vld [vmem:[%s6712_s2] ss:$0 sm:$0xff]  ;;  %v1158_v41 = vld [vmem:[%s6713_s3 + $0x128] sm:$0xff] }
  0x25   : > { %3622 = vmatprep.mubr.msk.f32.mxu0 %vm4671_vm0, %v4672_v6  ;;  %3664 = vmatprep.mubr.msk.f32.mxu1 %vm4671_vm0, %v4672_v6  ;;  %v3302_v52 = vld [vmem:[%s6713_s3 + $0x230] sm:$0xff]  ;;  %v1133_v22 = vld [vmem:[%s6713_s3 + $0x60] sm:$0xff] }
  0x26   : > { %v4003_v57 = vpack.c.bf16 %v3307_v54, %v3302_v52  ;;  %v1153_v40 = vld [vmem:[%s6713_s3 + $0x100] sm:$0xff] }
  0x27   : > { %3886 = vmatpush3.bf16.msra.mxu0 %v3885_v23  ;;  %3910 = vmatpush3.bf16.msra.mxu1 %v3885_v23  ;;  %v4007_v23 = vpack.c.bf16 %v3279_v21, %v3274_v20  ;;  %v3291_v21 = vld [vmem:[%s6713_s3 + $0x1d8] sm:$0xff]  ;;  %v1137_v52 = vld [vmem:[%s6713_s3 + $0x80] sm:$0xff] }
  0x28   : > { %3887 = vmatprep.subr.bf16.mxu0 %v4670_v3  ;;  %3911 = vmatprep.subr.bf16.mxu1 %v4670_v3 }
  0x2b   : > { %3889 = vmatpush3.bf16.msra.mxu0 %v3888_v26  ;;  %3913 = vmatpush3.bf16.msra.mxu1 %v3888_v26  ;;  %v3290_v26 = vld [vmem:[%s6713_s3 + $0x1d0] sm:$0xff] }
  0x2c   : > { %3890 = vmatprep.subr.bf16.mxu0 %v4670_v3  ;;  %3914 = vmatprep.subr.bf16.mxu1 %v4670_v3  ;;  %v4009_v28 = vpack.c.bf16 %v3290_v26, %v3285_v25  ;;  %v1149_v25 = vld [vmem:[%s6713_s3 + $0xe0] sm:$0xff] }
  0x2f   : > { %3892 = vmatpush3.bf16.msra.mxu0 %v3891_v29  ;;  %3916 = vmatpush3.bf16.msra.mxu1 %v3891_v29  ;;  %v3282_v29 = vld [vmem:[%s6713_s3 + $0x190] sm:$0xff] }
  0x30   : > { %3620 = vmatprep.subr.mxu0 %v4672_v6  ;;  %3662 = vmatprep.subr.mxu1 %v4672_v6 }
  0x33   : > { %3621 = vmatpush3.msra.mxu0 %v340_v32  ;;  %3663 = vmatpush3.msra.mxu1 %v340_v32  ;;  %v3995_v32 = vpack.c.bf16 %v3287_v30, %v3282_v29  ;;  %v4057_v29 = vpack.c.bf16 %v1149_v25, %v1144_v24  ;;  %v3301_v30 = vld [vmem:[%s6713_s3 + $0x228] sm:$0xff] }
  0x34   : > { %3917 = vmatprep.subr.bf16.mxu0 %v4670_v3  ;;  %3929 = vmatprep.subr.bf16.mxu1 %v4670_v3  ;;  %v3323_v24 = vld [vmem:[%s6713_s3 + $0x2a8] sm:$0xff] }
  0x35   : > { %3623 = vmatmul.mubr.msk.f32.vlgmr.msra.gmra.mrb[0].mxu0 %vm351_vm1, %v4814_v14  ;;  %3665 = vmatmul.mubr.msk.f32.vlgmr.msra.gmra.mrb[0].mxu1 %vm351_vm1, %v4828_v19  ;;  %v3989_v14 = vpack.c.bf16 %v3278_v12, %v3273_v11  ;;  %v3991_v19 = vpack.c.bf16 %v3277_v17, %v3272_v16  ;;  %v1123_v11 = vld [vmem:[%s6713_s3 + $0x10] sm:$0xff]  ;;  %v1128_v12 = vld [vmem:[%s6713_s3 + $0x38] sm:$0xff] }
  0x36   : > { %3919 = vmatpush3.bf16.msra.mxu0 %v3918_v33  ;;  %3931 = vmatpush3.bf16.msra.mxu1 %v3918_v33  ;;  %v3289_v33 = vld [vmem:[%s6713_s3 + $0x1c8] sm:$0xff]  ;;  %v4051_v17 = vpack.c.bf16 %v1128_v12, %v1123_v11  ;;  %v1151_v11 = vld [vmem:[%s6713_s3 + $0xf0] sm:$0xff]  ;;  %v1156_v12 = vld [vmem:[%s6713_s3 + $0x118] sm:$0xff] }
  0x37   : > { %3920 = vmatprep.subr.bf16.mxu0 %v4670_v3  ;;  %3932 = vmatprep.subr.bf16.mxu1 %v4670_v3  ;;  %v4011_v34 = vpack.c.bf16 %v3289_v33, %v3284_v31  ;;  %v1143_v31 = vld [vmem:[%s6713_s3 + $0xb0] sm:$0xff]  ;;  %v1154_v33 = vld [vmem:[%s6713_s3 + $0x108] sm:$0xff] }
  0x38   : > { %3685 = vmatprep.mubr.msk.f32.mxu0 %vm4671_vm0, %v4672_v6  ;;  %3706 = vmatprep.mubr.msk.f32.mxu1 %vm4671_vm0, %v4672_v6 }
  0x3a   : > { %3922 = vmatpush3.bf16.msra.mxu0 %v3921_v36  ;;  %3934 = vmatpush3.bf16.msra.mxu1 %v3921_v36  ;;  %v3298_v36 = vld [vmem:[%s6713_s3 + $0x210] sm:$0xff] }
  0x3b   : > { %3923 = vmatprep.subr.bf16.mxu0 %v4670_v3  ;;  %3935 = vmatprep.subr.bf16.mxu1 %v4670_v3  ;;  %v3997_v38 = vpack.c.bf16 %v3298_v36, %v3293_v35 }
  0x3e   : > { %3925 = vmatpush3.bf16.msra.mxu0 %v3924_v39  ;;  %3937 = vmatpush3.bf16.msra.mxu1 %v3924_v39  ;;  %v3300_v39 = vld [vmem:[%s6713_s3 + $0x220] sm:$0xff] }
  0x3f   : > { %3926 = vmatprep.subr.bf16.mxu0 %v4670_v3  ;;  %3938 = vmatprep.subr.bf16.mxu1 %v4670_v3 }
  0x42   : > { %3928 = vmatpush3.bf16.msra.mxu0 %v3927_v42  ;;  %3940 = vmatpush3.bf16.msra.mxu1 %v3927_v42  ;;  %v4013_v42 = vpack.c.bf16 %v3300_v39, %v3295_v37  ;;  %v3306_v37 = vld [vmem:[%s6713_s3 + $0x250] sm:$0xff]  ;;  %v3311_v39 = vld [vmem:[%s6713_s3 + $0x278] sm:$0xff] }
  0x43   : > { %3683 = vmatprep.subr.mxu0 %v4672_v6  ;;  %3704 = vmatprep.subr.mxu1 %v4672_v6 }
  0x46   : > { %3684 = vmatpush3.msra.mxu0 %v3246_v45  ;;  %3705 = vmatpush3.msra.mxu1 %v3246_v45  ;;  %v3299_v45 = vld [vmem:[%s6713_s3 + $0x218] sm:$0xff] }
  0x47   : > { %3941 = vmatprep.subr.bf16.mxu0 %v4670_v3  ;;  %3953 = vmatprep.subr.bf16.mxu1 %v4670_v3 }
  0x48   : > { %3686 = vmatmul.mubr.msk.f32.vlgmr.msra.gmra.mrb[0].mxu0 %vm351_vm1, %v498_v18  ;;  %3707 = vmatmul.mubr.msk.f32.vlgmr.msra.gmra.mrb[0].mxu1 %vm351_vm1, %v722_v46  ;;  %v4005_v18 = vpack.c.bf16 %v3280_v15, %v3275_v13  ;;  %v1134_v13 = vld [vmem:[%s6713_s3 + $0x68] sm:$0xff] }
  0x49   : > { %3943 = vmatpush3.bf16.msra.mxu0 %v3942_v47  ;;  %3955 = vmatpush3.bf16.msra.mxu1 %v3942_v47  ;;  %v3303_v47 = vld [vmem:[%s6713_s3 + $0x238] sm:$0xff] }
  0x4a   : > { %3944 = vmatprep.subr.bf16.mxu0 %v4670_v3  ;;  %3956 = vmatprep.subr.bf16.mxu1 %v4670_v3  ;;  %v4001_v49 = vpack.c.bf16 %v3308_v48, %v3303_v47  ;;  %v1126_v48 = vld [vmem:[%s6713_s3 + $0x28] sm:$0xff] }
  0x4b   : > { %3727 = vmatprep.mubr.msk.f32.mxu0 %vm4671_vm0, %v4672_v6  ;;  %3748 = vmatprep.mubr.msk.f32.mxu1 %vm4671_vm0, %v4672_v6 }
  0x4d   : > { %3946 = vmatpush3.bf16.msra.mxu0 %v3945_v50  ;;  %3958 = vmatpush3.bf16.msra.mxu1 %v3945_v50  ;;  %v3305_v50 = vld [vmem:[%s6713_s3 + $0x248] sm:$0xff] }
  0x4e   : > { %3947 = vmatprep.subr.bf16.mxu0 %v4670_v3  ;;  %3959 = vmatprep.subr.bf16.mxu1 %v4670_v3 }
  0x51   : > { %3949 = vmatpush3.bf16.msra.mxu0 %v3948_v53  ;;  %3961 = vmatpush3.bf16.msra.mxu1 %v3948_v53  ;;  %v4017_v53 = vpack.c.bf16 %v3310_v51, %v3305_v50  ;;  %v1130_v50 = vld [vmem:[%s6713_s3 + $0x48] sm:$0xff]  ;;  %v1132_v51 = vld [vmem:[%s6713_s3 + $0x58] sm:$0xff] }
  0x52   : > { %3950 = vmatprep.subr.bf16.mxu0 %v4670_v3  ;;  %3962 = vmatprep.subr.bf16.mxu1 %v4670_v3 }
  0x55   : > { %3952 = vmatpush3.bf16.msra.mxu0 %v3951_v56  ;;  %3964 = vmatpush3.bf16.msra.mxu1 %v3951_v56  ;;  %v3309_v56 = vld [vmem:[%s6713_s3 + $0x268] sm:$0xff] }
  0x56   : > { %3725 = vmatprep.subr.mxu0 %v4672_v6  ;;  %3746 = vmatprep.subr.mxu1 %v4672_v6  ;;  %v4019_v58 = vpack.c.bf16 %v3309_v56, %v3304_v55  ;;  %v1131_v55 = vld [vmem:[%s6713_s3 + $0x50] sm:$0xff]  ;;  %v4037_v56 = vpack.c.bf16 %v1137_v52, %v1132_v51  ;;  %v3345_v52 = vld [vmem:[%s6713_s3 + $0x358] sm:$0xff] }
  0x57   : > { %v3340_v51 = vld [vmem:[%s6713_s3 + $0x330] sm:$0xff] }
  0x59   : > { %3726 = vmatpush3.msra.mxu0 %v3257_v59  ;;  %3747 = vmatpush3.msra.mxu1 %v3257_v59  ;;  %v1124_v59 = vld [vmem:[%s6713_s3 + $0x18] sm:$0xff] }
  0x5a   : > { %3965 = vmatprep.subr.bf16.mxu0 %v4670_v3  ;;  %3977 = vmatprep.subr.bf16.mxu1 %v4670_v3 }
  0x5b   : > { %3728 = vmatmul.mubr.msk.f32.vlgmr.msra.gmra.mrb[0].mxu0 %vm351_vm1, %v722_v46  ;;  %3749 = vmatmul.mubr.msk.f32.vlgmr.msra.gmra.mrb[0].mxu1 %vm351_vm1, %v877_v60  ;;  %v4015_v46 = vpack.c.bf16 %v3299_v45, %v3294_v44  ;;  %v4031_v44 = vpack.c.bf16 %v3311_v39, %v3306_v37  ;;  %v4063_v45 = vpack.c.bf16 %v1158_v41, %v1153_v40  ;;  %v3330_v39 = vld [vmem:[%s6713_s3 + $0x2e0] sm:$0xff]  ;;  %v3335_v40 = vld [vmem:[%s6713_s3 + $0x308] sm:$0xff] }
  0x5c   : > { %3967 = vmatpush3.bf16.msra.mxu0 %v3966_v61  ;;  %3979 = vmatpush3.bf16.msra.mxu1 %v3966_v61  ;;  %v3339_v41 = vld [vmem:[%s6713_s3 + $0x328] sm:$0xff] }
  0x5d   : > { %3968 = vmatprep.subr.bf16.mxu0 %v4670_v3  ;;  %3980 = vmatprep.subr.bf16.mxu1 %v4670_v3 }
  0x5e   : > { %3769 = vmatprep.mubr.msk.f32.mxu0 %vm4671_vm0, %v4672_v6  ;;  %3790 = vmatprep.mubr.msk.f32.mxu1 %vm4671_vm0, %v4672_v6 }
  0x60   : > { %3970 = vmatpush3.bf16.msra.mxu0 %v3969_v0  ;;  %3982 = vmatpush3.bf16.msra.mxu1 %v3969_v0 }
  0x61   : > { %3971 = vmatprep.subr.bf16.mxu0 %v4670_v3  ;;  %3983 = vmatprep.subr.bf16.mxu1 %v4670_v3 }
  0x64   : > { %3973 = vmatpush3.bf16.msra.mxu0 %v3972_v4  ;;  %3985 = vmatpush3.bf16.msra.mxu1 %v3972_v4 }
  0x65   : > { %3974 = vmatprep.subr.bf16.mxu0 %v4670_v3  ;;  %3986 = vmatprep.subr.bf16.mxu1 %v4670_v3 }
  0x68   : > { %3976 = vmatpush3.bf16.msra.mxu0 %v3975_v8  ;;  %3988 = vmatpush3.bf16.msra.mxu1 %v3975_v8  ;;  %v3276_v8 = vld [vmem:[%s6713_s3 + $0x160] sm:$0xff] }
  0x69   : > { %3767 = vmatprep.subr.mxu0 %v4672_v6  ;;  %3788 = vmatprep.subr.mxu1 %v4672_v6 }
  0x6c   : > { %3768 = vmatpush3.msra.mxu0 %v3268_v10  ;;  %3789 = vmatpush3.msra.mxu1 %v3268_v10  ;;  %v3281_v10 = vld [vmem:[%s6713_s3 + $0x188] sm:$0xff] }
  0x6d   : > { %3770 = vmatmul.mubr.msk.f32.vlgmr.msra.gmra.mrb[0].mxu0 %vm351_vm1, %v877_v60  ;;  %3791 = vmatmul.mubr.msk.f32.vlgmr.msra.gmra.mrb[0].mxu1 %vm351_vm1, %v1032_v9  ;;  %v1129_v60 = vld [vmem:[%s6713_s3 + $0x40] sm:$0xff]  ;;  %v4022_v16 = vpack.c.bf16 %v3281_v10, %v3276_v8 }
  0x6e   : > { %1271 = vmatprep.mubr.f32.mxu0 %v4672_v6  ;;  %1342 = vmatprep.mubr.f32.mxu1 %v4672_v6  ;;  %v4049_v61 = vpack.c.bf16 %v1129_v60, %v1124_v59  ;;  %v1140_v59 = vld [vmem:[%s6713_s3 + $0x98] sm:$0xff]  ;;  %v1142_v60 = vld [vmem:[%s6713_s3 + $0xa8] sm:$0xff]  ;;  %v1157_v8 = vld [vmem:[%s6713_s3 + $0x120] sm:$0xff] }
  0x6f   : > { %3990 = vmatprep.subr.bf16.mxu0 %v3989_v14  ;;  %4006 = vmatprep.subr.bf16.mxu1 %v4005_v18  ;;  %v1139_v14 = vld [vmem:[%s6713_s3 + $0x90] sm:$0xff] }
  0x70   : > { %3992 = vmatpush1.bf16.msra.mxu0 %v3991_v19  ;;  %4008 = vmatpush1.bf16.msra.mxu1 %v4007_v23  ;;  %v3286_v18 = vld [vmem:[%s6713_s3 + $0x1b0] sm:$0xff]  ;;  %v4053_v20 = vpack.c.bf16 %v1139_v14, %v1134_v13  ;;  %v1138_v23 = vld [vmem:[%s6713_s3 + $0x88] sm:$0xff] }
  0x71   : > { %3994 = vmatprep.subr.bf16.mxu0 %v3993_v27  ;;  %4010 = vmatprep.subr.bf16.mxu1 %v4009_v28  ;;  %v4025_v26 = vpack.c.bf16 %v3291_v21, %v3286_v18  ;;  %v4055_v27 = vpack.c.bf16 %v1138_v23, %v1133_v22  ;;  %v3296_v28 = vld [vmem:[%s6713_s3 + $0x200] sm:$0xff]  ;;  %v1155_v14 = vld [vmem:[%s6713_s3 + $0x110] sm:$0xff]  ;;  %v4047_v21 = vpack.c.bf16 %v1156_v12, %v1151_v11  ;;  %v3368_v11 = vld [vmem:[%s6713_s3 + $0x3f8] sm:$0xff] }
  0x72   : > { %v4028_v35 = vpack.c.bf16 %v3301_v30, %v3296_v28  ;;  %v3324_v18 = vld [vmem:[%s6713_s3 + $0x2b0] sm:$0xff]  ;;  %v3318_v23 = vld [vmem:[%s6713_s3 + $0x280] sm:$0xff]  ;;  %v3325_v28 = vld [vmem:[%s6713_s3 + $0x2b8] sm:$0xff] }
  0x73   : > { %v3334_v30 = vld [vmem:[%s6713_s3 + $0x300] sm:$0xff]  ;;  %v3374_v12 = vld [vmem:[%s6713_s3 + $0x428] sm:$0xff] }
  0x74   : > { %3996 = vmatpush1.bf16.msra.mxu0 %v3995_v32  ;;  %4012 = vmatpush1.bf16.msra.mxu1 %v4011_v34  ;;  %v1148_v32 = vld [vmem:[%s6713_s3 + $0xd8] sm:$0xff]  ;;  %v1159_v34 = vld [vmem:[%s6713_s3 + $0x130] sm:$0xff] }
  0x75   : > { %3998 = vmatprep.subr.bf16.mxu0 %v3997_v38  ;;  %4014 = vmatprep.subr.bf16.mxu1 %v4013_v42  ;;  %v4059_v36 = vpack.c.bf16 %v1148_v32, %v1143_v31  ;;  %v4061_v38 = vpack.c.bf16 %v1159_v34, %v1154_v33  ;;  %v1122_v42 = vld [vmem:[%s6713_s3 + $0x8] sm:$0xff]  ;;  %v3336_v32 = vld [vmem:[%s6713_s3 + $0x310] sm:$0xff]  ;;  %v4079_v33 = vpack.c.bf16 %v3323_v24, %v3318_v23  ;;  %v3384_v23 = vld [vmem:[%s6713_s3 + $0x478] sm:$0xff] }
  0x76   : > { %v3331_v31 = vld [vmem:[%s6713_s3 + $0x2e8] sm:$0xff]  ;;  %v3389_v24 = vld [vmem:[%s6713_s3 + $0x4a0] sm:$0xff] }
  0x78   : > { %4000 = vmatpush1.bf16.msra.mxu0 %v3999_v43  ;;  %4016 = vmatpush1.bf16.msra.mxu1 %v4015_v46  ;;  %v1127_v43 = vld [vmem:[%s6713_s3 + $0x30] sm:$0xff]  ;;  %v1121_v46 = vld [vmem:[%s6713_s3] sm:$0xff] }
  0x79   : > { %4002 = vmatprep.subr.bf16.mxu0 %v4001_v49  ;;  %4018 = vmatprep.subr.bf16.mxu1 %v4017_v53  ;;  %v4033_v47 = vpack.c.bf16 %v1127_v43, %v1122_v42  ;;  %v1125_v49 = vld [vmem:[%s6713_s3 + $0x20] sm:$0xff]  ;;  %v4035_v53 = vpack.c.bf16 %v1126_v48, %v1121_v46  ;;  %v3344_v42 = vld [vmem:[%s6713_s3 + $0x350] sm:$0xff]  ;;  %v3341_v43 = vld [vmem:[%s6713_s3 + $0x338] sm:$0xff]  ;;  %v4099_v46 = vpack.c.bf16 %v3335_v40, %v3330_v39 }
  0x7a   : > { %v4066_v54 = vpack.c.bf16 %v1130_v50, %v1125_v49  ;;  %v3343_v48 = vld [vmem:[%s6713_s3 + $0x348] sm:$0xff]  ;;  %v4085_v49 = vpack.c.bf16 %v3344_v42, %v3339_v41  ;;  %v3393_v39 = vld [vmem:[%s6713_s3 + $0x4c0] sm:$0xff]  ;;  %v3367_v42 = vld [vmem:[%s6713_s3 + $0x3f0] sm:$0xff] }
  0x7b   : > { %v3398_v40 = vld [vmem:[%s6713_s3 + $0x4e8] sm:$0xff] }
  0x7c   : > { %4004 = vmatpush1.bf16.msra.mxu0 %v4003_v57  ;;  %4020 = vmatpush1.bf16.msra.mxu1 %v4019_v58  ;;  %v1136_v57 = vld [vmem:[%s6713_s3 + $0x78] sm:$0xff]  ;;  %v1135_v58 = vld [vmem:[%s6713_s3 + $0x70] sm:$0xff]  ;;  %v3362_v41 = vld [vmem:[%s6713_s3 + $0x3c8] sm:$0xff] }
  0x7d   : > { %4021 = vmatprep.subr.bf16.mxu0 %v4670_v3  ;;  %4050 = vmatprep.subr.bf16.mxu1 %v4049_v61  ;;  %v1147_v61 = vld [vmem:[%s6713_s3 + $0xd0] sm:$0xff] }
 0x140   : > { %v1027_v62 = vpop.f32.mrb[0].mxu0  ;;  %v1101_v63 = vpop.f32.mrb[0].mxu1 }
 0x141   : > { %v1106_v0 = vmax.f32 %v1027_v62, %v1101_v63  ;;  %v3771_v1 = vpop.f32.mrb[1].mxu0  ;;  %v3792_v2 = vpop.f32.mrb[1].mxu1  ;;  %v4039_v62 = vpack.c.bf16 %v1136_v57, %v1131_v55  ;;  %v4069_v63 = vpack.c.bf16 %v1140_v59, %v1135_v58  ;;  %v3351_v55 = vld [vmem:[%s6713_s3 + $0x388] sm:$0xff]  ;;  %v4103_v58 = vpack.c.bf16 %v3345_v52, %v3340_v51  ;;  %v3348_v59 = vld [vmem:[%s6713_s3 + $0x370] sm:$0xff]  ;;  %v3377_v51 = vld [vmem:[%s6713_s3 + $0x440] sm:$0xff] }
 0x142   : > { %v4041_v1 = vpack.c.bf16 %v1147_v61, %v1142_v60  ;;  %v1146_v2 = vld [vmem:[%s6713_s3 + $0xc8] sm:$0xff] }
 0x143   : > { %1108 = vrot.lane.b32.xlu0 %v1106_v0, %s4673_s28 }
 0x1b5   : > { %v1109_v4 = vpop.permute.xlu0 %1108 }
 0x1b6   : > { %v1111_v7 = vmax.f32 %v1106_v0, %v1109_v4  ;;  %v1141_v0 = vld [vmem:[%s6713_s3 + $0xa0] sm:$0xff] }
 0x1b7   : > { %v1145_v4 = vld [vmem:[%s6713_s3 + $0xc0] sm:$0xff] }
 0x1b8   : > { %v1119_v9 = vadd.f32 %v3271_v5, %v1111_v7  ;;  %v1150_v5 = vld [vmem:[%s6713_s3 + $0xe8] sm:$0xff]  ;;  %v1152_v7 = vld [vmem:[%s6713_s3 + $0xf8] sm:$0xff] }
 0x1b9   : > { %v4072_v10 = vpack.c.bf16 %v1150_v5, %v1145_v4  ;;  %v4045_v13 = vpack.c.bf16 %v1157_v8, %v1152_v7  ;;  %v3322_v7 = vld [vmem:[%s6713_s3 + $0x2a0] sm:$0xff] }
 0x1ba   : > { %v5134_v15 = vmax.f32 %v1119_v9, 0.0  ;;  %v4043_v9 = vpack.c.bf16 %v1146_v2, %v1141_v0  ;;  %v3355_v0 = vld [vmem:[%s6713_s3 + $0x3a8] sm:$0xff]  ;;  %v3369_v2 = vld [vmem:[%s6713_s3 + $0x400] sm:$0xff] }
 0x1bc   : > { %v5140_v19 = vrot.slane %v5134_v15, 1 }
 0x1be   : > { %3312 = vmatmul.mubr.msk.f32.vlgmr.msra.gmra.mrb[2].mxu0 %vm1204_vm2, %v5140_v19  ;;  %3313 = vmatmul.mubr.msk.f32.vlgmr.msra.gmra.mrb[2].mxu1 %vm1204_vm2, %v5140_v19 }
 0x1bf   : > { %4023 = vmatpush3.bf16.msra.mxu0 %v4022_v16  ;;  %4052 = vmatpush1.bf16.msra.mxu1 %v4051_v17  ;;  %v1160_v16 = vld [vmem:[%s6713_s3 + $0x138] sm:$0xff]  ;;  %v3319_v17 = vld [vmem:[%s6713_s3 + $0x288] sm:$0xff] }
 0x1c0   : > { %4024 = vmatprep.subr.bf16.mxu0 %v4670_v3  ;;  %4054 = vmatprep.subr.bf16.mxu1 %v4053_v20  ;;  %v3326_v20 = vld [vmem:[%s6713_s3 + $0x2c0] sm:$0xff]  ;;  %v4075_v22 = vpack.c.bf16 %v1160_v16, %v1155_v14  ;;  %v4077_v25 = vpack.c.bf16 %v3324_v18, %v3319_v17  ;;  %v3332_v17 = vld [vmem:[%s6713_s3 + $0x2f0] sm:$0xff]  ;;  %v5410_v18 = vrot.slane %v5134_v15, 2 }
 0x1c1   : > { %3809 = vmatprep.mubr.msk.f32.mxu0 %vm4671_vm0, %v4672_v6  ;;  %1556 = vmatprep.mubr.f32.mxu1 %v4672_v6 }
 0x1c3   : > { %4026 = vmatpush3.bf16.msra.mxu0 %v4025_v26  ;;  %4056 = vmatpush1.bf16.msra.mxu1 %v4055_v27  ;;  %v3320_v27 = vld [vmem:[%s6713_s3 + $0x290] sm:$0xff] }
 0x1c4   : > { %4027 = vmatprep.subr.bf16.mxu0 %v4670_v3  ;;  %4058 = vmatprep.subr.bf16.mxu1 %v4057_v29  ;;  %v3329_v29 = vld [vmem:[%s6713_s3 + $0x2d8] sm:$0xff]  ;;  %v4095_v34 = vpack.c.bf16 %v3325_v28, %v3320_v27  ;;  %v3342_v27 = vld [vmem:[%s6713_s3 + $0x340] sm:$0xff]  ;;  %v4145_v28 = vpack.c.bf16 %v3389_v24, %v3384_v23 }
 0x1c5   : > { %v4081_v37 = vpack.c.bf16 %v3334_v30, %v3329_v29  ;;  %v3347_v29 = vld [vmem:[%s6713_s3 + $0x368] sm:$0xff]  ;;  %v3383_v30 = vld [vmem:[%s6713_s3 + $0x470] sm:$0xff]  ;;  %v2192_v23 = vld [vmem:[%s6715_s5] sm:$0xff] }
 0x1c6   : > { %v2196_v24 = vld [vmem:[%s6715_s5 + $0x20] sm:$0xff] }
 0x1c7   : > { %4029 = vmatpush3.bf16.msra.mxu0 %v4028_v35  ;;  %4060 = vmatpush1.bf16.msra.mxu1 %v4059_v36  ;;  %v3328_v35 = vld [vmem:[%s6713_s3 + $0x2d0] sm:$0xff]  ;;  %v3333_v36 = vld [vmem:[%s6713_s3 + $0x2f8] sm:$0xff] }
 0x1c8   : > { %4030 = vmatprep.subr.bf16.mxu0 %v4670_v3  ;;  %4062 = vmatprep.subr.bf16.mxu1 %v4061_v38  ;;  %v4097_v38 = vpack.c.bf16 %v3336_v32, %v3331_v31  ;;  %v3388_v31 = vld [vmem:[%s6713_s3 + $0x498] sm:$0xff]  ;;  %v3394_v32 = vld [vmem:[%s6713_s3 + $0x4c8] sm:$0xff] }
 0x1cb   : > { %4032 = vmatpush3.bf16.msra.mxu0 %v4031_v44  ;;  %4064 = vmatpush1.bf16.msra.mxu1 %v4063_v45  ;;  %v3346_v44 = vld [vmem:[%s6713_s3 + $0x360] sm:$0xff]  ;;  %v4083_v45 = vpack.c.bf16 %v3333_v36, %v3328_v35  ;;  %v4147_v35 = vpack.c.bf16 %v3388_v31, %v3383_v30  ;;  %v3352_v36 = vld [vmem:[%s6713_s3 + $0x390] sm:$0xff]  ;;  %v2205_v31 = vld [vmem:[%s6715_s5 + $0x68] sm:$0xff] }
 0x1cc   : > { %4034 = vmatprep.subr.bf16.mxu0 %v4033_v47  ;;  %4065 = vmatprep.subr.bf16.mxu1 %v4670_v3  ;;  %v3338_v47 = vld [vmem:[%s6713_s3 + $0x320] sm:$0xff]  ;;  %v4101_v50 = vpack.c.bf16 %v3346_v44, %v3341_v43  ;;  %v4151_v44 = vpack.c.bf16 %v3398_v40, %v3393_v39  ;;  %v2206_v40 = vld [vmem:[%s6715_s5 + $0x70] sm:$0xff] }
 0x1cd   : > { %v4087_v57 = vpack.c.bf16 %v3343_v48, %v3338_v47  ;;  %v3366_v47 = vld [vmem:[%s6713_s3 + $0x3e8] sm:$0xff]  ;;  %v3365_v48 = vld [vmem:[%s6713_s3 + $0x3e0] sm:$0xff] }
 0x1ce   : > { %3810 = vmatmul.mubr.msk.f32.vlgmr.msra.gmra.mrb[4].mxu0 %vm1204_vm2, %v5140_v19  ;;  %3316 = vmatmul.mubr.msk.f32.vlgmr.msra.gmra.mrb[2].mxu1 %vm1204_vm2, %v5134_v15  ;;  %v3321_v19 = vld [vmem:[%s6713_s3 + $0x298] sm:$0xff] }
 0x1cf   : > { %4036 = vmatpush1.bf16.msra.mxu0 %v4035_v53  ;;  %4067 = vmatpush3.bf16.msra.mxu1 %v4066_v54  ;;  %v4093_v26 = vpack.c.bf16 %v3326_v20, %v3321_v19  ;;  %v3349_v53 = vld [vmem:[%s6713_s3 + $0x378] sm:$0xff]  ;;  %v3354_v54 = vld [vmem:[%s6713_s3 + $0x3a0] sm:$0xff] }
 0x1d0   : > { %4038 = vmatprep.subr.bf16.mxu0 %v4037_v56  ;;  %4068 = vmatprep.subr.bf16.mxu1 %v4670_v3  ;;  %v3356_v56 = vld [vmem:[%s6713_s3 + $0x3b0] sm:$0xff]  ;;  %v4089_v60 = vpack.c.bf16 %v3354_v54, %v3349_v53  ;;  %v3337_v20 = vld [vmem:[%s6713_s3 + $0x318] sm:$0xff] }
 0x1d1   : > { %1485 = vmatprep.mubr.f32.mxu0 %v4672_v6  ;;  %3828 = vmatprep.mubr.msk.f32.mxu1 %vm4671_vm0, %v4672_v6  ;;  %v4105_v61 = vpack.c.bf16 %v3356_v56, %v3351_v55  ;;  %v3371_v54 = vld [vmem:[%s6713_s3 + $0x410] sm:$0xff]  ;;  %v1935_v55 = vrot.slane %v5134_v15, 3 }
 0x1d3   : > { %4040 = vmatpush1.bf16.msra.mxu0 %v4039_v62  ;;  %4070 = vmatpush3.bf16.msra.mxu1 %v4069_v63  ;;  %v3353_v62 = vld [vmem:[%s6713_s3 + $0x398] sm:$0xff]  ;;  %v3350_v63 = vld [vmem:[%s6713_s3 + $0x380] sm:$0xff] }
 0x1d4   : > { %4042 = vmatprep.subr.bf16.mxu0 %v4041_v1  ;;  %4071 = vmatprep.subr.bf16.mxu1 %v4670_v3  ;;  %v3364_v1 = vld [vmem:[%s6713_s3 + $0x3d8] sm:$0xff]  ;;  %v4091_v4 = vpack.c.bf16 %v3353_v62, %v3348_v59  ;;  %v4107_v5 = vpack.c.bf16 %v3355_v0, %v3350_v63  ;;  %v3381_v63 = vld [vmem:[%s6713_s3 + $0x460] sm:$0xff] }
 0x1d5   : > { %v4137_v8 = vpack.c.bf16 %v3369_v2, %v3364_v1  ;;  %v3380_v59 = vld [vmem:[%s6713_s3 + $0x458] sm:$0xff]  ;;  %v3386_v1 = vld [vmem:[%s6713_s3 + $0x488] sm:$0xff]  ;;  %v3385_v2 = vld [vmem:[%s6713_s3 + $0x480] sm:$0xff] }
 0x1d7   : > { %4044 = vmatpush1.bf16.msra.mxu0 %v4043_v9  ;;  %4073 = vmatpush3.bf16.msra.mxu1 %v4072_v10  ;;  %v3327_v9 = vld [vmem:[%s6713_s3 + $0x2c8] sm:$0xff]  ;;  %v3363_v10 = vld [vmem:[%s6713_s3 + $0x3d0] sm:$0xff] }
 0x1d8   : > { %4046 = vmatprep.subr.bf16.mxu0 %v4045_v13  ;;  %4074 = vmatprep.subr.bf16.mxu1 %v4670_v3  ;;  %v3379_v13 = vld [vmem:[%s6713_s3 + $0x450] sm:$0xff]  ;;  %v4110_v14 = vpack.c.bf16 %v3327_v9, %v3322_v7  ;;  %v4139_v16 = vpack.c.bf16 %v3368_v11, %v3363_v10  ;;  %v3397_v7 = vld [vmem:[%s6713_s3 + $0x4e0] sm:$0xff] }
 0x1d9   : > { %v4141_v19 = vpack.c.bf16 %v3379_v13, %v3374_v12  ;;  %v3391_v10 = vld [vmem:[%s6713_s3 + $0x4b0] sm:$0xff]  ;;  %v3396_v12 = vld [vmem:[%s6713_s3 + $0x4d8] sm:$0xff] }
 0x1da   : > { %v3395_v13 = vld [vmem:[%s6713_s3 + $0x4d0] sm:$0xff] }
 0x1db   : > { %4048 = vmatpush1.bf16.msra.mxu0 %v4047_v21  ;;  %4076 = vmatpush3.bf16.msra.mxu1 %v4075_v22  ;;  %v3373_v21 = vld [vmem:[%s6713_s3 + $0x420] sm:$0xff]  ;;  %v3378_v22 = vld [vmem:[%s6713_s3 + $0x448] sm:$0xff] }
 0x1dc   : > { %4078 = vmatprep.subr.bf16.mxu0 %v4077_v25  ;;  %4094 = vmatprep.subr.bf16.mxu1 %v4093_v26  ;;  %v4113_v25 = vpack.c.bf16 %v3337_v20, %v3332_v17  ;;  %v4143_v26 = vpack.c.bf16 %v3378_v22, %v3373_v21  ;;  %v2195_v20 = vld [vmem:[%s6715_s5 + $0x18] sm:$0xff] }
 0x1dd   : > { %v2199_v22 = vld [vmem:[%s6715_s5 + $0x38] sm:$0xff] }
 0x1de   : > { %3315 = vmatmul.mubr.msk.f32.vlgmr.msra.gmra.mrb[2].mxu0 %vm1204_vm2, %v5134_v15  ;;  %3829 = vmatmul.mubr.msk.f32.vlgmr.msra.gmra.mrb[4].mxu1 %vm1204_vm2, %v5134_v15  ;;  %v3387_v15 = vld [vmem:[%s6713_s3 + $0x490] sm:$0xff] }
 0x1df   : > { %4080 = vmatpush1.bf16.msra.mxu0 %v4079_v33  ;;  %4096 = vmatpush1.bf16.msra.mxu1 %v4095_v34  ;;  %v3399_v33 = vld [vmem:[%s6713_s3 + $0x4f0] sm:$0xff]  ;;  %v4116_v34 = vpack.c.bf16 %v3347_v29, %v3342_v27  ;;  %v2201_v29 = vld [vmem:[%s6715_s5 + $0x48] sm:$0xff] }
 0x1e0   : > { %4082 = vmatprep.subr.bf16.mxu0 %v4081_v37  ;;  %4098 = vmatprep.subr.bf16.mxu1 %v4097_v38  ;;  %v4149_v37 = vpack.c.bf16 %v3399_v33, %v3394_v32  ;;  %v3357_v38 = vld [vmem:[%s6713_s3 + $0x3b8] sm:$0xff]  ;;  %v2194_v27 = vld [vmem:[%s6715_s5 + $0x10] sm:$0xff] }
 0x1e1   : > { %1741 = vmatprep.mubr.f32.mxu0 %v4672_v6  ;;  %1812 = vmatprep.mubr.f32.mxu1 %v4672_v6  ;;  %v4119_v43 = vpack.c.bf16 %v3357_v38, %v3352_v36  ;;  %v2203_v32 = vld [vmem:[%s6715_s5 + $0x58] sm:$0xff]  ;;  %v2200_v36 = vld [vmem:[%s6715_s5 + $0x40] sm:$0xff]  ;;  %v2202_v38 = vld [vmem:[%s6715_s5 + $0x50] sm:$0xff] }
 0x1e2   : > { %v2207_v33 = vld [vmem:[%s6715_s5 + $0x78] sm:$0xff] }
 0x1e3   : > { %4084 = vmatpush1.bf16.msra.mxu0 %v4083_v45  ;;  %4100 = vmatpush1.bf16.msra.mxu1 %v4099_v46  ;;  %v3361_v45 = vld [vmem:[%s6713_s3 + $0x3c0] sm:$0xff]  ;;  %v4121_v46 = vpack.c.bf16 %v3367_v42, %v3362_v41  ;;  %v2209_v41 = vld [vmem:[%s6715_s5 + $0x88] sm:$0xff] }
 0x1e4   : > { %4086 = vmatprep.subr.bf16.mxu0 %v4085_v49  ;;  %4102 = vmatprep.subr.bf16.mxu1 %v4101_v50  ;;  %v3370_v49 = vld [vmem:[%s6713_s3 + $0x408] sm:$0xff]  ;;  %v3372_v50 = vld [vmem:[%s6713_s3 + $0x418] sm:$0xff]  ;;  %v4123_v52 = vpack.c.bf16 %v3366_v47, %v3361_v45  ;;  %v2208_v47 = vld [vmem:[%s6715_s5 + $0x80] sm:$0xff] }
 0x1e5   : > { %v4154_v53 = vpack.c.bf16 %v3370_v49, %v3365_v48  ;;  %v4125_v56 = vpack.c.bf16 %v3377_v51, %v3372_v50  ;;  %v2213_v42 = vld [vmem:[%s6715_s5 + $0xa8] sm:$0xff]  ;;  %v2211_v45 = vld [vmem:[%s6715_s5 + $0x98] sm:$0xff]  ;;  %v2212_v49 = vld [vmem:[%s6715_s5 + $0xa0] sm:$0xff] }
 0x1e6   : > { %v2210_v50 = vld [vmem:[%s6715_s5 + $0x90] sm:$0xff] }
 0x1e7   : > { %4088 = vmatpush1.bf16.msra.mxu0 %v4087_v57  ;;  %4104 = vmatpush1.bf16.msra.mxu1 %v4103_v58  ;;  %v3376_v57 = vld [vmem:[%s6713_s3 + $0x438] sm:$0xff]  ;;  %v3375_v58 = vld [vmem:[%s6713_s3 + $0x430] sm:$0xff] }
 0x1e8   : > { %4090 = vmatprep.subr.bf16.mxu0 %v4089_v60  ;;  %4106 = vmatprep.subr.bf16.mxu1 %v4105_v61  ;;  %v3382_v60 = vld [vmem:[%s6713_s3 + $0x468] sm:$0xff]  ;;  %v4127_v61 = vpack.c.bf16 %v3376_v57, %v3371_v54  ;;  %v4157_v62 = vpack.c.bf16 %v3380_v59, %v3375_v58  ;;  %v2214_v51 = vld [vmem:[%s6715_s5 + $0xb0] sm:$0xff]  ;;  %v2223_v58 = vld [vmem:[%s6715_s5 + $0xf8] sm:$0xff] }
 0x1e9   : > { %v4129_v0 = vpack.c.bf16 %v3387_v15, %v3382_v60  ;;  %v2217_v54 = vld [vmem:[%s6715_s5 + $0xc8] sm:$0xff]  ;;  %v2216_v59 = vld [vmem:[%s6715_s5 + $0xc0] sm:$0xff] }
 0x1ea   : > { %v2220_v60 = vld [vmem:[%s6715_s5 + $0xe0] sm:$0xff] }
 0x1eb   : > { %4092 = vmatpush1.bf16.msra.mxu0 %v4091_v4  ;;  %4108 = vmatpush1.bf16.msra.mxu1 %v4107_v5  ;;  %v3390_v4 = vld [vmem:[%s6713_s3 + $0x4a8] sm:$0xff]  ;;  %v3392_v5 = vld [vmem:[%s6713_s3 + $0x4b8] sm:$0xff] }
 0x1ec   : > { %4109 = vmatprep.subr.bf16.mxu0 %v4670_v3  ;;  %4138 = vmatprep.subr.bf16.mxu1 %v4137_v8  ;;  %v4131_v8 = vpack.c.bf16 %v3386_v1, %v3381_v63  ;;  %v4160_v9 = vpack.c.bf16 %v3390_v4, %v3385_v2  ;;  %v4133_v11 = vpack.c.bf16 %v3397_v7, %v3392_v5  ;;  %v2222_v63 = vld [vmem:[%s6715_s5 + $0xf0] sm:$0xff]  ;;  %v2229_v2 = vld [vmem:[%s6715_s5 + $0x128] sm:$0xff]  ;;  %v2227_v4 = vld [vmem:[%s6715_s5 + $0x118] sm:$0xff] }
 0x1ed   : > { %v2231_v5 = vld [vmem:[%s6715_s5 + $0x138] sm:$0xff] }
 0x1ee   : > { %3358 = vmatmul.mubr.msk.f32.vlgmr.msra.gmra.mrb[2].mxu0 %vm1204_vm2, %v5410_v18  ;;  %3359 = vmatmul.mubr.msk.f32.vlgmr.msra.gmra.mrb[2].mxu1 %vm1204_vm2, %v5410_v18 }
 0x1ef   : > { %4111 = vmatpush3.bf16.msra.mxu0 %v4110_v14  ;;  %4140 = vmatpush1.bf16.msra.mxu1 %v4139_v16  ;;  %v3400_v14 = vld [vmem:[%s6713_s3 + $0x4f8] sm:$0xff]  ;;  %v4135_v16 = vpack.c.bf16 %v3396_v12, %v3391_v10  ;;  %v2228_v10 = vld [vmem:[%s6715_s5 + $0x120] sm:$0xff] }
 0x1f0   : > { %4112 = vmatprep.subr.bf16.mxu0 %v4670_v3  ;;  %4142 = vmatprep.subr.bf16.mxu1 %v4141_v19  ;;  %v4163_v17 = vpack.c.bf16 %v3400_v14, %v3395_v13  ;;  %v2197_v19 = vld [vmem:[%s6715_s5 + $0x28] sm:$0xff]  ;;  %v2230_v13 = vld [vmem:[%s6715_s5 + $0x130] sm:$0xff] }
 0x1f1   : > { %3847 = vmatprep.mubr.msk.f32.mxu0 %vm4671_vm0, %v4672_v6  ;;  %2073 = vmatprep.mubr.f32.mxu1 %v4672_v6  ;;  %v2233_v14 = vld [vmem:[%s6715_s5 + $0x148] sm:$0xff] }
 0x1f3   : > { %4114 = vmatpush3.bf16.msra.mxu0 %v4113_v25  ;;  %4144 = vmatpush1.bf16.msra.mxu1 %v4143_v26  ;;  %v4313_v25 = vpack.c.bf16 %v2199_v22, %v2195_v20  ;;  %v4167_v26 = vpack.c.bf16 %v2196_v24, %v2192_v23  ;;  %v2239_v20 = vld [vmem:[%s6715_s5 + $0x178] sm:$0xff]  ;;  %v2236_v23 = vld [vmem:[%s6715_s5 + $0x160] sm:$0xff]  ;;  %v2234_v24 = vld [vmem:[%s6715_s5 + $0x150] sm:$0xff] }
 0x1f4   : > { %4115 = vmatprep.subr.bf16.mxu0 %v4670_v3  ;;  %4146 = vmatprep.subr.bf16.mxu1 %v4145_v28  ;;  %v2198_v28 = vld [vmem:[%s6715_s5 + $0x30] sm:$0xff] }
 0x1f5   : > { %v4315_v30 = vpack.c.bf16 %v2198_v28, %v2194_v27  ;;  %v2241_v27 = vld [vmem:[%s6715_s5 + $0x188] sm:$0xff] }
 0x1f6   : > { %v2245_v28 = vld [vmem:[%s6715_s5 + $0x1a8] sm:$0xff] }
 0x1f7   : > { %4117 = vmatpush3.bf16.msra.mxu0 %v4116_v34  ;;  %4148 = vmatpush1.bf16.msra.mxu1 %v4147_v35  ;;  %v4169_v34 = vpack.c.bf16 %v2205_v31, %v2201_v29  ;;  %v4317_v35 = vpack.c.bf16 %v2207_v33, %v2203_v32  ;;  %v2243_v29 = vld [vmem:[%s6715_s5 + $0x198] sm:$0xff]  ;;  %v4189_v31 = vpack.c.bf16 %v2245_v28, %v2241_v27  ;;  %v2240_v33 = vld [vmem:[%s6715_s5 + $0x180] sm:$0xff]  ;;  %v2285_v27 = vld [vmem:[%s6715_s5 + $0x2e8] sm:$0xff] }
 0x1f8   : > { %4118 = vmatprep.subr.bf16.mxu0 %v4670_v3  ;;  %4150 = vmatprep.subr.bf16.mxu1 %v4149_v37  ;;  %v2204_v37 = vld [vmem:[%s6715_s5 + $0x60] sm:$0xff]  ;;  %v2247_v32 = vld [vmem:[%s6715_s5 + $0x1b8] sm:$0xff] }
 0x1f9   : > { %v4171_v39 = vpack.c.bf16 %v2204_v37, %v2200_v36  ;;  %v2242_v36 = vld [vmem:[%s6715_s5 + $0x190] sm:$0xff]  ;;  %v2283_v28 = vld [vmem:[%s6715_s5 + $0x2d8] sm:$0xff] }
 0x1fa   : > { %v2246_v37 = vld [vmem:[%s6715_s5 + $0x1b0] sm:$0xff] }
 0x1fb   : > { %4120 = vmatpush3.bf16.msra.mxu0 %v4119_v43  ;;  %4152 = vmatpush1.bf16.msra.mxu1 %v4151_v44  ;;  %v4319_v43 = vpack.c.bf16 %v2206_v40, %v2202_v38  ;;  %v4173_v44 = vpack.c.bf16 %v2213_v42, %v2209_v41  ;;  %v2249_v38 = vld [vmem:[%s6715_s5 + $0x1c8] sm:$0xff]  ;;  %v2251_v40 = vld [vmem:[%s6715_s5 + $0x1d8] sm:$0xff] }
 0x1fc   : > { %4122 = vmatprep.subr.bf16.mxu0 %v4121_v46  ;;  %4153 = vmatprep.subr.bf16.mxu1 %v4670_v3  ;;  %v2215_v46 = vld [vmem:[%s6715_s5 + $0xb8] sm:$0xff] }
 0x1fd   : > { %v4321_v48 = vpack.c.bf16 %v2215_v46, %v2211_v45  ;;  %v2255_v41 = vld [vmem:[%s6715_s5 + $0x1f8] sm:$0xff]  ;;  %v2248_v45 = vld [vmem:[%s6715_s5 + $0x1c0] sm:$0xff] }
 0x1fe   : > { %3848 = vmatmul.mubr.msk.f32.vlgmr.msra.gmra.mrb[6].mxu0 %vm1204_vm2, %v5410_v18  ;;  %3402 = vmatmul.mubr.msk.f32.vlgmr.msra.gmra.mrb[2].mxu1 %vm1204_vm2, %v1935_v55  ;;  %v2193_v18 = vld [vmem:[%s6715_s5 + $0x8] sm:$0xff]  ;;  %v2252_v46 = vld [vmem:[%s6715_s5 + $0x1e0] sm:$0xff] }
 0x1ff   : > { %4124 = vmatpush1.bf16.msra.mxu0 %v4123_v52  ;;  %4155 = vmatpush3.bf16.msra.mxu1 %v4154_v53  ;;  %v4165_v21 = vpack.c.bf16 %v2197_v19, %v2193_v18  ;;  %v4175_v52 = vpack.c.bf16 %v2212_v49, %v2208_v47  ;;  %v4323_v53 = vpack.c.bf16 %v2214_v51, %v2210_v50  ;;  %v2235_v19 = vld [vmem:[%s6715_s5 + $0x158] sm:$0xff]  ;;  %v2250_v47 = vld [vmem:[%s6715_s5 + $0x1d0] sm:$0xff]  ;;  %v2257_v50 = vld [vmem:[%s6715_s5 + $0x208] sm:$0xff] }
 0x200   : > { %4126 = vmatprep.subr.bf16.mxu0 %v4125_v56  ;;  %4156 = vmatprep.subr.bf16.mxu1 %v4670_v3  ;;  %v2219_v56 = vld [vmem:[%s6715_s5 + $0xd8] sm:$0xff]  ;;  %v4333_v22 = vpack.c.bf16 %v2239_v20, %v2235_v19  ;;  %v2254_v49 = vld [vmem:[%s6715_s5 + $0x1f0] sm:$0xff]  ;;  %v2261_v51 = vld [vmem:[%s6715_s5 + $0x228] sm:$0xff] }
 0x201   : > { %2002 = vmatprep.mubr.f32.mxu0 %v4672_v6  ;;  %3866 = vmatprep.mubr.msk.f32.mxu1 %vm4671_vm0, %v4672_v6  ;;  %v4325_v15 = vpack.c.bf16 %v2223_v58, %v2219_v56  ;;  %v4197_v56 = vpack.c.bf16 %v2261_v51, %v2257_v50  ;;  %v2260_v58 = vld [vmem:[%s6715_s5 + $0x220] sm:$0xff]  ;;  %v2301_v51 = vld [vmem:[%s6715_s5 + $0x368] sm:$0xff] }
 0x202   : > { %v2272_v19 = vld [vmem:[%s6715_s5 + $0x280] sm:$0xff] }
 0x203   : > { %4128 = vmatpush1.bf16.msra.mxu0 %v4127_v61  ;;  %4158 = vmatpush3.bf16.msra.mxu1 %v4157_v62  ;;  %v4179_v61 = vpack.c.bf16 %v2220_v60, %v2216_v59  ;;  %v2218_v62 = vld [vmem:[%s6715_s5 + $0xd0] sm:$0xff]  ;;  %v2276_v20 = vld [vmem:[%s6715_s5 + $0x2a0] sm:$0xff] }
 0x204   : > { %4130 = vmatprep.subr.bf16.mxu0 %v4129_v0  ;;  %4159 = vmatprep.subr.bf16.mxu1 %v4670_v3  ;;  %v2225_v0 = vld [vmem:[%s6715_s5 + $0x108] sm:$0xff]  ;;  %v4327_v1 = vpack.c.bf16 %v2222_v63, %v2218_v62  ;;  %v2258_v59 = vld [vmem:[%s6715_s5 + $0x210] sm:$0xff]  ;;  %v2267_v63 = vld [vmem:[%s6715_s5 + $0x258] sm:$0xff] }
 0x205   : > { %v4181_v7 = vpack.c.bf16 %v2229_v2, %v2225_v0  ;;  %v2269_v62 = vld [vmem:[%s6715_s5 + $0x268] sm:$0xff]  ;;  %v2271_v0 = vld [vmem:[%s6715_s5 + $0x278] sm:$0xff] }
 0x207   : > { %4132 = vmatpush1.bf16.msra.mxu0 %v4131_v8  ;;  %4161 = vmatpush3.bf16.msra.mxu1 %v4160_v9  ;;  %v4329_v8 = vpack.c.bf16 %v2231_v5, %v2227_v4  ;;  %v2224_v9 = vld [vmem:[%s6715_s5 + $0x100] sm:$0xff] }
 0x208   : > { %4134 = vmatprep.subr.bf16.mxu0 %v4133_v11  ;;  %4162 = vmatprep.subr.bf16.mxu1 %v4670_v3  ;;  %v2226_v11 = vld [vmem:[%s6715_s5 + $0x110] sm:$0xff]  ;;  %v4183_v12 = vpack.c.bf16 %v2228_v10, %v2224_v9  ;;  %v2264_v5 = vld [vmem:[%s6715_s5 + $0x240] sm:$0xff]  ;;  %v4349_v9 = vpack.c.bf16 %v2271_v0, %v2267_v63 }
 0x209   : > { %v2270_v10 = vld [vmem:[%s6715_s5 + $0x270] sm:$0xff] }
 0x20b   : > { %4136 = vmatpush1.bf16.msra.mxu0 %v4135_v16  ;;  %4164 = vmatpush3.bf16.msra.mxu1 %v4163_v17  ;;  %v2237_v16 = vld [vmem:[%s6715_s5 + $0x168] sm:$0xff]  ;;  %v4331_v17 = vpack.c.bf16 %v2230_v13, %v2226_v11  ;;  %v2275_v13 = vld [vmem:[%s6715_s5 + $0x298] sm:$0xff] }
 0x20c   : > { %4166 = vmatprep.subr.bf16.mxu0 %v4165_v21  ;;  %4314 = vmatprep.subr.bf16.mxu1 %v4313_v25  ;;  %v4185_v18 = vpack.c.bf16 %v2237_v16, %v2233_v14  ;;  %v2232_v21 = vld [vmem:[%s6715_s5 + $0x140] sm:$0xff]  ;;  %v2238_v25 = vld [vmem:[%s6715_s5 + $0x170] sm:$0xff]  ;;  %v2273_v11 = vld [vmem:[%s6715_s5 + $0x288] sm:$0xff] }
 0x20d   : > { %v2279_v14 = vld [vmem:[%s6715_s5 + $0x2b8] sm:$0xff] }
 0x20e   : > { %3401 = vmatmul.mubr.msk.f32.vlgmr.msra.gmra.mrb[2].mxu0 %vm1204_vm2, %v1935_v55  ;;  %3867 = vmatmul.mubr.msk.f32.vlgmr.msra.gmra.mrb[6].mxu1 %vm1204_vm2, %v1935_v55  ;;  %v2221_v55 = vld [vmem:[%s6715_s5 + $0xe8] sm:$0xff] }
 0x20f   : > { %4168 = vmatpush1.bf16.msra.mxu0 %v4167_v26  ;;  %4316 = vmatpush1.bf16.msra.mxu1 %v4315_v30  ;;  %v4177_v57 = vpack.c.bf16 %v2221_v55, %v2217_v54  ;;  %v4187_v26 = vpack.c.bf16 %v2236_v23, %v2232_v21  ;;  %v4335_v30 = vpack.c.bf16 %v2238_v25, %v2234_v24  ;;  %v2278_v23 = vld [vmem:[%s6715_s5 + $0x2b0] sm:$0xff] }
 0x210   : > { %4170 = vmatprep.subr.bf16.mxu0 %v4169_v34  ;;  %4318 = vmatprep.subr.bf16.mxu1 %v4317_v35  ;;  %v2244_v34 = vld [vmem:[%s6715_s5 + $0x1a0] sm:$0xff]  ;;  %v4337_v35 = vpack.c.bf16 %v2247_v32, %v2243_v29  ;;  %v4195_v54 = vpack.c.bf16 %v2252_v46, %v2248_v45  ;;  %v4343_v55 = vpack.c.bf16 %v2254_v49, %v2250_v47  ;;  %v2290_v47 = vld [vmem:[%s6715_s5 + $0x310] sm:$0xff]  ;;  %v2297_v49 = vld [vmem:[%s6715_s5 + $0x348] sm:$0xff] }
 0x211   : > { %v4191_v42 = vpack.c.bf16 %v2244_v34, %v2240_v33  ;;  %v4353_v21 = vpack.c.bf16 %v2279_v14, %v2275_v13  ;;  %v4207_v24 = vpack.c.bf16 %v2276_v20, %v2272_v19  ;;  %v2284_v32 = vld [vmem:[%s6715_s5 + $0x2e0] sm:$0xff]  ;;  %v2319_v20 = vld [vmem:[%s6715_s5 + $0x3f8] sm:$0xff] }
 0x212   : > { %v2155_v13 = vld [vmem:[%s6714_s4] sm:$0x1f] }
 0x213   : > { %4172 = vmatpush1.bf16.msra.mxu0 %v4171_v39  ;;  %4320 = vmatpush1.bf16.msra.mxu1 %v4319_v43  ;;  %v2253_v39 = vld [vmem:[%s6715_s5 + $0x1e8] sm:$0xff]  ;;  %v4339_v43 = vpack.c.bf16 %v2246_v37, %v2242_v36  ;;  %v2286_v36 = vld [vmem:[%s6715_s5 + $0x2f0] sm:$0xff] }
 0x214   : > { %4174 = vmatprep.subr.bf16.mxu0 %v4173_v44  ;;  %4322 = vmatprep.subr.bf16.mxu1 %v4321_v48  ;;  %v4193_v44 = vpack.c.bf16 %v2253_v39, %v2249_v38  ;;  %v4341_v48 = vpack.c.bf16 %v2255_v41, %v2251_v40  ;;  %v2289_v38 = vld [vmem:[%s6715_s5 + $0x308] sm:$0xff]  ;;  %v2291_v40 = vld [vmem:[%s6715_s5 + $0x318] sm:$0xff] }
 0x215   : > { %v2293_v39 = vld [vmem:[%s6715_s5 + $0x328] sm:$0xff] }
 0x216   : > { %v4213_v41 = vpack.c.bf16 %v2293_v39, %v2289_v38 }
 0x217   : > { %4176 = vmatpush1.bf16.msra.mxu0 %v4175_v52  ;;  %4324 = vmatpush1.bf16.msra.mxu1 %v4323_v53  ;;  %v2259_v52 = vld [vmem:[%s6715_s5 + $0x218] sm:$0xff] }
 0x218   : > { %4178 = vmatprep.subr.bf16.mxu0 %v4177_v57  ;;  %4326 = vmatprep.subr.bf16.mxu1 %v4325_v15  ;;  %v2263_v53 = vld [vmem:[%s6715_s5 + $0x238] sm:$0xff]  ;;  %v2256_v57 = vld [vmem:[%s6715_s5 + $0x200] sm:$0xff]  ;;  %v2262_v15 = vld [vmem:[%s6715_s5 + $0x230] sm:$0xff] }
 0x219   : > { %v4345_v60 = vpack.c.bf16 %v2263_v53, %v2259_v52  ;;  %v4347_v2 = vpack.c.bf16 %v2262_v15, %v2258_v59  ;;  %v2299_v52 = vld [vmem:[%s6715_s5 + $0x358] sm:$0xff]  ;;  %v2305_v15 = vld [vmem:[%s6715_s5 + $0x388] sm:$0xff] }
 0x21a   : > { %v2303_v53 = vld [vmem:[%s6715_s5 + $0x378] sm:$0xff] }
 0x21b   : > { %4180 = vmatpush1.bf16.msra.mxu0 %v4179_v61  ;;  %4328 = vmatpush1.bf16.msra.mxu1 %v4327_v1  ;;  %v2265_v61 = vld [vmem:[%s6715_s5 + $0x248] sm:$0xff]  ;;  %v4199_v1 = vpack.c.bf16 %v2260_v58, %v2256_v57  ;;  %v2300_v57 = vld [vmem:[%s6715_s5 + $0x360] sm:$0xff]  ;;  %v2298_v58 = vld [vmem:[%s6715_s5 + $0x350] sm:$0xff] }
 0x21c   : > { %4182 = vmatprep.subr.bf16.mxu0 %v4181_v7  ;;  %4330 = vmatprep.subr.bf16.mxu1 %v4329_v8  ;;  %v4201_v4 = vpack.c.bf16 %v2269_v62, %v2265_v61  ;;  %v2268_v7 = vld [vmem:[%s6715_s5 + $0x260] sm:$0xff]  ;;  %v2266_v8 = vld [vmem:[%s6715_s5 + $0x250] sm:$0xff]  ;;  %v2309_v61 = vld [vmem:[%s6715_s5 + $0x3a8] sm:$0xff]  ;;  %v2157_v62 = vlaneseq }
 0x21d   : > { %v4203_v16 = vpack.c.bf16 %v2268_v7, %v2264_v5  ;;  %v4221_v0 = vpack.c.bf16 %v2309_v61, %v2305_v15  ;;  %v2308_v7 = vld [vmem:[%s6715_s5 + $0x3a0] sm:$0xff]  ;;  %v2322_v61 = vld [vmem:[%s6715_s5 + $0x410] sm:$0xff] }
 0x21e   : > { %v2324_v15 = vld [vmem:[%s6715_s5 + $0x420] sm:$0xff] }
 0x21f   : > { %4184 = vmatpush1.bf16.msra.mxu0 %v4183_v12  ;;  %4332 = vmatpush1.bf16.msra.mxu1 %v4331_v17  ;;  %v2277_v12 = vld [vmem:[%s6715_s5 + $0x2a8] sm:$0xff]  ;;  %v4351_v17 = vpack.c.bf16 %v2270_v10, %v2266_v8  ;;  %v2306_v8 = vld [vmem:[%s6715_s5 + $0x390] sm:$0xff] }
 0x220   : > { %4186 = vmatprep.subr.bf16.mxu0 %v4185_v18  ;;  %4334 = vmatprep.subr.bf16.mxu1 %v4333_v22  ;;  %v4205_v18 = vpack.c.bf16 %v2277_v12, %v2273_v11  ;;  %v2274_v22 = vld [vmem:[%s6715_s5 + $0x290] sm:$0xff]  ;;  %v5913_v12 = vshrl.u32 %v2157_v62, 7 }
 0x221   : > { %v4355_v25 = vpack.c.bf16 %v2278_v23, %v2274_v22  ;;  %v2316_v22 = vld [vmem:[%s6715_s5 + $0x3e0] sm:$0xff]  ;;  %v2326_v62 = vld [vmem:[%s6715_s5 + $0x430] sm:$0xff] }
 0x222   : > { %v2175_v14 = vsub.s32 4, %v5913_v12 }
 0x223   : > { %4188 = vmatpush1.bf16.msra.mxu0 %v4187_v26  ;;  %4336 = vmatpush1.bf16.msra.mxu1 %v4335_v30  ;;  %v2281_v26 = vld [vmem:[%s6715_s5 + $0x2c8] sm:$0xff]  ;;  %v2287_v30 = vld [vmem:[%s6715_s5 + $0x2f8] sm:$0xff] }
 0x224   : > { %4190 = vmatprep.subr.bf16.mxu0 %v4189_v31  ;;  %4338 = vmatprep.subr.bf16.mxu1 %v4337_v35  ;;  %v4209_v29 = vpack.c.bf16 %v2285_v27, %v2281_v26  ;;  %v2280_v31 = vld [vmem:[%s6715_s5 + $0x2c0] sm:$0xff]  ;;  %v4357_v33 = vpack.c.bf16 %v2287_v30, %v2283_v28  ;;  %v2282_v35 = vld [vmem:[%s6715_s5 + $0x2d0] sm:$0xff]  ;;  %v2176_v23 = vrot.slane %v2155_v13, %v2175_v14  ;;  %v2325_v30 = vld [vmem:[%s6715_s5 + $0x428] sm:$0xff] }
 0x225   : > { %v4211_v34 = vpack.c.bf16 %v2284_v32, %v2280_v31  ;;  %v4359_v37 = vpack.c.bf16 %v2286_v36, %v2282_v35  ;;  %v2314_v26 = vld [vmem:[%s6715_s5 + $0x3d0] sm:$0xff]  ;;  %v2323_v31 = vld [vmem:[%s6715_s5 + $0x418] sm:$0xff] }
 0x226   : > { %v2318_v27 = vld [vmem:[%s6715_s5 + $0x3f0] sm:$0xff] }
 0x227   : > { %4192 = vmatpush1.bf16.msra.mxu0 %v4191_v42  ;;  %4340 = vmatpush1.bf16.msra.mxu1 %v4339_v43  ;;  %v2295_v42 = vld [vmem:[%s6715_s5 + $0x338] sm:$0xff]  ;;  %v2288_v43 = vld [vmem:[%s6715_s5 + $0x300] sm:$0xff]  ;;  %v4375_v28 = vpack.c.bf16 %v2318_v27, %v2314_v26 }
 0x228   : > { %4194 = vmatprep.subr.bf16.mxu0 %v4193_v44  ;;  %4342 = vmatprep.subr.bf16.mxu1 %v4341_v48  ;;  %v2292_v44 = vld [vmem:[%s6715_s5 + $0x320] sm:$0xff]  ;;  %v4361_v45 = vpack.c.bf16 %v2295_v42, %v2291_v40  ;;  %v2294_v48 = vld [vmem:[%s6715_s5 + $0x330] sm:$0xff]  ;;  %v2167_v40 = vsub.s32 2, %v5913_v12 }
 0x229   : > { %v4215_v46 = vpack.c.bf16 %v2292_v44, %v2288_v43  ;;  %v4363_v50 = vpack.c.bf16 %v2294_v48, %v2290_v47  ;;  %v2159_v48 = vsub.s32 0, %v5913_v12  ;;  %v2336_v27 = vld [vmem:[%s6715_s5 + $0x480] sm:$0xff] }
 0x22b   : > { %4196 = vmatpush1.bf16.msra.mxu0 %v4195_v54  ;;  %4344 = vmatpush1.bf16.msra.mxu1 %v4343_v55  ;;  %v4217_v54 = vpack.c.bf16 %v2301_v51, %v2297_v49  ;;  %v4365_v55 = vpack.c.bf16 %v2303_v53, %v2299_v52  ;;  %v2163_v49 = vsub.s32 1, %v5913_v12  ;;  %v2160_v51 = vrot.slane %v2155_v13, %v2159_v48 }
 0x22c   : > { %4198 = vmatprep.subr.bf16.mxu0 %v4197_v56  ;;  %4346 = vmatprep.subr.bf16.mxu1 %v4345_v60  ;;  %v2296_v56 = vld [vmem:[%s6715_s5 + $0x340] sm:$0xff]  ;;  %v2302_v60 = vld [vmem:[%s6715_s5 + $0x370] sm:$0xff] }
 0x22d   : > { %v4219_v59 = vpack.c.bf16 %v2300_v57, %v2296_v56  ;;  %v4367_v63 = vpack.c.bf16 %v2302_v60, %v2298_v58  ;;  %v2164_v52 = vrot.slane %v2155_v13, %v2163_v49  ;;  %v2320_v56 = vld [vmem:[%s6715_s5 + $0x400] sm:$0xff] }
 0x22f   : > { %4200 = vmatpush1.bf16.msra.mxu0 %v4199_v1  ;;  %4348 = vmatpush1.bf16.msra.mxu1 %v4347_v2  ;;  %v2307_v1 = vld [vmem:[%s6715_s5 + $0x398] sm:$0xff] }
 0x230   : > { %4202 = vmatprep.subr.bf16.mxu0 %v4201_v4  ;;  %4350 = vmatprep.subr.bf16.mxu1 %v4349_v9  ;;  %v2311_v2 = vld [vmem:[%s6715_s5 + $0x3b8] sm:$0xff]  ;;  %v2304_v4 = vld [vmem:[%s6715_s5 + $0x380] sm:$0xff]  ;;  %v2310_v9 = vld [vmem:[%s6715_s5 + $0x3b0] sm:$0xff] }
 0x231   : > { %v4369_v5 = vpack.c.bf16 %v2311_v2, %v2307_v1  ;;  %v4223_v10 = vpack.c.bf16 %v2308_v7, %v2304_v4  ;;  %v4371_v11 = vpack.c.bf16 %v2310_v9, %v2306_v8  ;;  %v2333_v4 = vld [vmem:[%s6715_s5 + $0x468] sm:$0xff]  ;;  %v2335_v7 = vld [vmem:[%s6715_s5 + $0x478] sm:$0xff]  ;;  %v4231_v9 = vpack.c.bf16 %v2324_v15, %v2320_v56  ;;  %v2352_v56 = vld [vmem:[%s6715_s5 + $0x500] sm:$0xff] }
 0x232   : > { %v2358_v15 = vld [vmem:[%s6715_s5 + $0x530] sm:$0xff] }
 0x233   : > { %4204 = vmatpush1.bf16.msra.mxu0 %v4203_v16  ;;  %4352 = vmatpush1.bf16.msra.mxu1 %v4351_v17  ;;  %v2313_v16 = vld [vmem:[%s6715_s5 + $0x3c8] sm:$0xff] }
 0x234   : > { %4206 = vmatprep.subr.bf16.mxu0 %v4205_v18  ;;  %4354 = vmatprep.subr.bf16.mxu1 %v4353_v21  ;;  %v2317_v17 = vld [vmem:[%s6715_s5 + $0x3e8] sm:$0xff]  ;;  %v2315_v18 = vld [vmem:[%s6715_s5 + $0x3d8] sm:$0xff]  ;;  %v2312_v21 = vld [vmem:[%s6715_s5 + $0x3c0] sm:$0xff] }
 0x235   : > { %v4225_v19 = vpack.c.bf16 %v2317_v17, %v2313_v16  ;;  %v2330_v16 = vld [vmem:[%s6715_s5 + $0x450] sm:$0xff] }
 0x236   : > { %v2334_v17 = vld [vmem:[%s6715_s5 + $0x470] sm:$0xff] }
 0x237   : > { %4208 = vmatpush1.bf16.msra.mxu0 %v4207_v24  ;;  %4356 = vmatpush1.bf16.msra.mxu1 %v4355_v25  ;;  %v4373_v24 = vpack.c.bf16 %v2319_v20, %v2315_v18  ;;  %v4227_v25 = vpack.c.bf16 %v2316_v22, %v2312_v21  ;;  %v2337_v18 = vld [vmem:[%s6715_s5 + $0x488] sm:$0xff]  ;;  %v2339_v22 = vld [vmem:[%s6715_s5 + $0x498] sm:$0xff]  ;;  %v4383_v26 = vpack.c.bf16 %v2334_v17, %v2330_v16 }
 0x238   : > { %4210 = vmatprep.subr.bf16.mxu0 %v4209_v29  ;;  %4358 = vmatprep.subr.bf16.mxu1 %v4357_v33  ;;  %v2321_v29 = vld [vmem:[%s6715_s5 + $0x408] sm:$0xff]  ;;  %v2327_v33 = vld [vmem:[%s6715_s5 + $0x438] sm:$0xff] }
 0x239   : > { %v4229_v32 = vpack.c.bf16 %v2325_v30, %v2321_v29  ;;  %v2341_v21 = vld [vmem:[%s6715_s5 + $0x4a8] sm:$0xff]  ;;  %v2371_v16 = vld [vmem:[%s6715_s5 + $0x598] sm:$0xff] }
 0x23a   : > { %v4237_v29 = vpack.c.bf16 %v2341_v21, %v2337_v18  ;;  %v2375_v17 = vld [vmem:[%s6715_s5 + $0x5b8] sm:$0xff]  ;;  %v2372_v21 = vld [vmem:[%s6715_s5 + $0x5a0] sm:$0xff] }
 0x23b   : > { %4212 = vmatpush1.bf16.msra.mxu0 %v4211_v34  ;;  %4360 = vmatpush1.bf16.msra.mxu1 %v4359_v37  ;;  %v4377_v34 = vpack.c.bf16 %v2327_v33, %v2323_v31  ;;  %v2338_v31 = vld [vmem:[%s6715_s5 + $0x490] sm:$0xff]  ;;  %v2345_v33 = vld [vmem:[%s6715_s5 + $0x4c8] sm:$0xff] }
 0x23c   : > { %4214 = vmatprep.subr.bf16.mxu0 %v4213_v41  ;;  %4362 = vmatprep.subr.bf16.mxu1 %v4361_v45  ;;  %v2168_v41 = vrot.slane %v2155_v13, %v2167_v40 }
 0x23f   : > { %4216 = vmatpush1.bf16.msra.mxu0 %v4215_v46  ;;  %4364 = vmatpush1.bf16.msra.mxu1 %v4363_v50  ;;  %v2171_v50 = vsub.s32 3, %v5913_v12 }
 0x240   : > { %4218 = vmatprep.subr.bf16.mxu0 %v4217_v54  ;;  %4366 = vmatprep.subr.bf16.mxu1 %v4365_v55 }
 0x241   : > { %v2172_v53 = vrot.slane %v2155_v13, %v2171_v50  ;;  %v2332_v13 = vld [vmem:[%s6715_s5 + $0x460] sm:$0xff] }
 0x243   : > { %4220 = vmatpush1.bf16.msra.mxu0 %v4219_v59  ;;  %4368 = vmatpush1.bf16.msra.mxu1 %v4367_v63 }
 0x244   : > { %4222 = vmatprep.subr.bf16.mxu0 %v4221_v0  ;;  %4370 = vmatprep.subr.bf16.mxu1 %v4369_v5  ;;  %v2329_v0 = vld [vmem:[%s6715_s5 + $0x448] sm:$0xff]  ;;  %v2331_v5 = vld [vmem:[%s6715_s5 + $0x458] sm:$0xff] }
 0x245   : > { %v4381_v20 = vpack.c.bf16 %v2335_v7, %v2331_v5  ;;  %v2360_v5 = vld [vmem:[%s6715_s5 + $0x540] sm:$0xff] }
 0x246   : > { %v2364_v7 = vld [vmem:[%s6715_s5 + $0x560] sm:$0xff] }
 0x247   : > { %4224 = vmatpush1.bf16.msra.mxu0 %v4223_v10  ;;  %4372 = vmatpush1.bf16.msra.mxu1 %v4371_v11  ;;  %v4379_v10 = vpack.c.bf16 %v2326_v62, %v2322_v61  ;;  %v2328_v11 = vld [vmem:[%s6715_s5 + $0x440] sm:$0xff]  ;;  %v2361_v61 = vld [vmem:[%s6715_s5 + $0x548] sm:$0xff]  ;;  %v4251_v18 = vpack.c.bf16 %v2364_v7, %v2360_v5  ;;  %v2403_v7 = vld [vmem:[%s6715_s5 + $0x698] sm:$0xff] }
 0x248   : > { %4226 = vmatprep.subr.bf16.mxu0 %v4225_v19  ;;  %4374 = vmatprep.subr.bf16.mxu1 %v4373_v24  ;;  %v4233_v19 = vpack.c.bf16 %v2333_v4, %v2329_v0  ;;  %v2365_v62 = vld [vmem:[%s6715_s5 + $0x568] sm:$0xff]  ;;  %v2367_v0 = vld [vmem:[%s6715_s5 + $0x578] sm:$0xff] }
 0x249   : > { %v2405_v5 = vld [vmem:[%s6715_s5 + $0x6a8] sm:$0xff] }
 0x24b   : > { %4228 = vmatpush1.bf16.msra.mxu0 %v4227_v25  ;;  %4376 = vmatpush1.bf16.msra.mxu1 %v4375_v28  ;;  %v4235_v25 = vpack.c.bf16 %v2332_v13, %v2328_v11  ;;  %v2340_v28 = vld [vmem:[%s6715_s5 + $0x4a0] sm:$0xff]  ;;  %v2366_v11 = vld [vmem:[%s6715_s5 + $0x570] sm:$0xff]  ;;  %v2369_v13 = vld [vmem:[%s6715_s5 + $0x588] sm:$0xff] }
 0x24c   : > { %4230 = vmatprep.subr.bf16.mxu0 %v4229_v32  ;;  %4378 = vmatprep.subr.bf16.mxu1 %v4377_v34  ;;  %v2342_v32 = vld [vmem:[%s6715_s5 + $0x4b0] sm:$0xff]  ;;  %v2349_v34 = vld [vmem:[%s6715_s5 + $0x4e8] sm:$0xff] }
 0x2a1   : > { %v1415_v35 = vpop.f32.mrb[4].mxu0 }
 0x2a2   : > { %v3811_v36 = vpop.f32.mrb[5].mxu0 }
 0x2a3   : > { %v2351_v36 = vld [vmem:[%s6715_s5 + $0x4f8] sm:$0xff] }
 0x2b1   : > { %v1629_v37 = vpop.f32.mrb[4].mxu1 }
 0x2b2   : > { %v1630_v38 = vadd.f32 %v1629_v37, %v1415_v35  ;;  %v3830_v39 = vpop.f32.mrb[5].mxu1  ;;  %v2347_v35 = vld [vmem:[%s6715_s5 + $0x4d8] sm:$0xff]  ;;  %v4239_v37 = vpack.c.bf16 %v2340_v28, %v2336_v27  ;;  %v2381_v27 = vld [vmem:[%s6715_s5 + $0x5e8] sm:$0xff] }
 0x2b3   : > { %v2344_v39 = vld [vmem:[%s6715_s5 + $0x4c0] sm:$0xff]  ;;  %v2379_v28 = vld [vmem:[%s6715_s5 + $0x5d8] sm:$0xff] }
 0x2d1   : > { %v1885_v42 = vpop.f32.mrb[6].mxu0  ;;  %v2075_v43 = vpop.f32.mrb[2].mxu1 }
 0x2d2   : > { %v1893_v44 = vadd.f32 %v1885_v42, %v1630_v38  ;;  %v5958_v45 = vadd.f32 %v2168_v41, %v2075_v43  ;;  %v3849_v46 = vpop.f32.mrb[7].mxu0  ;;  %v2077_v47 = vpop.f32.mrb[3].mxu1  ;;  %v4387_v38 = vpack.c.bf16 %v2342_v32, %v2338_v31  ;;  %v2348_v41 = vld [vmem:[%s6715_s5 + $0x4e0] sm:$0xff]  ;;  %v4241_v42 = vpack.c.bf16 %v2349_v34, %v2345_v33 }
 0x2d3   : > { %v2185_v1 = vadd.f32 %v2172_v53, %v2077_v47  ;;  %v4389_v43 = vpack.c.bf16 %v2351_v36, %v2347_v35  ;;  %v2350_v46 = vld [vmem:[%s6715_s5 + $0x4f0] sm:$0xff]  ;;  %v2353_v47 = vld [vmem:[%s6715_s5 + $0x508] sm:$0xff]  ;;  %v2359_v53 = vld [vmem:[%s6715_s5 + $0x538] sm:$0xff] }
 0x2d4   : > { %v2376_v32 = vld [vmem:[%s6715_s5 + $0x5c0] sm:$0xff]  ;;  %v2378_v36 = vld [vmem:[%s6715_s5 + $0x5d0] sm:$0xff] }
 0x2d5   : > { %v2190_v24 = vmax.f32 %v2185_v1, 0.0  ;;  %v2380_v33 = vld [vmem:[%s6715_s5 + $0x5e0] sm:$0xff] }
 0x2e1   : > { %v2004_v54 = vpop.f32.mrb[2].mxu0  ;;  %v2146_v55 = vpop.f32.mrb[6].mxu1 }
 0x2e2   : > { %v2182_v57 = vadd.f32 %v2160_v51, %v2004_v54  ;;  %v2154_v58 = vadd.f32 %v2146_v55, %v1893_v44  ;;  %v2006_v59 = vpop.f32.mrb[3].mxu0  ;;  %v3868_v60 = vpop.f32.mrb[7].mxu1  ;;  %v2346_v44 = vld [vmem:[%s6715_s5 + $0x4d0] sm:$0xff]  ;;  %v2357_v51 = vld [vmem:[%s6715_s5 + $0x528] sm:$0xff]  ;;  %v4243_v54 = vpack.c.bf16 %v2348_v41, %v2344_v39  ;;  %v2387_v41 = vld [vmem:[%s6715_s5 + $0x618] sm:$0xff] }
 0x2e3   : > { %v2183_v63 = vadd.f32 %v2164_v52, %v2006_v59  ;;  %v2355_v52 = vld [vmem:[%s6715_s5 + $0x518] sm:$0xff]  ;;  %v4391_v55 = vpack.c.bf16 %v2350_v46, %v2346_v44  ;;  %v2354_v60 = vld [vmem:[%s6715_s5 + $0x510] sm:$0xff]  ;;  %v2389_v39 = vld [vmem:[%s6715_s5 + $0x628] sm:$0xff] }
 0x2e4   : > { %v5984_v2 = vadd.f32 %v2176_v23, %v2154_v58  ;;  %v2187_v14 = vmax.f32 %v2182_v57, 0.0  ;;  %v2343_v23 = vld [vmem:[%s6715_s5 + $0x4b8] sm:$0xff]  ;;  %v2356_v57 = vld [vmem:[%s6715_s5 + $0x520] sm:$0xff]  ;;  %v4245_v58 = vpack.c.bf16 %v2357_v51, %v2353_v47  ;;  %v4393_v59 = vpack.c.bf16 %v2359_v53, %v2355_v52  ;;  %v2386_v53 = vld [vmem:[%s6715_s5 + $0x610] sm:$0xff] }
 0x2e5   : > { %v2188_v8 = vmax.f32 %v2183_v63, 0.0  ;;  %v4385_v30 = vpack.c.bf16 %v2343_v23, %v2339_v22  ;;  %v2363_v63 = vld [vmem:[%s6715_s5 + $0x558] sm:$0xff]  ;;  %v4247_v1 = vpack.c.bf16 %v2356_v57, %v2352_v56  ;;  %v4395_v4 = vpack.c.bf16 %v2358_v15, %v2354_v60  ;;  %v2384_v46 = vld [vmem:[%s6715_s5 + $0x600] sm:$0xff]  ;;  %v2397_v56 = vld [vmem:[%s6715_s5 + $0x668] sm:$0xff] }
 0x2e6   : > { %v4401_v23 = vpack.c.bf16 %v2375_v17, %v2371_v16  ;;  %v2388_v47 = vld [vmem:[%s6715_s5 + $0x620] sm:$0xff]  ;;  %v2395_v57 = vld [vmem:[%s6715_s5 + $0x658] sm:$0xff]  ;;  %v2402_v17 = vld [vmem:[%s6715_s5 + $0x690] sm:$0xff] }
 0x2e7   : > { %2582 = vmatprep.mubr.f32.mxu0 %v2188_v8  ;;  %2795 = vmatprep.mubr.f32.mxu1 %v2188_v8  ;;  %v4249_v8 = vpack.c.bf16 %v2365_v62, %v2361_v61  ;;  %v2392_v15 = vld [vmem:[%s6715_s5 + $0x640] sm:$0xff] }
 0x2e8   : > { %2583 = vmatmul.mubr.f32.vlgmr.msra.gmra.mrb[8].mxu0 %v2187_v14  ;;  %2796 = vmatmul.mubr.f32.vlgmr.msra.gmra.mrb[8].mxu1 %v2187_v14  ;;  %v2373_v14 = vld [vmem:[%s6715_s5 + $0x5a8] sm:$0xff]  ;;  %v2396_v61 = vld [vmem:[%s6715_s5 + $0x660] sm:$0xff] }
 0x2e9   : > { %4232 = vmatpush1.bf16.msra.mxu0 %v4231_v9  ;;  %4380 = vmatpush1.bf16.msra.mxu1 %v4379_v10  ;;  %v4397_v9 = vpack.c.bf16 %v2367_v0, %v2363_v63  ;;  %v2362_v10 = vld [vmem:[%s6715_s5 + $0x550] sm:$0xff]  ;;  %v4253_v22 = vpack.c.bf16 %v2373_v14, %v2369_v13  ;;  %v2404_v13 = vld [vmem:[%s6715_s5 + $0x6a0] sm:$0xff] }
 0x2ea   : > { %2653 = vmatprep.mubr.f32.mxu0 %v2190_v24  ;;  %2866 = vmatprep.mubr.f32.mxu1 %v2190_v24  ;;  %v2370_v24 = vld [vmem:[%s6715_s5 + $0x590] sm:$0xff] }
 0x2eb   : > { %4234 = vmatprep.subr.bf16.mxu0 %v4233_v19  ;;  %4382 = vmatprep.subr.bf16.mxu1 %v4381_v20  ;;  %v4399_v19 = vpack.c.bf16 %v2366_v11, %v2362_v10  ;;  %v2368_v20 = vld [vmem:[%s6715_s5 + $0x580] sm:$0xff]  ;;  %v2394_v0 = vld [vmem:[%s6715_s5 + $0x650] sm:$0xff] }
 0x2ec   : > { %v2400_v11 = vld [vmem:[%s6715_s5 + $0x680] sm:$0xff] }
 0x2ed   : > { %4236 = vmatpush1.bf16.msra.mxu0 %v4235_v25  ;;  %4384 = vmatpush1.bf16.msra.mxu1 %v4383_v26  ;;  %v2374_v25 = vld [vmem:[%s6715_s5 + $0x5b0] sm:$0xff]  ;;  %v2377_v26 = vld [vmem:[%s6715_s5 + $0x5c8] sm:$0xff] }
 0x2ee   : > { %4238 = vmatprep.subr.bf16.mxu0 %v4237_v29  ;;  %4386 = vmatprep.subr.bf16.mxu1 %v4385_v30  ;;  %v2383_v29 = vld [vmem:[%s6715_s5 + $0x5f8] sm:$0xff]  ;;  %v4255_v30 = vpack.c.bf16 %v2372_v21, %v2368_v20  ;;  %v4403_v31 = vpack.c.bf16 %v2374_v25, %v2370_v24  ;;  %v4257_v34 = vpack.c.bf16 %v2381_v27, %v2377_v26  ;;  %v2413_v20 = vld [vmem:[%s6715_s5 + $0x6e8] sm:$0xff]  ;;  %v2408_v25 = vld [vmem:[%s6715_s5 + $0x6c0] sm:$0xff] }
 0x2ef   : > { %v4405_v35 = vpack.c.bf16 %v2383_v29, %v2379_v28  ;;  %v2411_v21 = vld [vmem:[%s6715_s5 + $0x6d8] sm:$0xff]  ;;  %v2412_v26 = vld [vmem:[%s6715_s5 + $0x6e0] sm:$0xff]  ;;  %v2410_v29 = vld [vmem:[%s6715_s5 + $0x6d0] sm:$0xff] }
 0x2f1   : > { %4240 = vmatpush1.bf16.msra.mxu0 %v4239_v37  ;;  %4388 = vmatpush1.bf16.msra.mxu1 %v4387_v38  ;;  %v2382_v37 = vld [vmem:[%s6715_s5 + $0x5f0] sm:$0xff]  ;;  %v2385_v38 = vld [vmem:[%s6715_s5 + $0x608] sm:$0xff] }
 0x2f2   : > { %4242 = vmatprep.subr.bf16.mxu0 %v4241_v42  ;;  %4390 = vmatprep.subr.bf16.mxu1 %v4389_v43  ;;  %v2391_v42 = vld [vmem:[%s6715_s5 + $0x638] sm:$0xff]  ;;  %v4259_v43 = vpack.c.bf16 %v2380_v33, %v2376_v32  ;;  %v4407_v44 = vpack.c.bf16 %v2382_v37, %v2378_v36  ;;  %v4261_v51 = vpack.c.bf16 %v2389_v39, %v2385_v38  ;;  %v2421_v32 = vld [vmem:[%s6715_s5 + $0x728] sm:$0xff]  ;;  %v2416_v37 = vld [vmem:[%s6715_s5 + $0x700] sm:$0xff] }
 0x2f3   : > { %v4409_v52 = vpack.c.bf16 %v2391_v42, %v2387_v41  ;;  %v2419_v33 = vld [vmem:[%s6715_s5 + $0x718] sm:$0xff]  ;;  %v2420_v38 = vld [vmem:[%s6715_s5 + $0x720] sm:$0xff]  ;;  %v2418_v42 = vld [vmem:[%s6715_s5 + $0x710] sm:$0xff] }
 0x2f5   : > { %4244 = vmatpush1.bf16.msra.mxu0 %v4243_v54  ;;  %4392 = vmatpush1.bf16.msra.mxu1 %v4391_v55  ;;  %v2390_v54 = vld [vmem:[%s6715_s5 + $0x630] sm:$0xff]  ;;  %v2393_v55 = vld [vmem:[%s6715_s5 + $0x648] sm:$0xff] }
 0x2f6   : > { %4246 = vmatprep.subr.bf16.mxu0 %v4245_v58  ;;  %4394 = vmatprep.subr.bf16.mxu1 %v4393_v59  ;;  %v2399_v58 = vld [vmem:[%s6715_s5 + $0x678] sm:$0xff]  ;;  %v4263_v59 = vpack.c.bf16 %v2388_v47, %v2384_v46  ;;  %v4411_v60 = vpack.c.bf16 %v2390_v54, %v2386_v53  ;;  %v4265_v62 = vpack.c.bf16 %v2397_v56, %v2393_v55  ;;  %v2429_v46 = vld [vmem:[%s6715_s5 + $0x768] sm:$0xff]  ;;  %v2424_v54 = vld [vmem:[%s6715_s5 + $0x740] sm:$0xff] }
 0x2f7   : > { %v4413_v63 = vpack.c.bf16 %v2399_v58, %v2395_v57  ;;  %v2427_v47 = vld [vmem:[%s6715_s5 + $0x758] sm:$0xff]  ;;  %v2428_v55 = vld [vmem:[%s6715_s5 + $0x760] sm:$0xff]  ;;  %v2426_v58 = vld [vmem:[%s6715_s5 + $0x750] sm:$0xff] }
 0x2f9   : > { %4248 = vmatpush1.bf16.msra.mxu0 %v4247_v1  ;;  %4396 = vmatpush1.bf16.msra.mxu1 %v4395_v4  ;;  %v2398_v1 = vld [vmem:[%s6715_s5 + $0x670] sm:$0xff]  ;;  %v2401_v4 = vld [vmem:[%s6715_s5 + $0x688] sm:$0xff] }
 0x2fa   : > { %4250 = vmatprep.subr.bf16.mxu0 %v4249_v8  ;;  %4398 = vmatprep.subr.bf16.mxu1 %v4397_v9  ;;  %v2407_v8 = vld [vmem:[%s6715_s5 + $0x6b8] sm:$0xff]  ;;  %v4267_v9 = vpack.c.bf16 %v2396_v61, %v2392_v15  ;;  %v4415_v10 = vpack.c.bf16 %v2398_v1, %v2394_v0  ;;  %v4269_v14 = vpack.c.bf16 %v2405_v5, %v2401_v4  ;;  %v2437_v15 = vld [vmem:[%s6715_s5 + $0x7a8] sm:$0xff]  ;;  %v2432_v1 = vld [vmem:[%s6715_s5 + $0x780] sm:$0xff] }
 0x2fb   : > { %v4417_v16 = vpack.c.bf16 %v2407_v8, %v2403_v7  ;;  %v2435_v61 = vld [vmem:[%s6715_s5 + $0x798] sm:$0xff]  ;;  %v2436_v4 = vld [vmem:[%s6715_s5 + $0x7a0] sm:$0xff]  ;;  %v2434_v8 = vld [vmem:[%s6715_s5 + $0x790] sm:$0xff] }
 0x2fd   : > { %4252 = vmatpush1.bf16.msra.mxu0 %v4251_v18  ;;  %4400 = vmatpush1.bf16.msra.mxu1 %v4399_v19  ;;  %v2406_v18 = vld [vmem:[%s6715_s5 + $0x6b0] sm:$0xff]  ;;  %v2409_v19 = vld [vmem:[%s6715_s5 + $0x6c8] sm:$0xff] }
 0x2fe   : > { %4254 = vmatprep.subr.bf16.mxu0 %v4253_v22  ;;  %4402 = vmatprep.subr.bf16.mxu1 %v4401_v23  ;;  %v2415_v22 = vld [vmem:[%s6715_s5 + $0x6f8] sm:$0xff]  ;;  %v4271_v23 = vpack.c.bf16 %v2404_v13, %v2400_v11  ;;  %v4419_v24 = vpack.c.bf16 %v2406_v18, %v2402_v17  ;;  %v4273_v27 = vpack.c.bf16 %v2413_v20, %v2409_v19  ;;  %v2445_v11 = vld [vmem:[%s6715_s5 + $0x7e8] sm:$0xff]  ;;  %v2440_v18 = vld [vmem:[%s6715_s5 + $0x7c0] sm:$0xff] }
 0x2ff   : > { %v4421_v28 = vpack.c.bf16 %v2415_v22, %v2411_v21  ;;  %v2443_v13 = vld [vmem:[%s6715_s5 + $0x7d8] sm:$0xff]  ;;  %v2444_v19 = vld [vmem:[%s6715_s5 + $0x7e0] sm:$0xff]  ;;  %v2442_v22 = vld [vmem:[%s6715_s5 + $0x7d0] sm:$0xff] }
 0x301   : > { %4256 = vmatpush1.bf16.msra.mxu0 %v4255_v30  ;;  %4404 = vmatpush1.bf16.msra.mxu1 %v4403_v31  ;;  %v2414_v30 = vld [vmem:[%s6715_s5 + $0x6f0] sm:$0xff]  ;;  %v2417_v31 = vld [vmem:[%s6715_s5 + $0x708] sm:$0xff] }
 0x302   : > { %4258 = vmatprep.subr.bf16.mxu0 %v4257_v34  ;;  %4406 = vmatprep.subr.bf16.mxu1 %v4405_v35  ;;  %v2423_v34 = vld [vmem:[%s6715_s5 + $0x738] sm:$0xff]  ;;  %v4275_v35 = vpack.c.bf16 %v2412_v26, %v2408_v25  ;;  %v4423_v36 = vpack.c.bf16 %v2414_v30, %v2410_v29  ;;  %v4277_v39 = vpack.c.bf16 %v2421_v32, %v2417_v31  ;;  %v2453_v25 = vld [vmem:[%s6715_s5 + $0x828] sm:$0xff]  ;;  %v2448_v30 = vld [vmem:[%s6715_s5 + $0x800] sm:$0xff] }
 0x303   : > { %v4425_v41 = vpack.c.bf16 %v2423_v34, %v2419_v33  ;;  %v2451_v26 = vld [vmem:[%s6715_s5 + $0x818] sm:$0xff]  ;;  %v2452_v31 = vld [vmem:[%s6715_s5 + $0x820] sm:$0xff]  ;;  %v2450_v34 = vld [vmem:[%s6715_s5 + $0x810] sm:$0xff] }
 0x305   : > { %4260 = vmatpush1.bf16.msra.mxu0 %v4259_v43  ;;  %4408 = vmatpush1.bf16.msra.mxu1 %v4407_v44  ;;  %v2422_v43 = vld [vmem:[%s6715_s5 + $0x730] sm:$0xff]  ;;  %v2425_v44 = vld [vmem:[%s6715_s5 + $0x748] sm:$0xff] }
 0x306   : > { %4262 = vmatprep.subr.bf16.mxu0 %v4261_v51  ;;  %4410 = vmatprep.subr.bf16.mxu1 %v4409_v52  ;;  %v2431_v51 = vld [vmem:[%s6715_s5 + $0x778] sm:$0xff]  ;;  %v4279_v52 = vpack.c.bf16 %v2420_v38, %v2416_v37  ;;  %v4427_v53 = vpack.c.bf16 %v2422_v43, %v2418_v42  ;;  %v4281_v56 = vpack.c.bf16 %v2429_v46, %v2425_v44  ;;  %v2461_v37 = vld [vmem:[%s6715_s5 + $0x868] sm:$0xff]  ;;  %v2456_v43 = vld [vmem:[%s6715_s5 + $0x840] sm:$0xff]  ;;  %v2189_v46 = vmax.f32 %v5958_v45, 0.0 }
 0x307   : > { %v4429_v57 = vpack.c.bf16 %v2431_v51, %v2427_v47  ;;  %v2459_v38 = vld [vmem:[%s6715_s5 + $0x858] sm:$0xff]  ;;  %v2460_v44 = vld [vmem:[%s6715_s5 + $0x860] sm:$0xff]  ;;  %v2469_v45 = vld [vmem:[%s6715_s5 + $0x8a8] sm:$0xff] }
 0x309   : > { %4264 = vmatpush1.bf16.msra.mxu0 %v4263_v59  ;;  %4412 = vmatpush1.bf16.msra.mxu1 %v4411_v60  ;;  %v2430_v59 = vld [vmem:[%s6715_s5 + $0x770] sm:$0xff]  ;;  %v2433_v60 = vld [vmem:[%s6715_s5 + $0x788] sm:$0xff] }
 0x30a   : > { %4266 = vmatprep.subr.bf16.mxu0 %v4265_v62  ;;  %4414 = vmatprep.subr.bf16.mxu1 %v4413_v63  ;;  %v2439_v62 = vld [vmem:[%s6715_s5 + $0x7b8] sm:$0xff]  ;;  %v4283_v63 = vpack.c.bf16 %v2428_v55, %v2424_v54  ;;  %v4431_v0 = vpack.c.bf16 %v2430_v59, %v2426_v58  ;;  %v4285_v5 = vpack.c.bf16 %v2437_v15, %v2433_v60  ;;  %v2465_v54 = vld [vmem:[%s6715_s5 + $0x888] sm:$0xff]  ;;  %v2464_v59 = vld [vmem:[%s6715_s5 + $0x880] sm:$0xff] }
 0x30b   : > { %v4433_v7 = vpack.c.bf16 %v2439_v62, %v2435_v61  ;;  %v2467_v55 = vld [vmem:[%s6715_s5 + $0x898] sm:$0xff]  ;;  %v2468_v60 = vld [vmem:[%s6715_s5 + $0x8a0] sm:$0xff]  ;;  %v4301_v15 = vpack.c.bf16 %v2469_v45, %v2465_v54  ;;  %v2466_v62 = vld [vmem:[%s6715_s5 + $0x890] sm:$0xff] }
 0x30c   : > { %v2950_v45 = vld [vmem:[%s6717_s7 + $0x10] sm:$0xff] }
 0x30d   : > { %4268 = vmatpush1.bf16.msra.mxu0 %v4267_v9  ;;  %4416 = vmatpush1.bf16.msra.mxu1 %v4415_v10  ;;  %v2438_v9 = vld [vmem:[%s6715_s5 + $0x7b0] sm:$0xff]  ;;  %v2441_v10 = vld [vmem:[%s6715_s5 + $0x7c8] sm:$0xff] }
 0x30e   : > { %4270 = vmatprep.subr.bf16.mxu0 %v4269_v14  ;;  %4418 = vmatprep.subr.bf16.mxu1 %v4417_v16  ;;  %v2447_v14 = vld [vmem:[%s6715_s5 + $0x7f8] sm:$0xff]  ;;  %v4287_v16 = vpack.c.bf16 %v2436_v4, %v2432_v1  ;;  %v4435_v17 = vpack.c.bf16 %v2438_v9, %v2434_v8  ;;  %v4289_v20 = vpack.c.bf16 %v2445_v11, %v2441_v10  ;;  %v2477_v1 = vld [vmem:[%s6715_s5 + $0x8e8] sm:$0xff]  ;;  %v2472_v9 = vld [vmem:[%s6715_s5 + $0x8c0] sm:$0xff] }
 0x30f   : > { %v4437_v21 = vpack.c.bf16 %v2447_v14, %v2443_v13  ;;  %v2475_v4 = vld [vmem:[%s6715_s5 + $0x8d8] sm:$0xff]  ;;  %v2476_v10 = vld [vmem:[%s6715_s5 + $0x8e0] sm:$0xff]  ;;  %v2474_v14 = vld [vmem:[%s6715_s5 + $0x8d0] sm:$0xff] }
 0x311   : > { %4272 = vmatpush1.bf16.msra.mxu0 %v4271_v23  ;;  %4420 = vmatpush1.bf16.msra.mxu1 %v4419_v24  ;;  %v2446_v23 = vld [vmem:[%s6715_s5 + $0x7f0] sm:$0xff]  ;;  %v2449_v24 = vld [vmem:[%s6715_s5 + $0x808] sm:$0xff] }
 0x312   : > { %4274 = vmatprep.subr.bf16.mxu0 %v4273_v27  ;;  %4422 = vmatprep.subr.bf16.mxu1 %v4421_v28  ;;  %v2455_v27 = vld [vmem:[%s6715_s5 + $0x838] sm:$0xff]  ;;  %v4291_v28 = vpack.c.bf16 %v2444_v19, %v2440_v18  ;;  %v4439_v29 = vpack.c.bf16 %v2446_v23, %v2442_v22  ;;  %v4293_v32 = vpack.c.bf16 %v2453_v25, %v2449_v24  ;;  %v2485_v18 = vld [vmem:[%s6715_s5 + $0x928] sm:$0xff]  ;;  %v2480_v23 = vld [vmem:[%s6715_s5 + $0x900] sm:$0xff] }
 0x313   : > { %v4441_v33 = vpack.c.bf16 %v2455_v27, %v2451_v26  ;;  %v2483_v19 = vld [vmem:[%s6715_s5 + $0x918] sm:$0xff]  ;;  %v2484_v26 = vld [vmem:[%s6715_s5 + $0x920] sm:$0xff]  ;;  %v2482_v27 = vld [vmem:[%s6715_s5 + $0x910] sm:$0xff] }
 0x315   : > { %4276 = vmatpush1.bf16.msra.mxu0 %v4275_v35  ;;  %4424 = vmatpush1.bf16.msra.mxu1 %v4423_v36  ;;  %v2454_v35 = vld [vmem:[%s6715_s5 + $0x830] sm:$0xff]  ;;  %v2457_v36 = vld [vmem:[%s6715_s5 + $0x848] sm:$0xff] }
 0x316   : > { %4278 = vmatprep.subr.bf16.mxu0 %v4277_v39  ;;  %4426 = vmatprep.subr.bf16.mxu1 %v4425_v41  ;;  %v2463_v39 = vld [vmem:[%s6715_s5 + $0x878] sm:$0xff]  ;;  %v4295_v41 = vpack.c.bf16 %v2452_v31, %v2448_v30  ;;  %v4443_v42 = vpack.c.bf16 %v2454_v35, %v2450_v34  ;;  %v4297_v47 = vpack.c.bf16 %v2461_v37, %v2457_v36  ;;  %v2489_v31 = vld [vmem:[%s6715_s5 + $0x948] sm:$0xff]  ;;  %v2980_v34 = vld [vmem:[%s6717_s7 + $0x100] sm:$0xff] }
 0x317   : > { %v4445_v51 = vpack.c.bf16 %v2463_v39, %v2459_v38  ;;  %v2964_v35 = vld [vmem:[%s6717_s7 + $0x80] sm:$0xff]  ;;  %v2965_v36 = vld [vmem:[%s6717_s7 + $0x88] sm:$0xff] }
 0x318   : > { %v2981_v37 = vld [vmem:[%s6717_s7 + $0x108] sm:$0xff]  ;;  %v2948_v38 = vld [vmem:[%s6717_s7] sm:$0xff] }
 0x319   : > { %4280 = vmatpush1.bf16.msra.mxu0 %v4279_v52  ;;  %4428 = vmatpush1.bf16.msra.mxu1 %v4427_v53  ;;  %v2458_v52 = vld [vmem:[%s6715_s5 + $0x850] sm:$0xff]  ;;  %v2949_v39 = vld [vmem:[%s6717_s7 + $0x8] sm:$0xff] }
 0x31a   : > { %4282 = vmatprep.subr.bf16.mxu0 %v4281_v56  ;;  %4430 = vmatprep.subr.bf16.mxu1 %v4429_v57  ;;  %v2462_v53 = vld [vmem:[%s6715_s5 + $0x870] sm:$0xff]  ;;  %v2471_v56 = vld [vmem:[%s6715_s5 + $0x8b8] sm:$0xff]  ;;  %v4299_v57 = vpack.c.bf16 %v2460_v44, %v2456_v43  ;;  %v4461_v44 = vpack.c.bf16 %v2965_v36, %v2964_v35  ;;  %v2992_v35 = vld [vmem:[%s6717_s7 + $0x160] sm:$0xff] }
 0x31b   : > { %v4447_v58 = vpack.c.bf16 %v2462_v53, %v2458_v52  ;;  %v4449_v61 = vpack.c.bf16 %v2471_v56, %v2467_v55  ;;  %v2967_v43 = vld [vmem:[%s6717_s7 + $0x98] sm:$0xff]  ;;  %v4463_v52 = vpack.c.bf16 %v2949_v39, %v2948_v38  ;;  %v2968_v55 = vld [vmem:[%s6717_s7 + $0xa0] sm:$0xff]  ;;  %v2969_v56 = vld [vmem:[%s6717_s7 + $0xa8] sm:$0xff] }
 0x31c   : > { %v2983_v53 = vld [vmem:[%s6717_s7 + $0x118] sm:$0xff]  ;;  %v2993_v36 = vld [vmem:[%s6717_s7 + $0x168] sm:$0xff]  ;;  %v2994_v39 = vld [vmem:[%s6717_s7 + $0x170] sm:$0xff] }
 0x31d   : > { %4284 = vmatpush1.bf16.msra.mxu0 %v4283_v63  ;;  %4432 = vmatpush1.bf16.msra.mxu1 %v4431_v0  ;;  %v2470_v63 = vld [vmem:[%s6715_s5 + $0x8b0] sm:$0xff]  ;;  %v2473_v0 = vld [vmem:[%s6715_s5 + $0x8c8] sm:$0xff]  ;;  %v4512_v38 = vpack.c.bf16 %v2993_v36, %v2992_v35 }
 0x31e   : > { %4286 = vmatprep.subr.bf16.mxu0 %v4285_v5  ;;  %4434 = vmatprep.subr.bf16.mxu1 %v4433_v7  ;;  %v2479_v5 = vld [vmem:[%s6715_s5 + $0x8f8] sm:$0xff]  ;;  %v4303_v7 = vpack.c.bf16 %v2468_v60, %v2464_v59  ;;  %v4451_v8 = vpack.c.bf16 %v2470_v63, %v2466_v62  ;;  %v4305_v11 = vpack.c.bf16 %v2477_v1, %v2473_v0  ;;  %v2985_v60 = vld [vmem:[%s6717_s7 + $0x128] sm:$0xff]  ;;  %v2970_v63 = vld [vmem:[%s6717_s7 + $0xb0] sm:$0xff] }
 0x31f   : > { %v4453_v13 = vpack.c.bf16 %v2479_v5, %v2475_v4  ;;  %v2953_v62 = vld [vmem:[%s6717_s7 + $0x28] sm:$0xff]  ;;  %v2971_v0 = vld [vmem:[%s6717_s7 + $0xb8] sm:$0xff]  ;;  %v2986_v4 = vld [vmem:[%s6717_s7 + $0x130] sm:$0xff] }
 0x321   : > { %4288 = vmatpush1.bf16.msra.mxu0 %v4287_v16  ;;  %4436 = vmatpush1.bf16.msra.mxu1 %v4435_v17  ;;  %v2478_v16 = vld [vmem:[%s6715_s5 + $0x8f0] sm:$0xff]  ;;  %v2481_v17 = vld [vmem:[%s6715_s5 + $0x908] sm:$0xff] }
 0x322   : > { %4290 = vmatprep.subr.bf16.mxu0 %v4289_v20  ;;  %4438 = vmatprep.subr.bf16.mxu1 %v4437_v21  ;;  %v2487_v20 = vld [vmem:[%s6715_s5 + $0x938] sm:$0xff]  ;;  %v4307_v21 = vpack.c.bf16 %v2476_v10, %v2472_v9  ;;  %v4455_v22 = vpack.c.bf16 %v2478_v16, %v2474_v14  ;;  %v4309_v24 = vpack.c.bf16 %v2485_v18, %v2481_v17  ;;  %v2954_v9 = vld [vmem:[%s6717_s7 + $0x30] sm:$0xff]  ;;  %v2988_v16 = vld [vmem:[%s6717_s7 + $0x140] sm:$0xff] }
 0x323   : > { %v4457_v25 = vpack.c.bf16 %v2487_v20, %v2483_v19  ;;  %v2955_v10 = vld [vmem:[%s6717_s7 + $0x38] sm:$0xff]  ;;  %v2989_v18 = vld [vmem:[%s6717_s7 + $0x148] sm:$0xff]  ;;  %v2956_v20 = vld [vmem:[%s6717_s7 + $0x40] sm:$0xff] }
 0x324   : > { %v4475_v17 = vpack.c.bf16 %v2955_v10, %v2954_v9 }
 0x325   : > { %4292 = vmatpush1.bf16.msra.mxu0 %v4291_v28  ;;  %4440 = vmatpush1.bf16.msra.mxu1 %v4439_v29  ;;  %v2486_v28 = vld [vmem:[%s6715_s5 + $0x930] sm:$0xff]  ;;  %v4311_v29 = vpack.c.bf16 %v2484_v26, %v2480_v23  ;;  %v2975_v23 = vld [vmem:[%s6717_s7 + $0xd8] sm:$0xff] }
 0x326   : > { %4294 = vmatprep.subr.bf16.mxu0 %v4293_v32  ;;  %4442 = vmatprep.subr.bf16.mxu1 %v4441_v33  ;;  %v4459_v30 = vpack.c.bf16 %v2486_v28, %v2482_v27  ;;  %v2491_v32 = vld [vmem:[%s6715_s5 + $0x958] sm:$0xff]  ;;  %v2488_v33 = vld [vmem:[%s6715_s5 + $0x940] sm:$0xff] }
 0x327   : > { %v2991_v27 = vld [vmem:[%s6717_s7 + $0x158] sm:$0xff] }
 0x328   : > { %2654 = vmatmul.mubr.f32.vlgmr.msra.gmra.mrb[8].mxu0 %v2189_v46  ;;  %2867 = vmatmul.mubr.f32.vlgmr.msra.gmra.mrb[8].mxu1 %v2189_v46  ;;  %v2191_v46 = vmax.f32 %v5984_v2, 0.0  ;;  %v2951_v2 = vld [vmem:[%s6717_s7 + $0x18] sm:$0xff] }
 0x329   : > { %4296 = vmatpush1.bf16.msra.mxu0 %v4295_v41  ;;  %4444 = vmatpush1.bf16.msra.mxu1 %v4443_v42  ;;  %v2490_v41 = vld [vmem:[%s6715_s5 + $0x950] sm:$0xff]  ;;  %v4467_v59 = vpack.c.bf16 %v2951_v2, %v2950_v45  ;;  %v2979_v2 = vld [vmem:[%s6717_s7 + $0xf8] sm:$0xff] }
 0x32a   : > { %4298 = vmatprep.subr.bf16.mxu0 %v4297_v47  ;;  %4446 = vmatprep.subr.bf16.mxu1 %v4445_v51  ;;  %v2966_v42 = vld [vmem:[%s6717_s7 + $0x90] sm:$0xff]  ;;  %v4494_v47 = vpack.c.bf16 %v2981_v37, %v2980_v34 }
 0x32b   : > { %2724 = vmatprep.mubr.f32.mxu0 %v4672_v6  ;;  %2937 = vmatprep.mubr.f32.mxu1 %v4672_v6  ;;  %v2982_v51 = vld [vmem:[%s6717_s7 + $0x110] sm:$0xff]  ;;  %v4465_v54 = vpack.c.bf16 %v2967_v43, %v2966_v42  ;;  %v2996_v43 = vld [vmem:[%s6717_s7 + $0x180] sm:$0xff] }
 0x32d   : > { %4300 = vmatpush1.bf16.msra.mxu0 %v4299_v57  ;;  %4448 = vmatpush1.bf16.msra.mxu1 %v4447_v58  ;;  %v4497_v57 = vpack.c.bf16 %v2983_v53, %v2982_v51  ;;  %v2984_v58 = vld [vmem:[%s6717_s7 + $0x120] sm:$0xff]  ;;  %v2961_v51 = vld [vmem:[%s6717_s7 + $0x68] sm:$0xff]  ;;  %v2998_v53 = vld [vmem:[%s6717_s7 + $0x190] sm:$0xff] }
 0x32e   : > { %4302 = vmatprep.subr.bf16.mxu0 %v4301_v15  ;;  %4450 = vmatprep.subr.bf16.mxu1 %v4449_v61  ;;  %v4469_v15 = vpack.c.bf16 %v2969_v56, %v2968_v55  ;;  %v2952_v61 = vld [vmem:[%s6717_s7 + $0x20] sm:$0xff]  ;;  %v4500_v1 = vpack.c.bf16 %v2985_v60, %v2984_v58  ;;  %v2962_v56 = vld [vmem:[%s6717_s7 + $0x70] sm:$0xff] }
 0x32f   : > { %v4471_v5 = vpack.c.bf16 %v2953_v62, %v2952_v61  ;;  %v2492_v60 = vld [vmem:[%s6716_s6] sm:$0xf] }
 0x330   : > { %v2505_v61 = vrot.slane %v2492_v60, %v2167_v40  ;;  %v2509_v62 = vrot.slane %v2492_v60, %v2171_v50  ;;  %v3001_v50 = vld [vmem:[%s6718_s8] sm:$0x1] }
 0x331   : > { %4304 = vmatpush1.bf16.msra.mxu0 %v4303_v7  ;;  %4452 = vmatpush1.bf16.msra.mxu1 %v4451_v8  ;;  %v2987_v7 = vld [vmem:[%s6717_s7 + $0x138] sm:$0xff]  ;;  %v4473_v8 = vpack.c.bf16 %v2971_v0, %v2970_v63 }
 0x332   : > { %4306 = vmatprep.subr.bf16.mxu0 %v4305_v11  ;;  %4454 = vmatprep.subr.bf16.mxu1 %v4453_v13  ;;  %v2972_v11 = vld [vmem:[%s6717_s7 + $0xc0] sm:$0xff]  ;;  %v2973_v13 = vld [vmem:[%s6717_s7 + $0xc8] sm:$0xff]  ;;  %v4503_v14 = vpack.c.bf16 %v2987_v7, %v2986_v4 }
 0x333   : > { %v4477_v19 = vpack.c.bf16 %v2973_v13, %v2972_v11 }
 0x335   : > { %4308 = vmatpush1.bf16.msra.mxu0 %v4307_v21  ;;  %4456 = vmatpush1.bf16.msra.mxu1 %v4455_v22  ;;  %v2957_v21 = vld [vmem:[%s6717_s7 + $0x48] sm:$0xff]  ;;  %v2974_v22 = vld [vmem:[%s6717_s7 + $0xd0] sm:$0xff] }
 0x336   : > { %4310 = vmatprep.subr.bf16.mxu0 %v4309_v24  ;;  %4458 = vmatprep.subr.bf16.mxu1 %v4457_v25  ;;  %v4506_v24 = vpack.c.bf16 %v2989_v18, %v2988_v16  ;;  %v2990_v25 = vld [vmem:[%s6717_s7 + $0x150] sm:$0xff]  ;;  %v4479_v26 = vpack.c.bf16 %v2957_v21, %v2956_v20  ;;  %v4481_v28 = vpack.c.bf16 %v2975_v23, %v2974_v22 }
 0x339   : > { %4312 = vmatpush1.bf16.msra.mxu0 %v4311_v29  ;;  %4460 = vmatpush1.bf16.msra.mxu1 %v4459_v30  ;;  %v2958_v29 = vld [vmem:[%s6717_s7 + $0x50] sm:$0xff]  ;;  %v2959_v30 = vld [vmem:[%s6717_s7 + $0x58] sm:$0xff] }
 0x33a   : > { %2680 = vmatprep.subr.mxu0 %v2489_v31  ;;  %2893 = vmatprep.subr.mxu1 %v2491_v32  ;;  %v2976_v31 = vld [vmem:[%s6717_s7 + $0xe0] sm:$0xff]  ;;  %v2977_v32 = vld [vmem:[%s6717_s7 + $0xe8] sm:$0xff]  ;;  %v4483_v34 = vpack.c.bf16 %v2959_v30, %v2958_v29 }
 0x33b   : > { %v4485_v37 = vpack.c.bf16 %v2977_v32, %v2976_v31 }
 0x33d   : > { %2681 = vmatpush1.msra.mxu0 %v2488_v33  ;;  %2894 = vmatpush1.msra.mxu1 %v2490_v41  ;;  %v4509_v33 = vpack.c.bf16 %v2991_v27, %v2990_v25  ;;  %v2995_v41 = vld [vmem:[%s6717_s7 + $0x178] sm:$0xff] }
 0x33e   : > { %3404 = vmatmul.mubr.msk.f32.vlgmr.msra.gmra.mrb[8].mxu0 %vm2514_vm3, %v2191_v46  ;;  %3405 = vmatmul.mubr.msk.f32.vlgmr.msra.gmra.mrb[8].mxu1 %vm2514_vm3, %v2191_v46  ;;  %v4515_v42 = vpack.c.bf16 %v2995_v41, %v2994_v39 }
 0x33f   : > { %4493 = vmatprep.subr.bf16.mxu1 %v4670_v3  ;;  %4462 = vmatprep.subr.bf16.mxu0 %v4461_v44  ;;  %v2997_v44 = vld [vmem:[%s6717_s7 + $0x188] sm:$0xff] }
 0x340   : > { %4495 = vmatpush1.bf16.msra.mxu1 %v4494_v47  ;;  %4464 = vmatpush3.bf16.msra.mxu0 %v4463_v52  ;;  %v4518_v46 = vpack.c.bf16 %v2997_v44, %v2996_v43  ;;  %v2960_v47 = vld [vmem:[%s6717_s7 + $0x60] sm:$0xff] }
 0x341   : > { %4496 = vmatprep.subr.bf16.mxu1 %v4670_v3  ;;  %4466 = vmatprep.subr.bf16.mxu0 %v4465_v54  ;;  %v4487_v52 = vpack.c.bf16 %v2961_v51, %v2960_v47  ;;  %v2999_v54 = vld [vmem:[%s6717_s7 + $0x198] sm:$0xff] }
 0x342   : > { %v4521_v45 = vpack.c.bf16 %v2999_v54, %v2998_v53 }
 0x344   : > { %4498 = vmatpush1.bf16.msra.mxu1 %v4497_v57  ;;  %4468 = vmatpush3.bf16.msra.mxu0 %v4467_v59  ;;  %v2963_v57 = vld [vmem:[%s6717_s7 + $0x78] sm:$0xff]  ;;  %v3000_v59 = vld [vmem:[%s6717_s7 + $0x1a0] sm:$0xf] }
 0x345   : > { %4499 = vmatprep.subr.bf16.mxu1 %v4670_v3  ;;  %4470 = vmatprep.subr.bf16.mxu0 %v4469_v15  ;;  %v4491_v58 = vpack.c.bf16 %v2963_v57, %v2962_v56  ;;  %v2497_v15 = vrot.slane %v2492_v60, %v2159_v48 }
 0x348   : > { %4501 = vmatpush1.bf16.msra.mxu1 %v4500_v1  ;;  %4472 = vmatpush3.bf16.msra.mxu0 %v4471_v5 }
 0x349   : > { %4502 = vmatprep.subr.bf16.mxu1 %v4670_v3  ;;  %4474 = vmatprep.subr.bf16.mxu0 %v4473_v8 }
 0x34c   : > { %4504 = vmatpush1.bf16.msra.mxu1 %v4503_v14  ;;  %4476 = vmatpush3.bf16.msra.mxu0 %v4475_v17 }
 0x34d   : > { %4505 = vmatprep.subr.bf16.mxu1 %v4670_v3  ;;  %4478 = vmatprep.subr.bf16.mxu0 %v4477_v19 }
 0x350   : > { %4507 = vmatpush1.bf16.msra.mxu1 %v4506_v24  ;;  %4480 = vmatpush3.bf16.msra.mxu0 %v4479_v26 }
 0x351   : > { %4508 = vmatprep.subr.bf16.mxu1 %v4670_v3  ;;  %4482 = vmatprep.subr.bf16.mxu0 %v4481_v28 }
 0x354   : > { %4510 = vmatpush1.bf16.msra.mxu1 %v4509_v33  ;;  %4484 = vmatpush3.bf16.msra.mxu0 %v4483_v34 }
 0x355   : > { %4511 = vmatprep.subr.bf16.mxu1 %v4670_v3  ;;  %4486 = vmatprep.subr.bf16.mxu0 %v4485_v37 }
 0x358   : > { %4513 = vmatpush1.bf16.msra.mxu1 %v4512_v38  ;;  %4488 = vmatpush3.bf16.msra.mxu0 %v4487_v52 }
 0x359   : > { %4514 = vmatprep.subr.bf16.mxu1 %v4670_v3 }
 0x35c   : > { %4516 = vmatpush1.bf16.msra.mxu1 %v4515_v42 }
 0x35d   : > { %4517 = vmatprep.subr.bf16.mxu1 %v4670_v3 }
 0x360   : > { %4519 = vmatpush1.bf16.msra.mxu1 %v4518_v46 }
 0x361   : > { %4520 = vmatprep.subr.bf16.mxu1 %v4670_v3  ;;  %v2978_v3 = vld [vmem:[%s6717_s7 + $0xf0] sm:$0xff] }
 0x362   : > { %v4489_v55 = vpack.c.bf16 %v2979_v2, %v2978_v3 }
 0x364   : > { %4522 = vmatpush1.bf16.msra.mxu1 %v4521_v45  ;;  %4490 = vmatprep.subr.bf16.mxu0 %v4489_v55 }
 0x365   : > { %3120 = vmatprep.subr.mxu1 %v4672_v6  ;;  %4492 = vmatpush3.bf16.msra.mxu0 %v4491_v58  ;;  %v2501_v6 = vrot.slane %v2492_v60, %v2163_v49 }
 0x368   : > { %3406 = vmatpush1.msk.msra.mxu1 %vm3006_vm4, %v3000_v59 }
 0x411   : > { %v2726_v63 = vpop.f32.mrb[8].mxu0  ;;  %v2939_v0 = vpop.f32.mrb[8].mxu1 }
 0x412   : > { %v4523_v1 = vadd.f32 %v2726_v63, %v2497_v15  ;;  %v4525_v4 = vadd.f32 %v2939_v0, %v2505_v61  ;;  %v2728_v5 = vpop.f32.mrb[9].mxu0  ;;  %v2941_v7 = vpop.f32.mrb[9].mxu1 }
 0x413   : > { %v4524_v8 = vadd.f32 %v2728_v5, %v2501_v6  ;;  %v4526_v9 = vadd.f32 %v2941_v7, %v2509_v62 }
 0x414   : > { %v2944_v40 = vmax.f32 %v4523_v1, 0.0  ;;  %v2946_v11 = vmax.f32 %v4525_v4, 0.0 }
 0x415   : > { %v2945_v48 = vmax.f32 %v4524_v8, 0.0  ;;  %v2947_v10 = vmax.f32 %v4526_v9, 0.0 }
 0x417   : > { %3074 = vmatprep.mubr.f32.mxu0 %v2945_v48  ;;  %3407 = vmatprep.mubr.msk.f32.mxu1 %vm3002_vm5, %v2947_v10 }
 0x418   : > { %3075 = vmatmul.mubr.f32.vlgmr.msra.gmra.mrb[10].mxu0 %v2944_v40  ;;  %3145 = vmatmul.mubr.f32.vlgmr.msra.gmra.mrb[10].mxu1 %v2946_v11 }
 0x4eb   : > { %v3580_v12 = vpop.f32.mrb[10].mxu0  ;;  %v3146_v49 = vpop.f32.mrb[10].mxu1 }
 0x4ec   : > { %v3581_v13 = vpop.f32.mrb[11].mxu0  ;;  %v3148_v14 = vpop.f32.mrb[11].mxu1 }
 0x4ed   : > { %v3582_v16 = vadd.f32 %v3581_v13, %v3580_v12 }
 0x4ef   : > { %v3077_v17 = vadd.f32 %v3582_v16, %v3001_v50 }
 0x4f1   : > { %v3147_v18 = vadd.f32 %v3146_v49, %v3077_v17 }
 0x4f3   : > { %3150 = vst [vmem:[%s324_s25] sm:$0x1] %v3147_v18 }
 0x4f4   : > { %4619 = shalt.err (!%p4616_p3)
}
 0x4f5   : > { %s4620_s21 = scalar_lea.hbm %s6668_s29, 16  ;;  %s4624_s25 = scalar_lea.hbm %s6719_s9, 32 }
 0x4f6   : > { %p4621_p4 = scmp.ne.s32.totalorder %s6668_s29, %s4620_s21  ;;  %p4625_p9 = scmp.lt.u32.totalorder %s6668_s29, %s6719_s9 }
 0x4f7   : > { %p4626_p10 = scmp.lt.u32.totalorder %s4624_s25, %s4620_s21  ;;  %p4628_p12 = scmp.lt.u32.totalorder %s4620_s21, %s6668_s29 }
 0x4f8   : > { %p4622_p7 = pnand %p4621_p4, %p4763_p5 }
 0x4f9   : > { %p4627_p11 = por %p4626_p10, %p4625_p9 }
 0x4fa   : > { %p4623_p8 = pneg %p4622_p7 }
 0x4fb   : > { %p4629_p13 = por %p4628_p12, %p4627_p11 }
 0x4fd   : > { %p4630_p0 = pnand %p4629_p13, %p4623_p8 }
 0x4ff   : > { %4633 = shalt.err (!%p4630_p0)
}
 0x500   : > { %4563 = dma.vmem_to_hbm [thread:$0]  (%p4763_p5), %s6670_s26, 16, %s6668_s29, %s3152_s14  }
 0x501 PF: > { %p4569_p1 = scmp.ge.s32.totalorder %s4668_s12, 2  ;;  %s3176_s16 = sand.u32 1, %s4656_s30  }
 0x502   : > { %s3177_s13 = scalar_lea.sflag [#allocation3], %s3176_s16 }
 0x503   : > { %p4566_p2 = pnand %p4569_p1, %p4767_p6 }
 0x505   : > { %4651 = dma.done.wait (!%p4566_p2), %s3177_s13, 16  }
 0x506   : > { %4653 = vsyncadd (!%p4566_p2), %s3177_s13, 4294967280  ;;  %p19_p3 = scmp.ge.s32.totalorder %s4750_s15, 4   ;;  %s6722_s30 = smov %s4660_s10 }
 0x507   : > { %s6723_s10 = smov %s4664_s11  ;;  %s6724_s11 = smov %s4761_s18 }
 0x508   : > { %s6725_s12 = smov %s4750_s15  ;;  %21 = sbr.rel (!%p19_p3) target bundleno = 3 (0x3), region = 98 }
 0x50f   :  { %3181 = vsyncpa [#allocation3], 1 }
 0x510   :  { %3183 = vsyncpa [#allocation3 + $0x1], 1 }

</bundles_post_ra>
